<compile_context>
chip_gen: v7x
topology: tpu7x:2x2x1
jax: 0.10.0
libtpu: 0.0.40
codegen_flags: <defaults>
</compile_context>

<pallas_src>
import functools
import math

import jax
import jax.numpy as jnp
from jax import lax
from jax.experimental import pallas as pl
from jax.experimental.pallas import tpu as pltpu

NEG_SLOPE = 0.2
LANE = 128


def _leaky(x):
    return jnp.where(x > 0, x, NEG_SLOPE * x)


def _rup(n, m=LANE):
    return ((n + m - 1) // m) * m


def _pad2(a, rows, cols):
    return jnp.pad(a, ((0, rows - a.shape[0]), (0, cols - a.shape[1])))


# --------------------------------------------------------------------------
# Kernel 1: negative squared pairwise distance of the (padded) input points.
# f32 on purpose: keeps the kNN selection bit-stable; negligible cost here.
# --------------------------------------------------------------------------
def _pdist_kernel(x_ref, o_ref):
    x = x_ref[0]                                               # [N, CP]
    N = x.shape[0]
    sq = jnp.sum(x * x, axis=-1, keepdims=True)                # [N, 1]
    inner = lax.dot_general(x, x, (((1,), (1,)), ((), ())),
                            preferred_element_type=jnp.float32)  # [N, N]
    nd = 2.0 * inner - sq - jnp.transpose(sq)
    r = lax.broadcasted_iota(jnp.int32, (N, N), 0)
    c = lax.broadcasted_iota(jnp.int32, (N, N), 1)
    o_ref[0] = jnp.where(r == c, 0.0, nd)                      # exact self-dist


def pairwise_neg_dist(x_pad):
    bs, N, CP = x_pad.shape
    return pl.pallas_call(
        _pdist_kernel,
        out_shape=jax.ShapeDtypeStruct((bs, N, N), jnp.float32),
        grid=(bs,),
        in_specs=[pl.BlockSpec((1, N, CP), lambda b: (b, 0, 0))],
        out_specs=pl.BlockSpec((1, N, N), lambda b: (b, 0, 0)),
        compiler_params=pltpu.CompilerParams(dimension_semantics=("parallel",)),
    )(x_pad)


# --------------------------------------------------------------------------
# Kernel 2: fused edge-conv 1 (gather + delta/center MLP + max over k)
#           + pairwise distance of x1 for the second kNN.
# --------------------------------------------------------------------------
def _edgeconv1_kernel(x_ref, idx_ref, w1d_ref, w1c_ref, b1a_ref, w1b_ref,
                      b1b_ref, x1_ref, nd_ref):
    N = x_ref.shape[1]
    C = x_ref.shape[2]
    k = idx_ref.shape[1]

    x = x_ref[0]                                               # [N, C] f32
    idx_t = idx_ref[0]                                         # [k, N] int32

    # In-kernel kNN gather as a one-hot MXU matmul (row order: (j, n)).
    iota_m = lax.broadcasted_iota(jnp.int32, (k, N, N), 2)
    oh = (idx_t[:, :, None] == iota_m).astype(jnp.float32).reshape(k * N, N)
    nb = jnp.dot(oh, x, preferred_element_type=jnp.float32)    # [k*N, C]
    delta = (nb.reshape(k, N, C) - x[None, :, :]).reshape(k * N, C)

    # Layer 1, split-weight form: center part computed once per point.
    H = w1d_ref.shape[1]
    hc = jnp.dot(x.astype(jnp.bfloat16), w1c_ref[...],
                 preferred_element_type=jnp.float32) + b1a_ref[...]     # [N, H]
    hd = jnp.dot(delta.astype(jnp.bfloat16), w1d_ref[...],
                 preferred_element_type=jnp.float32)                    # [k*N, H]
    h = _leaky((hd.reshape(k, N, H) + hc[None, :, :]).reshape(k * N, H))

    # Layer 2.
    y = _leaky(jnp.dot(h.astype(jnp.bfloat16), w1b_ref[...],
                       preferred_element_type=jnp.float32) + b1b_ref[...])
    Co = y.shape[1]
    x1 = jnp.max(y.reshape(k, N, Co), axis=0)                  # [N, Co]
    x1_ref[0] = x1

    # Fused pairwise negative squared distance of x1 (next kNN).
    sq = jnp.sum(x1 * x1, axis=-1, keepdims=True)
    inner = lax.dot_general(x1, x1, (((1,), (1,)), ((), ())),
                            preferred_element_type=jnp.float32)
    nd = 2.0 * inner - sq - jnp.transpose(sq)
    r = lax.broadcasted_iota(jnp.int32, (N, N), 0)
    c = lax.broadcasted_iota(jnp.int32, (N, N), 1)
    nd_ref[0] = jnp.where(r == c, 0.0, nd)


def edgeconv1(x_pad, idx_t, p1):
    bs, N, CP0 = x_pad.shape
    k = idx_t.shape[1]
    w1d, w1c, b1a, w1b, b1b = p1
    H1P, C1P = w1d.shape[1], w1b.shape[1]

    def wspec(r, c):
        return pl.BlockSpec((r, c), lambda b: (0, 0))

    return pl.pallas_call(
        _edgeconv1_kernel,
        out_shape=(jax.ShapeDtypeStruct((bs, N, C1P), jnp.float32),
                   jax.ShapeDtypeStruct((bs, N, N), jnp.float32)),
        grid=(bs,),
        in_specs=[
            pl.BlockSpec((1, N, CP0), lambda b: (b, 0, 0)),
            pl.BlockSpec((1, k, N), lambda b: (b, 0, 0)),
            wspec(CP0, H1P), wspec(CP0, H1P), wspec(1, H1P),
            wspec(H1P, C1P), wspec(1, C1P),
        ],
        out_specs=[pl.BlockSpec((1, N, C1P), lambda b: (b, 0, 0)),
                   pl.BlockSpec((1, N, N), lambda b: (b, 0, 0))],
        compiler_params=pltpu.CompilerParams(dimension_semantics=("parallel",)),
    )(x_pad, idx_t, w1d, w1c, b1a, w1b, b1b)


# --------------------------------------------------------------------------
# Kernel 3: fused edge-conv 2 (gather + MLP + max over k) + conv3 on
# concat(x1, x2) in split-weight form (no concat materialized).
# --------------------------------------------------------------------------
def _edgeconv2_conv3_kernel(x1_ref, idx_ref,
                            w2d_ref, w2c_ref, b2a_ref, w2b_ref, b2b_ref,
                            w3x1_ref, w3x2_ref, b3a_ref, w3b_ref, b3b_ref,
                            out_ref):
    N = x1_ref.shape[1]
    C1 = x1_ref.shape[2]
    k = idx_ref.shape[1]

    x1 = x1_ref[0]                                             # [N, C1] f32
    idx_t = idx_ref[0]                                         # [k, N]

    iota_m = lax.broadcasted_iota(jnp.int32, (k, N, N), 2)
    oh = (idx_t[:, :, None] == iota_m).astype(jnp.float32).reshape(k * N, N)
    nb = jnp.dot(oh, x1, preferred_element_type=jnp.float32)   # [k*N, C1]
    delta = (nb.reshape(k, N, C1) - x1[None, :, :]).reshape(k * N, C1)

    # conv2, layer 1 (split-weight) + layer 2 + max over k.
    H2 = w2d_ref.shape[1]
    hc = jnp.dot(x1.astype(jnp.bfloat16), w2c_ref[...],
                 preferred_element_type=jnp.float32) + b2a_ref[...]
    hd = jnp.dot(delta.astype(jnp.bfloat16), w2d_ref[...],
                 preferred_element_type=jnp.float32)
    h = _leaky((hd.reshape(k, N, H2) + hc[None, :, :]).reshape(k * N, H2))
    y = _leaky(jnp.dot(h.astype(jnp.bfloat16), w2b_ref[...],
                       preferred_element_type=jnp.float32) + b2b_ref[...])
    C2 = y.shape[1]
    x2 = jnp.max(y.reshape(k, N, C2), axis=0)                  # [N, C2]

    # conv3 on concat(x1, x2): split-weight avoids materializing the concat.
    z = _leaky(
        jnp.dot(x1.astype(jnp.bfloat16), w3x1_ref[...],
                preferred_element_type=jnp.float32)
        + jnp.dot(x2.astype(jnp.bfloat16), w3x2_ref[...],
                  preferred_element_type=jnp.float32)
        + b3a_ref[...])
    out = _leaky(jnp.dot(z.astype(jnp.bfloat16), w3b_ref[...],
                         preferred_element_type=jnp.float32) + b3b_ref[...])
    out_ref[0] = out                                           # lane-dense store


def edgeconv2_conv3(x1_pad, idx_t, p2, p3):
    bs, N, C1P = x1_pad.shape
    k = idx_t.shape[1]
    w2d, w2c, b2a, w2b, b2b = p2
    w3x1, w3x2, b3a, w3b, b3b = p3
    H2P, C2P = w2d.shape[1], w2b.shape[1]
    H3P, OUTP = w3x1.shape[1], w3b.shape[1]

    def wspec(r, c):
        return pl.BlockSpec((r, c), lambda b: (0, 0))

    return pl.pallas_call(
        _edgeconv2_conv3_kernel,
        out_shape=jax.ShapeDtypeStruct((bs, N, OUTP), jnp.float32),
        grid=(bs,),
        in_specs=[
            pl.BlockSpec((1, N, C1P), lambda b: (b, 0, 0)),
            pl.BlockSpec((1, k, N), lambda b: (b, 0, 0)),
            wspec(C1P, H2P), wspec(C1P, H2P), wspec(1, H2P),
            wspec(H2P, C2P), wspec(1, C2P),
            wspec(C1P, H3P), wspec(C2P, H3P), wspec(1, H3P),
            wspec(H3P, OUTP), wspec(1, OUTP),
        ],
        out_specs=pl.BlockSpec((1, N, OUTP), lambda b: (b, 0, 0)),
        compiler_params=pltpu.CompilerParams(dimension_semantics=("parallel",)),
    )(x1_pad, idx_t, w2d, w2c, b2a, w2b, b2b, w3x1, w3x2, b3a, w3b, b3b)


# --------------------------------------------------------------------------
# Parameters (deterministic; channel arithmetic matches GCNEncoder.__init__)
# --------------------------------------------------------------------------
def gcn_dims(emb_in, emb_out):
    emb_inc = (emb_out / (4 * emb_in)) ** 0.25
    l1_0 = emb_in * 2
    l1_1 = int(l1_0 * emb_inc)
    l1_2 = int(l1_0 * emb_inc ** 2)
    l2_0 = l1_2 * 2
    l2_1 = int(l2_0 * emb_inc)
    l2_2 = emb_out
    l3_0 = l2_2 + l1_2
    l3_1 = int((emb_out / l3_0) ** 0.5 * l3_0)
    l3_2 = emb_out
    return (l1_0, l1_1, l1_2), (l2_0, l2_1, l2_2), (l3_0, l3_1, l3_2)


def _init_layer(key, cin, cout):
    kw, kb = jax.random.split(key)
    w = jax.random.normal(kw, (cin, cout), jnp.float32) * math.sqrt(2.0 / cin)
    b = jax.random.normal(kb, (1, cout), jnp.float32) * 0.01
    return w, b


def init_params(key, dn_in, dn_out):
    c1, c2, c3 = gcn_dims(dn_in, dn_out)
    keys = jax.random.split(key, 6)
    params = {}
    for name, ch, ks in (("conv1", c1, keys[0:2]),
                         ("conv2", c2, keys[2:4]),
                         ("conv3", c3, keys[4:6])):
        w_a, b_a = _init_layer(ks[0], ch[0], ch[1])
        w_b, b_b = _init_layer(ks[1], ch[1], ch[2])
        params[name] = (w_a, b_a, w_b, b_b)
    return params


def pack_params(params, emb_in, emb_out):
    """Split first-layer weights into delta/center halves, zero-pad every
    channel dim to a multiple of 128, cast weights to bf16 (biases stay f32)."""
    c1, c2, c3 = gcn_dims(emb_in, emb_out)
    CP0 = _rup(emb_in)
    H1P, C1P = _rup(c1[1]), _rup(c1[2])
    H2P, C2P = _rup(c2[1]), _rup(c2[2])
    H3P, OUTP = _rup(c3[1]), _rup(c3[2])
    bf16 = jnp.bfloat16

    w1a, b1a, w1b, b1b = params["conv1"]     # w1a: [2*emb_in, l1_1]
    w2a, b2a, w2b, b2b = params["conv2"]     # w2a: [2*l1_2, l2_1]
    w3a, b3a, w3b, b3b = params["conv3"]     # w3a: [l1_2 + l2_2, l3_1]

    return {
        "conv1": (_pad2(w1a[:emb_in], CP0, H1P).astype(bf16),
                  _pad2(w1a[emb_in:], CP0, H1P).astype(bf16),
                  _pad2(b1a, 1, H1P),
                  _pad2(w1b, H1P, C1P).astype(bf16),
                  _pad2(b1b, 1, C1P)),
        "conv2": (_pad2(w2a[:c1[2]], C1P, H2P).astype(bf16),
                  _pad2(w2a[c1[2]:], C1P, H2P).astype(bf16),
                  _pad2(b2a, 1, H2P),
                  _pad2(w2b, H2P, C2P).astype(bf16),
                  _pad2(b2b, 1, C2P)),
        "conv3": (_pad2(w3a[:c1[2]], C1P, H3P).astype(bf16),   # rows for x1
                  _pad2(w3a[c1[2]:], C2P, H3P).astype(bf16),   # rows for x2
                  _pad2(b3a, 1, H3P),
                  _pad2(w3b, H3P, OUTP).astype(bf16),
                  _pad2(b3b, 1, OUTP)),
    }


# --------------------------------------------------------------------------
# DenseUpdate.forward
# --------------------------------------------------------------------------
def dense_update_forward(dense_fea, packed, emb_out, n_near=10):
    # dense_fea: [bs, emb, n_stk, n_stk_pnt]  (PyTorch NCHW-style)
    bs, emb, n_stk, n_stk_pnt = dense_fea.shape
    N = n_stk * n_stk_pnt
    CP0 = packed["conv1"][0].shape[0]

    x_pts = jnp.transpose(dense_fea.reshape(bs, emb, N), (0, 2, 1))   # [bs,N,emb]
    x_pad = jnp.pad(x_pts, ((0, 0), (0, 0), (0, CP0 - emb)))          # lane-pad

    # kNN 1 — distance matmul in Pallas; top_k stays in JAX.
    # TODO(synk): lax.top_k (sorting) has no Pallas/Mosaic lowering; kept as glue.
    nd1 = pairwise_neg_dist(x_pad)
    _, idx1 = lax.top_k(nd1, n_near)                                  # [bs,N,k]
    idx1_t = jnp.transpose(idx1, (0, 2, 1)).astype(jnp.int32)         # [bs,k,N]

    # Fused edge-conv1 (+ distance matrix of x1 for kNN 2).
    x1_pad, nd2 = edgeconv1(x_pad, idx1_t, packed["conv1"])

    _, idx2 = lax.top_k(nd2, n_near)
    idx2_t = jnp.transpose(idx2, (0, 2, 1)).astype(jnp.int32)

    # Fused edge-conv2 + conv3.
    out_pad = edgeconv2_conv3(x1_pad, idx2_t, packed["conv2"], packed["conv3"])

    out = jnp.transpose(out_pad[:, :, :emb_out], (0, 2, 1))
    return out.reshape(bs, emb_out, n_stk, n_stk_pnt)


if __name__ == "__main__":
    key = jax.random.PRNGKey(0)
    k_in, k_par = jax.random.split(key)

    bs, emb, n_stk, n_stk_pnt = 2, 4, 4, 8      # n_point = 32
    dn_out, n_near = 32, 10

    dense_fea = jax.random.normal(k_in, (bs, emb, n_stk, n_stk_pnt), jnp.float32)
    raw_params = init_params(k_par, emb, dn_out)
    packed = pack_params(raw_params, emb, dn_out)

    fwd = jax.jit(functools.partial(dense_update_forward,
                                    emb_out=dn_out, n_near=n_near))
    out = fwd(dense_fea, packed)
    out = jax.block_until_ready(out)

    assert out.shape == (bs, dn_out, n_stk, n_stk_pnt), out.shape
    assert bool(jnp.all(jnp.isfinite(out)))
    print("KERNEL_OK")
</pallas_src>

<mosaic_0001>
module attributes {stable_mosaic.version = 11 : i64} {
  func.func @_pdist_kernel(%arg0: i32, %arg1: memref<1x32x128xf32, #tpu.memory_space<vmem>>, %arg2: memref<1x32x32xf32, #tpu.memory_space<vmem>>) attributes {dimension_semantics = [#tpu.dimension_semantics<parallel>], iteration_bounds = array<i64: 2>, scalar_prefetch = 0 : i64, scratch_operands = 0 : i64, tpu.core_type = #tpu.core_type<tc>, window_params = [{transform_indices = @transform_0, window_bounds = array<i64: 1, 32, 128>}, {transform_indices = @transform_1, window_bounds = array<i64: 1, 32, 32>}]} {
    %c0 = arith.constant 0 : index
    %c0_0 = arith.constant 0 : index
    %c0_1 = arith.constant 0 : index
    %0 = vector.load %arg1[%c0, %c0_0, %c0_1] : memref<1x32x128xf32, #tpu.memory_space<vmem>>, vector<1x32x128xf32>
    %1 = vector.shape_cast %0 : vector<1x32x128xf32> to vector<32x128xf32>
    %2 = arith.mulf %1, %1 : vector<32x128xf32>
    %cst = arith.constant dense<0.000000e+00> : vector<32xf32>
    %3 = vector.multi_reduction <add>, %2, %cst [1] : vector<32x128xf32> to vector<32xf32>
    %4 = vector.shape_cast %3 : vector<32xf32> to vector<32x1xf32>
    %cst_2 = arith.constant dense<0.000000e+00> : vector<32x32xf32>
    %5 = tpu.matmul %1, %1, %cst_2 {dimension_numbers = #tpu.dot_dimension_numbers<[1], [1], [0], [0], [0, 0, 1, 0], [], []>} : vector<32x128xf32>, vector<32x128xf32>, vector<32x32xf32> -> vector<32x32xf32>
    %cst_3 = arith.constant 2.000000e+00 : f32
    %6 = vector.broadcast %cst_3 : f32 to vector<32x32xf32>
    %7 = arith.mulf %6, %5 : vector<32x32xf32>
    %8 = vector.broadcast %4 : vector<32x1xf32> to vector<32x32xf32>
    %9 = arith.subf %7, %8 : vector<32x32xf32>
    %10 = tpu.transpose %4, [1, 0] : vector<32x1xf32> -> vector<1x32xf32>
    %11 = vector.broadcast %10 : vector<1x32xf32> to vector<32x32xf32>
    %12 = arith.subf %9, %11 : vector<32x32xf32>
    %13 = tpu.iota {dimensions = array<i32: 0>} : vector<32x32xi32>
    %14 = tpu.iota {dimensions = array<i32: 1>} : vector<32x32xi32>
    %15 = arith.cmpi eq, %13, %14 : vector<32x32xi32>
    %cst_4 = arith.constant 0.000000e+00 : f32
    %16 = vector.broadcast %cst_4 : f32 to vector<32x32xf32>
    %17 = arith.select %15, %16, %12 : vector<32x32xi1>, vector<32x32xf32>
    %c0_5 = arith.constant 0 : index
    %c0_6 = arith.constant 0 : index
    %c0_7 = arith.constant 0 : index
    %18 = vector.load %arg2[%c0_5, %c0_6, %c0_7] : memref<1x32x32xf32, #tpu.memory_space<vmem>>, vector<1x32x32xf32>
    %19 = vector.shape_cast %18 : vector<1x32x32xf32> to vector<32x32xf32>
    %20 = vector.shape_cast %17 : vector<32x32xf32> to vector<1x32x32xf32>
    tpu.vector_store %arg2[%c0_5, %c0_6, %c0_7], %20 {strides = array<i32>} : memref<1x32x32xf32, #tpu.memory_space<vmem>>, vector<1x32x32xf32>,
    return
  }
  func.func @transform_0(%arg0: i32) -> (i32, i32, i32) {
    %c0_i32 = arith.constant 0 : i32
    %c0_i32_0 = arith.constant 0 : i32
    %c0_i32_1 = arith.constant 0 : i32
    return %arg0, %c0_i32, %c0_i32_0 : i32, i32, i32
  }
  func.func @transform_1(%arg0: i32) -> (i32, i32, i32) {
    %c0_i32 = arith.constant 0 : i32
    %c0_i32_0 = arith.constant 0 : i32
    %c0_i32_1 = arith.constant 0 : i32
    return %arg0, %c0_i32, %c0_i32_0 : i32, i32, i32
  }
}

module attributes {stable_mosaic.version = 11 : i64} {
  func.func @_edgeconv1_kernel(%arg0: i32, %arg1: memref<1x32x128xf32, #tpu.memory_space<vmem>>, %arg2: memref<1x10x32xi32, #tpu.memory_space<vmem>>, %arg3: memref<128x128xbf16, #tpu.memory_space<vmem>>, %arg4: memref<128x128xbf16, #tpu.memory_space<vmem>>, %arg5: memref<1x128xf32, #tpu.memory_space<vmem>>, %arg6: memref<128x128xbf16, #tpu.memory_space<vmem>>, %arg7: memref<1x128xf32, #tpu.memory_space<vmem>>, %arg8: memref<1x32x128xf32, #tpu.memory_space<vmem>>, %arg9: memref<1x32x32xf32, #tpu.memory_space<vmem>>) attributes {dimension_semantics = [#tpu.dimension_semantics<parallel>], iteration_bounds = array<i64: 2>, scalar_prefetch = 0 : i64, scratch_operands = 0 : i64, tpu.core_type = #tpu.core_type<tc>, window_params = [{transform_indices = @transform_0, window_bounds = array<i64: 1, 32, 128>}, {transform_indices = @transform_1, window_bounds = array<i64: 1, 10, 32>}, {pipeline_mode = #tpu.pipeline_mode<synchronous>, transform_indices = @transform_2, window_bounds = array<i64: 128, 128>}, {pipeline_mode = #tpu.pipeline_mode<synchronous>, transform_indices = @transform_3, window_bounds = array<i64: 128, 128>}, {pipeline_mode = #tpu.pipeline_mode<synchronous>, transform_indices = @transform_4, window_bounds = array<i64: 1, 128>}, {pipeline_mode = #tpu.pipeline_mode<synchronous>, transform_indices = @transform_5, window_bounds = array<i64: 128, 128>}, {pipeline_mode = #tpu.pipeline_mode<synchronous>, transform_indices = @transform_6, window_bounds = array<i64: 1, 128>}, {transform_indices = @transform_7, window_bounds = array<i64: 1, 32, 128>}, {transform_indices = @transform_8, window_bounds = array<i64: 1, 32, 32>}]} {
    %c0 = arith.constant 0 : index
    %c0_0 = arith.constant 0 : index
    %c0_1 = arith.constant 0 : index
    %0 = vector.load %arg1[%c0, %c0_0, %c0_1] : memref<1x32x128xf32, #tpu.memory_space<vmem>>, vector<1x32x128xf32>
    %1 = vector.shape_cast %0 : vector<1x32x128xf32> to vector<32x128xf32>
    %c0_2 = arith.constant 0 : index
    %c0_3 = arith.constant 0 : index
    %c0_4 = arith.constant 0 : index
    %2 = vector.load %arg2[%c0_2, %c0_3, %c0_4] : memref<1x10x32xi32, #tpu.memory_space<vmem>>, vector<1x10x32xi32>
    %3 = vector.shape_cast %2 : vector<1x10x32xi32> to vector<10x32xi32>
    %4 = tpu.iota {dimensions = array<i32: 2>} : vector<10x32x32xi32>
    %5 = vector.shape_cast %3 : vector<10x32xi32> to vector<10x32x1xi32>
    %6 = vector.broadcast %5 : vector<10x32x1xi32> to vector<10x32x32xi32>
    %7 = arith.cmpi eq, %6, %4 : vector<10x32x32xi32>
    %8 = arith.extui %7 : vector<10x32x32xi1> to vector<10x32x32xi32>
    %9 = arith.sitofp %8 : vector<10x32x32xi32> to vector<10x32x32xf32>
    %10 = vector.shape_cast %9 : vector<10x32x32xf32> to vector<320x32xf32>
    %cst = arith.constant dense<0.000000e+00> : vector<320x128xf32>
    %11 = tpu.matmul %10, %1, %cst {dimension_numbers = #tpu.dot_dimension_numbers<[1], [0], [0], [1], [0, 0, 1, 1], [], []>} : vector<320x32xf32>, vector<32x128xf32>, vector<320x128xf32> -> vector<320x128xf32>
    %12 = vector.shape_cast %11 : vector<320x128xf32> to vector<10x32x128xf32>
    %13 = vector.shape_cast %1 : vector<32x128xf32> to vector<1x32x128xf32>
    %14 = vector.broadcast %13 : vector<1x32x128xf32> to vector<10x32x128xf32>
    %15 = arith.subf %12, %14 : vector<10x32x128xf32>
    %16 = vector.shape_cast %15 : vector<10x32x128xf32> to vector<320x128xf32>
    %17 = arith.truncf %1 : vector<32x128xf32> to vector<32x128xbf16>
    %c0_5 = arith.constant 0 : index
    %c0_6 = arith.constant 0 : index
    %18 = vector.load %arg4[%c0_5, %c0_6] : memref<128x128xbf16, #tpu.memory_space<vmem>>, vector<128x128xbf16>
    %cst_7 = arith.constant dense<0.000000e+00> : vector<32x128xf32>
    %19 = tpu.matmul %17, %18, %cst_7 {dimension_numbers = #tpu.dot_dimension_numbers<[1], [0], [0], [1], [0, 0, 1, 1], [], []>} : vector<32x128xbf16>, vector<128x128xbf16>, vector<32x128xf32> -> vector<32x128xf32>
    %c0_8 = arith.constant 0 : index
    %c0_9 = arith.constant 0 : index
    %20 = vector.load %arg5[%c0_8, %c0_9] : memref<1x128xf32, #tpu.memory_space<vmem>>, vector<1x128xf32>
    %21 = vector.broadcast %20 : vector<1x128xf32> to vector<32x128xf32>
    %22 = arith.addf %19, %21 : vector<32x128xf32>
    %23 = arith.truncf %16 : vector<320x128xf32> to vector<320x128xbf16>
    %c0_10 = arith.constant 0 : index
    %c0_11 = arith.constant 0 : index
    %24 = vector.load %arg3[%c0_10, %c0_11] : memref<128x128xbf16, #tpu.memory_space<vmem>>, vector<128x128xbf16>
    %cst_12 = arith.constant dense<0.000000e+00> : vector<320x128xf32>
    %25 = tpu.matmul %23, %24, %cst_12 {dimension_numbers = #tpu.dot_dimension_numbers<[1], [0], [0], [1], [0, 0, 1, 1], [], []>} : vector<320x128xbf16>, vector<128x128xbf16>, vector<320x128xf32> -> vector<320x128xf32>
    %26 = vector.shape_cast %25 : vector<320x128xf32> to vector<10x32x128xf32>
    %27 = vector.shape_cast %22 : vector<32x128xf32> to vector<1x32x128xf32>
    %28 = vector.broadcast %27 : vector<1x32x128xf32> to vector<10x32x128xf32>
    %29 = arith.addf %26, %28 : vector<10x32x128xf32>
    %30 = vector.shape_cast %29 : vector<10x32x128xf32> to vector<320x128xf32>
    %cst_13 = arith.constant 0.000000e+00 : f32
    %31 = vector.broadcast %cst_13 : f32 to vector<320x128xf32>
    %32 = arith.cmpf ogt, %30, %31 : vector<320x128xf32>
    %cst_14 = arith.constant 2.000000e-01 : f32
    %33 = vector.broadcast %cst_14 : f32 to vector<320x128xf32>
    %34 = arith.mulf %33, %30 : vector<320x128xf32>
    %35 = arith.select %32, %30, %34 : vector<320x128xi1>, vector<320x128xf32>
    %36 = arith.truncf %35 : vector<320x128xf32> to vector<320x128xbf16>
    %c0_15 = arith.constant 0 : index
    %c0_16 = arith.constant 0 : index
    %37 = vector.load %arg6[%c0_15, %c0_16] : memref<128x128xbf16, #tpu.memory_space<vmem>>, vector<128x128xbf16>
    %cst_17 = arith.constant dense<0.000000e+00> : vector<320x128xf32>
    %38 = tpu.matmul %36, %37, %cst_17 {dimension_numbers = #tpu.dot_dimension_numbers<[1], [0], [0], [1], [0, 0, 1, 1], [], []>} : vector<320x128xbf16>, vector<128x128xbf16>, vector<320x128xf32> -> vector<320x128xf32>
    %c0_18 = arith.constant 0 : index
    %c0_19 = arith.constant 0 : index
    %39 = vector.load %arg7[%c0_18, %c0_19] : memref<1x128xf32, #tpu.memory_space<vmem>>, vector<1x128xf32>
    %40 = vector.broadcast %39 : vector<1x128xf32> to vector<320x128xf32>
    %41 = arith.addf %38, %40 : vector<320x128xf32>
    %cst_20 = arith.constant 0.000000e+00 : f32
    %42 = vector.broadcast %cst_20 : f32 to vector<320x128xf32>
    %43 = arith.cmpf ogt, %41, %42 : vector<320x128xf32>
    %cst_21 = arith.constant 2.000000e-01 : f32
    %44 = vector.broadcast %cst_21 : f32 to vector<320x128xf32>
    %45 = arith.mulf %44, %41 : vector<320x128xf32>
    %46 = arith.select %43, %41, %45 : vector<320x128xi1>, vector<320x128xf32>
    %47 = vector.shape_cast %46 : vector<320x128xf32> to vector<10x32x128xf32>
    %cst_22 = arith.constant dense<0xFF800000> : vector<32x128xf32>
    %48 = vector.multi_reduction <maximumf>, %47, %cst_22 [0] : vector<10x32x128xf32> to vector<32x128xf32>
    %c0_23 = arith.constant 0 : index
    %c0_24 = arith.constant 0 : index
    %c0_25 = arith.constant 0 : index
    %49 = vector.load %arg8[%c0_23, %c0_24, %c0_25] : memref<1x32x128xf32, #tpu.memory_space<vmem>>, vector<1x32x128xf32>
    %50 = vector.shape_cast %49 : vector<1x32x128xf32> to vector<32x128xf32>
    %51 = vector.shape_cast %48 : vector<32x128xf32> to vector<1x32x128xf32>
    tpu.vector_store %arg8[%c0_23, %c0_24, %c0_25], %51 {strides = array<i32>} : memref<1x32x128xf32, #tpu.memory_space<vmem>>, vector<1x32x128xf32>,
    %52 = arith.mulf %48, %48 : vector<32x128xf32>
    %cst_26 = arith.constant dense<0.000000e+00> : vector<32xf32>
    %53 = vector.multi_reduction <add>, %52, %cst_26 [1] : vector<32x128xf32> to vector<32xf32>
    %54 = vector.shape_cast %53 : vector<32xf32> to vector<32x1xf32>
    %cst_27 = arith.constant dense<0.000000e+00> : vector<32x32xf32>
    %55 = tpu.matmul %48, %48, %cst_27 {dimension_numbers = #tpu.dot_dimension_numbers<[1], [1], [0], [0], [0, 0, 1, 0], [], []>} : vector<32x128xf32>, vector<32x128xf32>, vector<32x32xf32> -> vector<32x32xf32>
    %cst_28 = arith.constant 2.000000e+00 : f32
    %56 = vector.broadcast %cst_28 : f32 to vector<32x32xf32>
    %57 = arith.mulf %56, %55 : vector<32x32xf32>
    %58 = vector.broadcast %54 : vector<32x1xf32> to vector<32x32xf32>
    %59 = arith.subf %57, %58 : vector<32x32xf32>
    %60 = tpu.transpose %54, [1, 0] : vector<32x1xf32> -> vector<1x32xf32>
    %61 = vector.broadcast %60 : vector<1x32xf32> to vector<32x32xf32>
    %62 = arith.subf %59, %61 : vector<32x32xf32>
    %63 = tpu.iota {dimensions = array<i32: 0>} : vector<32x32xi32>
    %64 = tpu.iota {dimensions = array<i32: 1>} : vector<32x32xi32>
    %65 = arith.cmpi eq, %63, %64 : vector<32x32xi32>
    %cst_29 = arith.constant 0.000000e+00 : f32
    %66 = vector.broadcast %cst_29 : f32 to vector<32x32xf32>
    %67 = arith.select %65, %66, %62 : vector<32x32xi1>, vector<32x32xf32>
    %c0_30 = arith.constant 0 : index
    %c0_31 = arith.constant 0 : index
    %c0_32 = arith.constant 0 : index
    %68 = vector.load %arg9[%c0_30, %c0_31, %c0_32] : memref<1x32x32xf32, #tpu.memory_space<vmem>>, vector<1x32x32xf32>
    %69 = vector.shape_cast %68 : vector<1x32x32xf32> to vector<32x32xf32>
    %70 = vector.shape_cast %67 : vector<32x32xf32> to vector<1x32x32xf32>
    tpu.vector_store %arg9[%c0_30, %c0_31, %c0_32], %70 {strides = array<i32>} : memref<1x32x32xf32, #tpu.memory_space<vmem>>, vector<1x32x32xf32>,
    return
  }
  func.func @transform_0(%arg0: i32) -> (i32, i32, i32) {
    %c0_i32 = arith.constant 0 : i32
    %c0_i32_0 = arith.constant 0 : i32
    %c0_i32_1 = arith.constant 0 : i32
    return %arg0, %c0_i32, %c0_i32_0 : i32, i32, i32
  }
  func.func @transform_1(%arg0: i32) -> (i32, i32, i32) {
    %c0_i32 = arith.constant 0 : i32
    %c0_i32_0 = arith.constant 0 : i32
    %c0_i32_1 = arith.constant 0 : i32
    return %arg0, %c0_i32, %c0_i32_0 : i32, i32, i32
  }
  func.func @transform_2(%arg0: i32) -> (i32, i32) {
    %c0_i32 = arith.constant 0 : i32
    %c0_i32_0 = arith.constant 0 : i32
    %c0_i32_1 = arith.constant 0 : i32
    return %c0_i32, %c0_i32_0 : i32, i32
  }
  func.func @transform_3(%arg0: i32) -> (i32, i32) {
    %c0_i32 = arith.constant 0 : i32
    %c0_i32_0 = arith.constant 0 : i32
    %c0_i32_1 = arith.constant 0 : i32
    return %c0_i32, %c0_i32_0 : i32, i32
  }
  func.func @transform_4(%arg0: i32) -> (i32, i32) {
    %c0_i32 = arith.constant 0 : i32
    %c0_i32_0 = arith.constant 0 : i32
    %c0_i32_1 = arith.constant 0 : i32
    return %c0_i32, %c0_i32_0 : i32, i32
  }
  func.func @transform_5(%arg0: i32) -> (i32, i32) {
    %c0_i32 = arith.constant 0 : i32
    %c0_i32_0 = arith.constant 0 : i32
    %c0_i32_1 = arith.constant 0 : i32
    return %c0_i32, %c0_i32_0 : i32, i32
  }
  func.func @transform_6(%arg0: i32) -> (i32, i32) {
    %c0_i32 = arith.constant 0 : i32
    %c0_i32_0 = arith.constant 0 : i32
    %c0_i32_1 = arith.constant 0 : i32
    return %c0_i32, %c0_i32_0 : i32, i32
  }
  func.func @transform_7(%arg0: i32) -> (i32, i32, i32) {
    %c0_i32 = arith.constant 0 : i32
    %c0_i32_0 = arith.constant 0 : i32
    %c0_i32_1 = arith.constant 0 : i32
    return %arg0, %c0_i32, %c0_i32_0 : i32, i32, i32
  }
  func.func @transform_8(%arg0: i32) -> (i32, i32, i32) {
    %c0_i32 = arith.constant 0 : i32
    %c0_i32_0 = arith.constant 0 : i32
    %c0_i32_1 = arith.constant 0 : i32
    return %arg0, %c0_i32, %c0_i32_0 : i32, i32, i32
  }
}

module attributes {stable_mosaic.version = 11 : i64} {
  func.func @_edgeconv2_conv3_kernel(%arg0: i32, %arg1: memref<1x32x128xf32, #tpu.memory_space<vmem>>, %arg2: memref<1x10x32xi32, #tpu.memory_space<vmem>>, %arg3: memref<128x128xbf16, #tpu.memory_space<vmem>>, %arg4: memref<128x128xbf16, #tpu.memory_space<vmem>>, %arg5: memref<1x128xf32, #tpu.memory_space<vmem>>, %arg6: memref<128x128xbf16, #tpu.memory_space<vmem>>, %arg7: memref<1x128xf32, #tpu.memory_space<vmem>>, %arg8: memref<128x128xbf16, #tpu.memory_space<vmem>>, %arg9: memref<128x128xbf16, #tpu.memory_space<vmem>>, %arg10: memref<1x128xf32, #tpu.memory_space<vmem>>, %arg11: memref<128x128xbf16, #tpu.memory_space<vmem>>, %arg12: memref<1x128xf32, #tpu.memory_space<vmem>>, %arg13: memref<1x32x128xf32, #tpu.memory_space<vmem>>) attributes {dimension_semantics = [#tpu.dimension_semantics<parallel>], iteration_bounds = array<i64: 2>, scalar_prefetch = 0 : i64, scratch_operands = 0 : i64, tpu.core_type = #tpu.core_type<tc>, window_params = [{transform_indices = @transform_0, window_bounds = array<i64: 1, 32, 128>}, {transform_indices = @transform_1, window_bounds = array<i64: 1, 10, 32>}, {pipeline_mode = #tpu.pipeline_mode<synchronous>, transform_indices = @transform_2, window_bounds = array<i64: 128, 128>}, {pipeline_mode = #tpu.pipeline_mode<synchronous>, transform_indices = @transform_3, window_bounds = array<i64: 128, 128>}, {pipeline_mode = #tpu.pipeline_mode<synchronous>, transform_indices = @transform_4, window_bounds = array<i64: 1, 128>}, {pipeline_mode = #tpu.pipeline_mode<synchronous>, transform_indices = @transform_5, window_bounds = array<i64: 128, 128>}, {pipeline_mode = #tpu.pipeline_mode<synchronous>, transform_indices = @transform_6, window_bounds = array<i64: 1, 128>}, {pipeline_mode = #tpu.pipeline_mode<synchronous>, transform_indices = @transform_7, window_bounds = array<i64: 128, 128>}, {pipeline_mode = #tpu.pipeline_mode<synchronous>, transform_indices = @transform_8, window_bounds = array<i64: 128, 128>}, {pipeline_mode = #tpu.pipeline_mode<synchronous>, transform_indices = @transform_9, window_bounds = array<i64: 1, 128>}, {pipeline_mode = #tpu.pipeline_mode<synchronous>, transform_indices = @transform_10, window_bounds = array<i64: 128, 128>}, {pipeline_mode = #tpu.pipeline_mode<synchronous>, transform_indices = @transform_11, window_bounds = array<i64: 1, 128>}, {transform_indices = @transform_12, window_bounds = array<i64: 1, 32, 128>}]} {
    %c0 = arith.constant 0 : index
    %c0_0 = arith.constant 0 : index
    %c0_1 = arith.constant 0 : index
    %0 = vector.load %arg1[%c0, %c0_0, %c0_1] : memref<1x32x128xf32, #tpu.memory_space<vmem>>, vector<1x32x128xf32>
    %1 = vector.shape_cast %0 : vector<1x32x128xf32> to vector<32x128xf32>
    %c0_2 = arith.constant 0 : index
    %c0_3 = arith.constant 0 : index
    %c0_4 = arith.constant 0 : index
    %2 = vector.load %arg2[%c0_2, %c0_3, %c0_4] : memref<1x10x32xi32, #tpu.memory_space<vmem>>, vector<1x10x32xi32>
    %3 = vector.shape_cast %2 : vector<1x10x32xi32> to vector<10x32xi32>
    %4 = tpu.iota {dimensions = array<i32: 2>} : vector<10x32x32xi32>
    %5 = vector.shape_cast %3 : vector<10x32xi32> to vector<10x32x1xi32>
    %6 = vector.broadcast %5 : vector<10x32x1xi32> to vector<10x32x32xi32>
    %7 = arith.cmpi eq, %6, %4 : vector<10x32x32xi32>
    %8 = arith.extui %7 : vector<10x32x32xi1> to vector<10x32x32xi32>
    %9 = arith.sitofp %8 : vector<10x32x32xi32> to vector<10x32x32xf32>
    %10 = vector.shape_cast %9 : vector<10x32x32xf32> to vector<320x32xf32>
    %cst = arith.constant dense<0.000000e+00> : vector<320x128xf32>
    %11 = tpu.matmul %10, %1, %cst {dimension_numbers = #tpu.dot_dimension_numbers<[1], [0], [0], [1], [0, 0, 1, 1], [], []>} : vector<320x32xf32>, vector<32x128xf32>, vector<320x128xf32> -> vector<320x128xf32>
    %12 = vector.shape_cast %11 : vector<320x128xf32> to vector<10x32x128xf32>
    %13 = vector.shape_cast %1 : vector<32x128xf32> to vector<1x32x128xf32>
    %14 = vector.broadcast %13 : vector<1x32x128xf32> to vector<10x32x128xf32>
    %15 = arith.subf %12, %14 : vector<10x32x128xf32>
    %16 = vector.shape_cast %15 : vector<10x32x128xf32> to vector<320x128xf32>
    %17 = arith.truncf %1 : vector<32x128xf32> to vector<32x128xbf16>
    %c0_5 = arith.constant 0 : index
    %c0_6 = arith.constant 0 : index
    %18 = vector.load %arg4[%c0_5, %c0_6] : memref<128x128xbf16, #tpu.memory_space<vmem>>, vector<128x128xbf16>
    %cst_7 = arith.constant dense<0.000000e+00> : vector<32x128xf32>
    %19 = tpu.matmul %17, %18, %cst_7 {dimension_numbers = #tpu.dot_dimension_numbers<[1], [0], [0], [1], [0, 0, 1, 1], [], []>} : vector<32x128xbf16>, vector<128x128xbf16>, vector<32x128xf32> -> vector<32x128xf32>
    %c0_8 = arith.constant 0 : index
    %c0_9 = arith.constant 0 : index
    %20 = vector.load %arg5[%c0_8, %c0_9] : memref<1x128xf32, #tpu.memory_space<vmem>>, vector<1x128xf32>
    %21 = vector.broadcast %20 : vector<1x128xf32> to vector<32x128xf32>
    %22 = arith.addf %19, %21 : vector<32x128xf32>
    %23 = arith.truncf %16 : vector<320x128xf32> to vector<320x128xbf16>
    %c0_10 = arith.constant 0 : index
    %c0_11 = arith.constant 0 : index
    %24 = vector.load %arg3[%c0_10, %c0_11] : memref<128x128xbf16, #tpu.memory_space<vmem>>, vector<128x128xbf16>
    %cst_12 = arith.constant dense<0.000000e+00> : vector<320x128xf32>
    %25 = tpu.matmul %23, %24, %cst_12 {dimension_numbers = #tpu.dot_dimension_numbers<[1], [0], [0], [1], [0, 0, 1, 1], [], []>} : vector<320x128xbf16>, vector<128x128xbf16>, vector<320x128xf32> -> vector<320x128xf32>
    %26 = vector.shape_cast %25 : vector<320x128xf32> to vector<10x32x128xf32>
    %27 = vector.shape_cast %22 : vector<32x128xf32> to vector<1x32x128xf32>
    %28 = vector.broadcast %27 : vector<1x32x128xf32> to vector<10x32x128xf32>
    %29 = arith.addf %26, %28 : vector<10x32x128xf32>
    %30 = vector.shape_cast %29 : vector<10x32x128xf32> to vector<320x128xf32>
    %cst_13 = arith.constant 0.000000e+00 : f32
    %31 = vector.broadcast %cst_13 : f32 to vector<320x128xf32>
    %32 = arith.cmpf ogt, %30, %31 : vector<320x128xf32>
    %cst_14 = arith.constant 2.000000e-01 : f32
    %33 = vector.broadcast %cst_14 : f32 to vector<320x128xf32>
    %34 = arith.mulf %33, %30 : vector<320x128xf32>
    %35 = arith.select %32, %30, %34 : vector<320x128xi1>, vector<320x128xf32>
    %36 = arith.truncf %35 : vector<320x128xf32> to vector<320x128xbf16>
    %c0_15 = arith.constant 0 : index
    %c0_16 = arith.constant 0 : index
    %37 = vector.load %arg6[%c0_15, %c0_16] : memref<128x128xbf16, #tpu.memory_space<vmem>>, vector<128x128xbf16>
    %cst_17 = arith.constant dense<0.000000e+00> : vector<320x128xf32>
    %38 = tpu.matmul %36, %37, %cst_17 {dimension_numbers = #tpu.dot_dimension_numbers<[1], [0], [0], [1], [0, 0, 1, 1], [], []>} : vector<320x128xbf16>, vector<128x128xbf16>, vector<320x128xf32> -> vector<320x128xf32>
    %c0_18 = arith.constant 0 : index
    %c0_19 = arith.constant 0 : index
    %39 = vector.load %arg7[%c0_18, %c0_19] : memref<1x128xf32, #tpu.memory_space<vmem>>, vector<1x128xf32>
    %40 = vector.broadcast %39 : vector<1x128xf32> to vector<320x128xf32>
    %41 = arith.addf %38, %40 : vector<320x128xf32>
    %cst_20 = arith.constant 0.000000e+00 : f32
    %42 = vector.broadcast %cst_20 : f32 to vector<320x128xf32>
    %43 = arith.cmpf ogt, %41, %42 : vector<320x128xf32>
    %cst_21 = arith.constant 2.000000e-01 : f32
    %44 = vector.broadcast %cst_21 : f32 to vector<320x128xf32>
    %45 = arith.mulf %44, %41 : vector<320x128xf32>
    %46 = arith.select %43, %41, %45 : vector<320x128xi1>, vector<320x128xf32>
    %47 = vector.shape_cast %46 : vector<320x128xf32> to vector<10x32x128xf32>
    %cst_22 = arith.constant dense<0xFF800000> : vector<32x128xf32>
    %48 = vector.multi_reduction <maximumf>, %47, %cst_22 [0] : vector<10x32x128xf32> to vector<32x128xf32>
    %49 = arith.truncf %1 : vector<32x128xf32> to vector<32x128xbf16>
    %c0_23 = arith.constant 0 : index
    %c0_24 = arith.constant 0 : index
    %50 = vector.load %arg8[%c0_23, %c0_24] : memref<128x128xbf16, #tpu.memory_space<vmem>>, vector<128x128xbf16>
    %cst_25 = arith.constant dense<0.000000e+00> : vector<32x128xf32>
    %51 = tpu.matmul %49, %50, %cst_25 {dimension_numbers = #tpu.dot_dimension_numbers<[1], [0], [0], [1], [0, 0, 1, 1], [], []>} : vector<32x128xbf16>, vector<128x128xbf16>, vector<32x128xf32> -> vector<32x128xf32>
    %52 = arith.truncf %48 : vector<32x128xf32> to vector<32x128xbf16>
    %c0_26 = arith.constant 0 : index
    %c0_27 = arith.constant 0 : index
    %53 = vector.load %arg9[%c0_26, %c0_27] : memref<128x128xbf16, #tpu.memory_space<vmem>>, vector<128x128xbf16>
    %cst_28 = arith.constant dense<0.000000e+00> : vector<32x128xf32>
    %54 = tpu.matmul %52, %53, %cst_28 {dimension_numbers = #tpu.dot_dimension_numbers<[1], [0], [0], [1], [0, 0, 1, 1], [], []>} : vector<32x128xbf16>, vector<128x128xbf16>, vector<32x128xf32> -> vector<32x128xf32>
    %55 = arith.addf %51, %54 : vector<32x128xf32>
    %c0_29 = arith.constant 0 : index
    %c0_30 = arith.constant 0 : index
    %56 = vector.load %arg10[%c0_29, %c0_30] : memref<1x128xf32, #tpu.memory_space<vmem>>, vector<1x128xf32>
    %57 = vector.broadcast %56 : vector<1x128xf32> to vector<32x128xf32>
    %58 = arith.addf %55, %57 : vector<32x128xf32>
    %cst_31 = arith.constant 0.000000e+00 : f32
    %59 = vector.broadcast %cst_31 : f32 to vector<32x128xf32>
    %60 = arith.cmpf ogt, %58, %59 : vector<32x128xf32>
    %cst_32 = arith.constant 2.000000e-01 : f32
    %61 = vector.broadcast %cst_32 : f32 to vector<32x128xf32>
    %62 = arith.mulf %61, %58 : vector<32x128xf32>
    %63 = arith.select %60, %58, %62 : vector<32x128xi1>, vector<32x128xf32>
    %64 = arith.truncf %63 : vector<32x128xf32> to vector<32x128xbf16>
    %c0_33 = arith.constant 0 : index
    %c0_34 = arith.constant 0 : index
    %65 = vector.load %arg11[%c0_33, %c0_34] : memref<128x128xbf16, #tpu.memory_space<vmem>>, vector<128x128xbf16>
    %cst_35 = arith.constant dense<0.000000e+00> : vector<32x128xf32>
    %66 = tpu.matmul %64, %65, %cst_35 {dimension_numbers = #tpu.dot_dimension_numbers<[1], [0], [0], [1], [0, 0, 1, 1], [], []>} : vector<32x128xbf16>, vector<128x128xbf16>, vector<32x128xf32> -> vector<32x128xf32>
    %c0_36 = arith.constant 0 : index
    %c0_37 = arith.constant 0 : index
    %67 = vector.load %arg12[%c0_36, %c0_37] : memref<1x128xf32, #tpu.memory_space<vmem>>, vector<1x128xf32>
    %68 = vector.broadcast %67 : vector<1x128xf32> to vector<32x128xf32>
    %69 = arith.addf %66, %68 : vector<32x128xf32>
    %cst_38 = arith.constant 0.000000e+00 : f32
    %70 = vector.broadcast %cst_38 : f32 to vector<32x128xf32>
    %71 = arith.cmpf ogt, %69, %70 : vector<32x128xf32>
    %cst_39 = arith.constant 2.000000e-01 : f32
    %72 = vector.broadcast %cst_39 : f32 to vector<32x128xf32>
    %73 = arith.mulf %72, %69 : vector<32x128xf32>
    %74 = arith.select %71, %69, %73 : vector<32x128xi1>, vector<32x128xf32>
    %c0_40 = arith.constant 0 : index
    %c0_41 = arith.constant 0 : index
    %c0_42 = arith.constant 0 : index
    %75 = vector.load %arg13[%c0_40, %c0_41, %c0_42] : memref<1x32x128xf32, #tpu.memory_space<vmem>>, vector<1x32x128xf32>
    %76 = vector.shape_cast %75 : vector<1x32x128xf32> to vector<32x128xf32>
    %77 = vector.shape_cast %74 : vector<32x128xf32> to vector<1x32x128xf32>
    tpu.vector_store %arg13[%c0_40, %c0_41, %c0_42], %77 {strides = array<i32>} : memref<1x32x128xf32, #tpu.memory_space<vmem>>, vector<1x32x128xf32>,
    return
  }
  func.func @transform_0(%arg0: i32) -> (i32, i32, i32) {
    %c0_i32 = arith.constant 0 : i32
    %c0_i32_0 = arith.constant 0 : i32
    %c0_i32_1 = arith.constant 0 : i32
    return %arg0, %c0_i32, %c0_i32_0 : i32, i32, i32
  }
  func.func @transform_1(%arg0: i32) -> (i32, i32, i32) {
    %c0_i32 = arith.constant 0 : i32
    %c0_i32_0 = arith.constant 0 : i32
    %c0_i32_1 = arith.constant 0 : i32
    return %arg0, %c0_i32, %c0_i32_0 : i32, i32, i32
  }
  func.func @transform_2(%arg0: i32) -> (i32, i32) {
    %c0_i32 = arith.constant 0 : i32
    %c0_i32_0 = arith.constant 0 : i32
    %c0_i32_1 = arith.constant 0 : i32
    return %c0_i32, %c0_i32_0 : i32, i32
  }
  func.func @transform_3(%arg0: i32) -> (i32, i32) {
    %c0_i32 = arith.constant 0 : i32
    %c0_i32_0 = arith.constant 0 : i32
    %c0_i32_1 = arith.constant 0 : i32
    return %c0_i32, %c0_i32_0 : i32, i32
  }
  func.func @transform_4(%arg0: i32) -> (i32, i32) {
    %c0_i32 = arith.constant 0 : i32
    %c0_i32_0 = arith.constant 0 : i32
    %c0_i32_1 = arith.constant 0 : i32
    return %c0_i32, %c0_i32_0 : i32, i32
  }
  func.func @transform_5(%arg0: i32) -> (i32, i32) {
    %c0_i32 = arith.constant 0 : i32
    %c0_i32_0 = arith.constant 0 : i32
    %c0_i32_1 = arith.constant 0 : i32
    return %c0_i32, %c0_i32_0 : i32, i32
  }
  func.func @transform_6(%arg0: i32) -> (i32, i32) {
    %c0_i32 = arith.constant 0 : i32
    %c0_i32_0 = arith.constant 0 : i32
    %c0_i32_1 = arith.constant 0 : i32
    return %c0_i32, %c0_i32_0 : i32, i32
  }
  func.func @transform_7(%arg0: i32) -> (i32, i32) {
    %c0_i32 = arith.constant 0 : i32
    %c0_i32_0 = arith.constant 0 : i32
    %c0_i32_1 = arith.constant 0 : i32
    return %c0_i32, %c0_i32_0 : i32, i32
  }
  func.func @transform_8(%arg0: i32) -> (i32, i32) {
    %c0_i32 = arith.constant 0 : i32
    %c0_i32_0 = arith.constant 0 : i32
    %c0_i32_1 = arith.constant 0 : i32
    return %c0_i32, %c0_i32_0 : i32, i32
  }
  func.func @transform_9(%arg0: i32) -> (i32, i32) {
    %c0_i32 = arith.constant 0 : i32
    %c0_i32_0 = arith.constant 0 : i32
    %c0_i32_1 = arith.constant 0 : i32
    return %c0_i32, %c0_i32_0 : i32, i32
  }
  func.func @transform_10(%arg0: i32) -> (i32, i32) {
    %c0_i32 = arith.constant 0 : i32
    %c0_i32_0 = arith.constant 0 : i32
    %c0_i32_1 = arith.constant 0 : i32
    return %c0_i32, %c0_i32_0 : i32, i32
  }
  func.func @transform_11(%arg0: i32) -> (i32, i32) {
    %c0_i32 = arith.constant 0 : i32
    %c0_i32_0 = arith.constant 0 : i32
    %c0_i32_1 = arith.constant 0 : i32
    return %c0_i32, %c0_i32_0 : i32, i32
  }
  func.func @transform_12(%arg0: i32) -> (i32, i32, i32) {
    %c0_i32 = arith.constant 0 : i32
    %c0_i32_0 = arith.constant 0 : i32
    %c0_i32_1 = arith.constant 0 : i32
    return %arg0, %c0_i32, %c0_i32_0 : i32, i32, i32
  }
}

</mosaic_0001>

<bundles_post_ra>
// kernel: dense_update_forward.3
= control target key start
LH: loop header
LB: loop body
LE: loop exit
PB: predicated region body
PF: predicated region fallthrough
CT: control target
= control target key end

     0   :  { %s415_s6 = smov 0   ;;  %s443_s0 = inlined_call_operand.vmem [shape: f32[2,32,128], index: 0, kind: input, shape index: {}]   ;;  %s444_s1 = inlined_call_operand.vmem [shape: f32[2,32,32], index: 1, kind: output, shape index: {}]  }
   0x1 LB: > { %s341_s7 = sadd.s32 4294967295, %s403_s6   ;;  %p345_p0 = scmp.ge.s32.totalorder %s403_s6, 1  ;;  %s403_s6 = sphi %s415_s6, %s11_s6  }
   0x2   : > { %p87_p1 = scmp.lt.s32.totalorder %s403_s6, 3 }
   0x4   : > { %p88_p2 = pnand %p345_p0, %p87_p1 }
   0x5   : > { %p107_p3 = scmp.lt.s32.totalorder (!%p88_p2), %s341_s7, 1  ;;  %v258_v18 = vlaneseq (!%p88_p2)  ;;  %vm281_vm0 = vcmask (!%p88_p2), 261120  }
   0x6   : > { %91 = sbr.rel (%p88_p2) target bundleno = 298 (0x12a), region = 24 }
   0x7   : > { %v259_v19 = vshrl.u32 (!%p88_p2), %v258_v18, 7  ;;  %v272_v28 = vand.u32 (!%p88_p2), 127, %v258_v18 }
   0x9   : > { %v260_v24 = vsub.s32 (!%p88_p2), 0, %v259_v19  ;;  %v268_v25 = vadd.s32 (!%p88_p2), 8, %v259_v19  ;;  %v269_v26 = vadd.s32 (!%p88_p2), 16, %v259_v19  ;;  %v270_v27 = vadd.s32 (!%p88_p2), 24, %v259_v19 }
   0xa   : > { %vm273_vm1 = vcmp.eq.s32.totalorder (!%p88_p2), %v259_v19, %v272_v28 }
   0xb   : > { %vm274_vm2 = vcmp.eq.s32.totalorder (!%p88_p2), %v268_v25, %v272_v28  ;;  %vm275_vm3 = vcmp.eq.s32.totalorder (!%p88_p2), %v269_v26, %v272_v28  ;;  %vm276_vm4 = vcmp.eq.s32.totalorder (!%p88_p2), %v270_v27, %v272_v28 }
   0xd   : > { %s446_s7 = smov (!%p107_p3, %s341_s7), 1 }
   0xe   : > { %s352_s8 = sshll.u32 %s446_s7, 5 }
   0xf   : > { %s111_s11 = scalar_lea.vmem %s443_s0, %s352_s8  ;;  %s116_s14 = scalar_lea.vmem %s444_s1, %s352_s8 }
  0x10   : > { %v117_v0 = vld [vmem:[%s111_s11] sm:$0xff]  ;;  %v118_v1 = vld [vmem:[%s111_s11 + $0x8] sm:$0xff]  ;;  %v119_v2 = vld [vmem:[%s111_s11 + $0x10] sm:$0xff] }
  0x11   : > { %v376_v3 = vpack.c.bf16 %v118_v1, %v117_v0  ;;  %v121_v4 = vmul.f32 %v117_v0, %v117_v0  ;;  %v120_v5 = vld [vmem:[%s111_s11 + $0x18] sm:$0xff]  ;;  %v123_v6 = vmul.f32 %v119_v2, %v119_v2  ;;  %370 = vmatprep.mubr.f32.mxu0 %v117_v0  ;;  %373 = vmatprep.mubr.f32.mxu1 %v119_v2 }
  0x12   : > { %v380_v7 = vpack.c.bf16 %v120_v5, %v119_v2  ;;  %v122_v8 = vmul.f32 %v118_v1, %v118_v1  ;;  %v124_v9 = vmul.f32 %v120_v5, %v120_v5 }
  0x13   : > { %377 = vmatprep.subr.bf16.mxu0 %v376_v3  ;;  %384 = vmatprep.subr.bf16.mxu1 %v376_v3 }
  0x14   : > { %125 = vadd.xlane.f32.xlu0 %v121_v4  ;;  %379 = vmatpush3.bf16.xpose.msra.mxu0 %v376_v3 }
  0x15   : > { %386 = vmatpush3.bf16.xpose.msra.mxu1 %v376_v3  ;;  %129 = vadd.xlane.f32.xlu1 %v123_v6 }
  0x16   : > { %381 = vmatprep.subr.bf16.mxu0 %v380_v7  ;;  %385 = vmatprep.subr.bf16.mxu1 %v380_v7 }
  0x18   : > { %127 = vadd.xlane.f32.xlu0 %v122_v8 }
  0x19   : > { %131 = vadd.xlane.f32.xlu1 %v124_v9 }
  0x1c   : > { %383 = vmatpush3.bf16.xpose.msra.mxu0 %v380_v7 }
  0x1d   : > { %387 = vmatpush3.bf16.xpose.msra.mxu1 %v380_v7 }
  0x23   : > { %371 = vmatmul.mubr.f32.vlgmr.msra.gmra.mrb[0].mxu0 %v118_v1 }
  0x24   : > { %374 = vmatmul.mubr.f32.vlgmr.msra.gmra.mrb[0].mxu1 %v120_v5 }
  0xa1   : > { %v126_v10 = vpop.xlane.xlu0 %125 }
  0xa2   : > { %226 = vxpose.xlu0.b32.start [1/4] (short) (narrow) %v126_v10, 8  ;;  %v130_v12 = vpop.xlane.xlu1 %129 }
  0xa5   : > { %v128_v11 = vpop.xlane.xlu0 %127 }
  0xa6   : > { %227 = vxpose.xlu0.b32.cont [2/4] (short) (narrow) %v128_v11, 8  ;;  %v132_v13 = vpop.xlane.xlu1 %131 }
  0xaa   : > { %228 = vxpose.xlu0.b32.cont [3/4] (short) (narrow) %v130_v12, 8 }
  0xae   : > { %229 = vxpose.xlu0.b32.end [4/4] (short) (narrow) %v132_v13, 8 }
  0xf6   : > { %v372_v14 = vpop.f32.mrb[0].mxu0 }
  0xf7   : > { %v375_v15 = vpop.f32.mrb[0].mxu1  ;;  %v199_v16 = vpop.f32.mrb[1].mxu0  ;;  %v219_v20 = vmul.f32 2.0, %v372_v14 }
  0xf8   : > { %v209_v17 = vpop.f32.mrb[1].mxu1  ;;  %v221_v21 = vmul.f32 2.0, %v375_v15  ;;  %v218_v22 = vmul.f32 2.0, %v199_v16 }
  0xf9   : > { %v220_v23 = vmul.f32 2.0, %v209_v17  ;;  %v223_v29 = vsub.f32 %v219_v20, %v128_v11 }
  0xfa   : > { %v225_v31 = vsub.f32 %v221_v21, %v132_v13  ;;  %v222_v32 = vsub.f32 %v218_v22, %v126_v10 }
  0xfb   : > { %v224_v33 = vsub.f32 %v220_v23, %v130_v12 }
 0x122   : > { %v242_v30 = vpop.trf.xlu0 }
 0x123   : > { %v261_v34 = vrot.slane %v242_v30, %v260_v24 }
 0x125   : > { %v262_v35 = vsub.f32 %v222_v32, %v261_v34  ;;  %v263_v36 = vsub.f32 %v223_v29, %v261_v34  ;;  %v264_v37 = vsub.f32 %v224_v33, %v261_v34  ;;  %v265_v38 = vsub.f32 %v225_v31, %v261_v34 }
 0x127   : > { %v277_v39 = vsel %vm273_vm1, 0.0, %v262_v35  ;;  %v278_v40 = vsel %vm274_vm2, 0.0, %v263_v36  ;;  %v279_v41 = vsel %vm275_vm3, 0.0, %v264_v37  ;;  %v280_v42 = vsel %vm276_vm4, 0.0, %v265_v38 }
 0x128   : > { %282 = vst.msk [vmem:[%s116_s14] sm:$0xff] %vm281_vm0, %v277_v39  ;;  %283 = vst.msk [vmem:[%s116_s14 + $0x8] sm:$0xff] %vm281_vm0, %v278_v40 }
 0x129   : > { %284 = vst.msk [vmem:[%s116_s14 + $0x10] sm:$0xff] %vm281_vm0, %v279_v41  ;;  %285 = vst.msk [vmem:[%s116_s14 + $0x18] sm:$0xff] %vm281_vm0, %v280_v42 }
 0x12a PF: > { %s11_s6 = sadd.s32 1, %s403_s6  }
 0x12b   : > { %p8_p4 = scmp.ge.s32.totalorder %s11_s6, 4  }
 0x12d   :  { %10 = sbr.rel (!%p8_p4) target bundleno = 1 (0x1), region = 54 }

// kernel: dense_update_forward.4
= control target key start
LH: loop header
LB: loop body
LE: loop exit
PB: predicated region body
PF: predicated region fallthrough
CT: control target
= control target key end

     0   :  { %s2909_s27 = smov 0   ;;  %s3332_s0 = inlined_call_operand.vmem [shape: f32[2,32,128], index: 0, kind: input, shape index: {}]   ;;  %s3333_s1 = inlined_call_operand.vmem [shape: s32[2,10,32], index: 1, kind: input, shape index: {}]   ;;  %s3334_s2 = inlined_call_operand.vmem [shape: bf16[128,128], index: 2, kind: input, shape index: {}]   ;;  %s3335_s3 = inlined_call_operand.vmem [shape: bf16[128,128], index: 3, kind: input, shape index: {}]   ;;  %s3336_s4 = inlined_call_operand.vmem [shape: f32[1,128], index: 4, kind: input, shape index: {}]   ;;  %s3337_s5 = inlined_call_operand.vmem [shape: bf16[128,128], index: 5, kind: input, shape index: {}]   ;;  %s3338_s6 = inlined_call_operand.vmem [shape: f32[1,128], index: 6, kind: input, shape index: {}]   ;;  %s3339_s7 = inlined_call_operand.vmem [shape: f32[2,32,128], index: 7, kind: output, shape index: {0}]   ;;  %s3340_s8 = inlined_call_operand.vmem [shape: f32[2,32,32], index: 8, kind: output, shape index: {1}]  }
   0x1 LB: > { %s2349_s28 = sadd.s32 4294967295, %s2861_s27   ;;  %p2353_p0 = scmp.ge.s32.totalorder %s2861_s27, 1  ;;  %s2861_s27 = sphi %s2909_s27, %s19_s27  }
   0x2   : > { %p275_p1 = scmp.lt.s32.totalorder %s2861_s27, 3 }
   0x4   : > { %p276_p2 = pnand %p2353_p0, %p275_p1 }
   0x5   : > { %p319_p3 = scmp.lt.s32.totalorder (!%p276_p2), %s2349_s28, 1  ;;  %v346_v0 = vlaneseq (!%p276_p2)  ;;  %v2831_v28 = vld [vmem:[%s3335_s3] sm:$0xff] (!%p276_p2)   ;;  %v2832_v29 = vld [vmem:[%s3335_s3 + $0x8] sm:$0xff] (!%p276_p2)   ;;  %v2833_v30 = vld [vmem:[%s3335_s3 + $0x10] sm:$0xff] (!%p276_p2)   ;;  %vm658_vm0 = vcmask (!%p276_p2), 261120   ;;  %v2863_v44 = vmov (!%p276_p2), 0.0  }
   0x6   : > { %279 = sbr.rel (%p276_p2) target bundleno = 1156 (0x484), region = 48  ;;  %2660 = vmatprep.subr.bf16.mxu1 (!%p276_p2), %v2831_v28  ;;  %v2834_v31 = vld [vmem:[%s3335_s3 + $0x18] sm:$0xff] (!%p276_p2)   ;;  %v2835_v32 = vld [vmem:[%s3335_s3 + $0x20] sm:$0xff] (!%p276_p2)   ;;  %v2836_v33 = vld [vmem:[%s3335_s3 + $0x28] sm:$0xff] (!%p276_p2)  }
   0x7   : > { %v2918_v1 = vshrl.u32 (!%p276_p2), %v346_v0, 7  ;;  %2661 = vmatpush3.bf16.msra.mxu1 (!%p276_p2), %v2831_v28  ;;  %v2837_v34 = vld [vmem:[%s3335_s3 + $0x30] sm:$0xff] (!%p276_p2)   ;;  %v2838_v35 = vld [vmem:[%s3335_s3 + $0x38] sm:$0xff] (!%p276_p2)   ;;  %v2839_v36 = vld [vmem:[%s3334_s2] sm:$0xff] (!%p276_p2)   ;;  %v3001_v40 = vand.u32 (!%p276_p2), 127, %v346_v0 }
   0x8   : > { %2662 = vmatprep.subr.bf16.mxu1 (!%p276_p2), %v2832_v29  ;;  %v2840_v37 = vld [vmem:[%s3334_s2 + $0x8] sm:$0xff] (!%p276_p2)   ;;  %v2841_v38 = vld [vmem:[%s3334_s2 + $0x10] sm:$0xff] (!%p276_p2)   ;;  %v2842_v39 = vld [vmem:[%s3334_s2 + $0x18] sm:$0xff] (!%p276_p2)  }
   0x9   : > { %v2921_v2 = vsub.s32 (!%p276_p2), 0, %v2918_v1  ;;  %v369_v7 = vsub.s32 (!%p276_p2), 1, %v2918_v1  ;;  %v388_v8 = vsub.s32 (!%p276_p2), 2, %v2918_v1  ;;  %v407_v17 = vsub.s32 (!%p276_p2), 3, %v2918_v1  ;;  %v2843_v43 = vld [vmem:[%s3334_s2 + $0x20] sm:$0xff] (!%p276_p2)   ;;  %v2844_v48 = vld [vmem:[%s3334_s2 + $0x28] sm:$0xff] (!%p276_p2)  }
   0xa   : > { %v426_v19 = vsub.s32 (!%p276_p2), 4, %v2918_v1  ;;  %v445_v21 = vsub.s32 (!%p276_p2), 5, %v2918_v1  ;;  %v464_v23 = vsub.s32 (!%p276_p2), 6, %v2918_v1  ;;  %v483_v25 = vsub.s32 (!%p276_p2), 7, %v2918_v1 }
   0xb   : > { %2663 = vmatpush3.bf16.msra.mxu1 (!%p276_p2), %v2832_v29 }
   0xc   : > { %2664 = vmatprep.subr.bf16.mxu1 (!%p276_p2), %v2833_v30 }
   0xd   : > { %s3342_s28 = smov (!%p319_p3, %s2349_s28), 1 }
   0xe   : > { %s2471_s29 = sshll.u32 %s3342_s28, 4  ;;  %s2923_s30 = sshll.u32 %s3342_s28, 5 }
   0xf   : > { %s328_s11 = scalar_lea.vmem %s3333_s1, %s2471_s29  ;;  %s323_s14 = scalar_lea.vmem %s3332_s0, %s2923_s30  ;;  %2665 = vmatpush3.bf16.msra.mxu1 %v2833_v30 }
  0x10   : > { %v344_v3 = vld [vmem:[%s328_s11] sm:$0xff]  ;;  %v345_v4 = vld [vmem:[%s328_s11 + $0x8] sm:$0x3]  ;;  %v2939_v10 = vld [vmem:[%s323_s14 + $0x10] sm:$0xff]  ;;  %2666 = vmatprep.subr.bf16.mxu1 %v2834_v31  ;;  %s333_s9 = scalar_lea.vmem %s3339_s7, %s2923_s30  ;;  %s338_s12 = scalar_lea.vmem %s3340_s8, %s2923_s30 }
  0x11   : > { %v2932_v5 = vld [vmem:[%s323_s14] sm:$0xff]  ;;  %v351_v6 = vrot.slane %v344_v3, %v2921_v2  ;;  %v2937_v9 = vld [vmem:[%s323_s14 + $0x8] sm:$0xff]  ;;  %v2941_v11 = vld [vmem:[%s323_s14 + $0x18] sm:$0xff]  ;;  %v2943_v12 = vrot.slane %v345_v4, %v369_v7  ;;  %v370_v15 = vrot.slane %v344_v3, %v369_v7  ;;  %v389_v16 = vrot.slane %v344_v3, %v388_v8 }
  0x12   : > { %v2806_v13 = vpack.c.bf16 %v2937_v9, %v2932_v5  ;;  %v2949_v14 = vpack.c.bf16 %v2941_v11, %v2939_v10  ;;  %v408_v18 = vrot.slane %v344_v3, %v407_v17  ;;  %v427_v20 = vrot.slane %v344_v3, %v426_v19 }
  0x13   : > { %353 = vbcast.lane.b32.xlu0 %v351_v6, 256  ;;  %361 = vbcast.lane.b32.xlu1 %v351_v6, 272  ;;  %v446_v22 = vrot.slane %v344_v3, %v445_v21  ;;  %v465_v24 = vrot.slane %v344_v3, %v464_v23  ;;  %v484_v26 = vrot.slane %v344_v3, %v483_v25 }
  0x14   : > { %2807 = vmatprep.subr.bf16.mxu0 %v2806_v13  ;;  %2676 = vmatprep.mubr.bf16.mxu1 %v2806_v13  ;;  %v503_v27 = vrot.slane %v345_v4, %v2921_v2 }
  0x15   : > { %2809 = vmatpush3.bf16.msra.mxu0 %v2806_v13  ;;  %2667 = vmatpush3.bf16.msra.mxu1 %v2834_v31 }
  0x16   : > { %2811 = vmatprep.subr.bf16.mxu0 %v2949_v14  ;;  %2668 = vmatprep.subr.bf16.mxu1 %v2835_v32 }
  0x17   : > { %357 = vbcast.lane.b32.xlu0 %v351_v6, 264  ;;  %365 = vbcast.lane.b32.xlu1 %v351_v6, 280 }
  0x19   : > { %2813 = vmatpush3.bf16.msra.mxu0 %v2949_v14  ;;  %2669 = vmatpush3.bf16.msra.mxu1 %v2835_v32 }
  0x1a   : > { %2670 = vmatprep.subr.bf16.mxu1 %v2836_v33 }
  0x1b   : > { %372 = vbcast.lane.b32.xlu0 %v370_v15, 256  ;;  %376 = vbcast.lane.b32.xlu1 %v370_v15, 264 }
  0x1d   : > { %2671 = vmatpush3.bf16.msra.mxu1 %v2836_v33 }
  0x1e   : > { %2672 = vmatprep.subr.bf16.mxu1 %v2837_v34 }
  0x1f   : > { %380 = vbcast.lane.b32.xlu0 %v370_v15, 272  ;;  %384 = vbcast.lane.b32.xlu1 %v370_v15, 280 }
  0x21   : > { %2673 = vmatpush3.bf16.msra.mxu1 %v2837_v34 }
  0x22   : > { %2674 = vmatprep.subr.bf16.mxu1 %v2838_v35 }
  0x23   : > { %391 = vbcast.lane.b32.xlu0 %v389_v16, 256  ;;  %395 = vbcast.lane.b32.xlu1 %v389_v16, 264 }
  0x25   : > { %2675 = vmatpush3.bf16.msra.mxu1 %v2838_v35 }
  0x26   : > { %2680 = vmatprep.subr.bf16.mxu1 %v2839_v36 }
  0x27   : > { %399 = vbcast.lane.b32.xlu0 %v389_v16, 272  ;;  %403 = vbcast.lane.b32.xlu1 %v389_v16, 280 }
  0x28   : > { %2677 = vmatmul.mubr.bf16.vlgmr.msra.gmra.mrb[0].mxu1 %v2949_v14 }
  0x29   : > { %2681 = vmatpush3.bf16.msra.mxu1 %v2839_v36 }
  0x2a   : > { %2682 = vmatprep.subr.bf16.mxu1 %v2840_v37 }
  0x2b   : > { %410 = vbcast.lane.b32.xlu0 %v408_v18, 256  ;;  %414 = vbcast.lane.b32.xlu1 %v408_v18, 264 }
  0x2d   : > { %2683 = vmatpush3.bf16.msra.mxu1 %v2840_v37 }
  0x2e   : > { %2684 = vmatprep.subr.bf16.mxu1 %v2841_v38 }
  0x2f   : > { %418 = vbcast.lane.b32.xlu0 %v408_v18, 272  ;;  %422 = vbcast.lane.b32.xlu1 %v408_v18, 280 }
  0x31   : > { %2685 = vmatpush3.bf16.msra.mxu1 %v2841_v38 }
  0x32   : > { %2686 = vmatprep.subr.bf16.mxu1 %v2842_v39 }
  0x33   : > { %429 = vbcast.lane.b32.xlu0 %v427_v20, 256  ;;  %433 = vbcast.lane.b32.xlu1 %v427_v20, 264 }
  0x35   : > { %2687 = vmatpush3.bf16.msra.mxu1 %v2842_v39 }
  0x36   : > { %2688 = vmatprep.subr.bf16.mxu1 %v2843_v43 }
  0x37   : > { %437 = vbcast.lane.b32.xlu0 %v427_v20, 272  ;;  %441 = vbcast.lane.b32.xlu1 %v427_v20, 280 }
  0x39   : > { %2689 = vmatpush3.bf16.msra.mxu1 %v2843_v43 }
  0x3a   : > { %2690 = vmatprep.subr.bf16.mxu1 %v2844_v48 }
  0x3b   : > { %448 = vbcast.lane.b32.xlu0 %v446_v22, 256  ;;  %452 = vbcast.lane.b32.xlu1 %v446_v22, 264 }
  0x3d   : > { %2691 = vmatpush3.bf16.msra.mxu1 %v2844_v48 }
  0x3f   : > { %456 = vbcast.lane.b32.xlu0 %v446_v22, 272  ;;  %460 = vbcast.lane.b32.xlu1 %v446_v22, 280 }
  0x43   : > { %467 = vbcast.lane.b32.xlu0 %v465_v24, 256  ;;  %471 = vbcast.lane.b32.xlu1 %v465_v24, 264 }
  0x47   : > { %475 = vbcast.lane.b32.xlu0 %v465_v24, 272  ;;  %479 = vbcast.lane.b32.xlu1 %v465_v24, 280 }
  0x4b   : > { %486 = vbcast.lane.b32.xlu0 %v484_v26, 256  ;;  %490 = vbcast.lane.b32.xlu1 %v484_v26, 264 }
  0x4f   : > { %494 = vbcast.lane.b32.xlu0 %v484_v26, 272  ;;  %498 = vbcast.lane.b32.xlu1 %v484_v26, 280 }
  0x53   : > { %505 = vbcast.lane.b32.xlu0 %v503_v27, 256  ;;  %509 = vbcast.lane.b32.xlu1 %v503_v27, 264 }
  0x57   : > { %513 = vbcast.lane.b32.xlu0 %v503_v27, 272  ;;  %517 = vbcast.lane.b32.xlu1 %v503_v27, 280 }
  0x5b   : > { %524 = vbcast.lane.b32.xlu0 %v2943_v12, 256  ;;  %528 = vbcast.lane.b32.xlu1 %v2943_v12, 264 }
  0x5f   : > { %532 = vbcast.lane.b32.xlu0 %v2943_v12, 272  ;;  %536 = vbcast.lane.b32.xlu1 %v2943_v12, 280 }
  0x85   : > { %v354_v41 = vpop.permute.xlu0 %353  ;;  %v362_v42 = vpop.permute.xlu1 %361 }
  0x86   : > { %vm538_vm1 = vcmp.eq.s32.totalorder %v354_v41, %v3001_v40  ;;  %vm540_vm2 = vcmp.eq.s32.totalorder %v362_v42, %v3001_v40 }
  0x87   : > { %v2362_v45 = vsel %vm538_vm1, 1.0, %v2863_v44  ;;  %v2364_v49 = vsel %vm540_vm2, 1.0, %v2863_v44 }
  0x88   : > { %2600 = vmatprep.mubr.msk.f32.mxu0 %vm658_vm0, %v2362_v45 }
  0x89   : > { %v358_v46 = vpop.permute.xlu0 %357  ;;  %v366_v47 = vpop.permute.xlu1 %365 }
  0x8a   : > { %vm539_vm3 = vcmp.eq.s32.totalorder %v358_v46, %v3001_v40  ;;  %vm541_vm4 = vcmp.eq.s32.totalorder %v366_v47, %v3001_v40 }
  0x8b   : > { %v2363_v50 = vsel %vm539_vm3, 1.0, %v2863_v44  ;;  %v2365_v51 = vsel %vm541_vm4, 1.0, %v2863_v44 }
  0x8c   : > { %2601 = vmatmul.mubr.msk.f32.vlgmr.msra.gmra.mrb[0].mxu0 %vm658_vm0, %v2363_v50 }
  0x8d   : > { %2603 = vmatprep.mubr.msk.f32.mxu0 %vm658_vm0, %v2364_v49  ;;  %v373_v52 = vpop.permute.xlu0 %372  ;;  %v377_v53 = vpop.permute.xlu1 %376 }
  0x8e   : > { %vm542_vm5 = vcmp.eq.s32.totalorder %v373_v52, %v3001_v40  ;;  %vm543_vm6 = vcmp.eq.s32.totalorder %v377_v53, %v3001_v40 }
  0x8f   : > { %v2366_v54 = vsel %vm542_vm5, 1.0, %v2863_v44  ;;  %v2367_v55 = vsel %vm543_vm6, 1.0, %v2863_v44 }
  0x90   : > { %2604 = vmatmul.mubr.msk.f32.gmra.mrb[2].mxu0 %vm658_vm0, %v2365_v51 }
  0x91   : > { %2606 = vmatprep.mubr.msk.f32.mxu0 %vm658_vm0, %v2366_v54  ;;  %v381_v56 = vpop.permute.xlu0 %380  ;;  %v385_v57 = vpop.permute.xlu1 %384 }
  0x92   : > { %vm544_vm7 = vcmp.eq.s32.totalorder %v381_v56, %v3001_v40  ;;  %vm545_vm8 = vcmp.eq.s32.totalorder %v385_v57, %v3001_v40 }
  0x93   : > { %v2368_v58 = vsel %vm544_vm7, 1.0, %v2863_v44  ;;  %v2369_v59 = vsel %vm545_vm8, 1.0, %v2863_v44 }
  0x94   : > { %2607 = vmatmul.mubr.msk.f32.gmra.mrb[4].mxu0 %vm658_vm0, %v2367_v55 }
  0x95   : > { %2609 = vmatprep.mubr.msk.f32.mxu0 %vm658_vm0, %v2368_v58  ;;  %v392_v60 = vpop.permute.xlu0 %391  ;;  %v396_v61 = vpop.permute.xlu1 %395 }
  0x96   : > { %vm546_vm9 = vcmp.eq.s32.totalorder %v392_v60, %v3001_v40  ;;  %vm547_vm10 = vcmp.eq.s32.totalorder %v396_v61, %v3001_v40 }
  0x97   : > { %v2370_v62 = vsel %vm546_vm9, 1.0, %v2863_v44  ;;  %v2371_v63 = vsel %vm547_vm10, 1.0, %v2863_v44 }
  0x98   : > { %2610 = vmatmul.mubr.msk.f32.gmra.mrb[6].mxu0 %vm658_vm0, %v2369_v59 }
  0x99   : > { %2612 = vmatprep.mubr.msk.f32.mxu0 %vm658_vm0, %v2370_v62  ;;  %v400_v0 = vpop.permute.xlu0 %399  ;;  %v404_v3 = vpop.permute.xlu1 %403 }
  0x9a   : > { %vm548_vm11 = vcmp.eq.s32.totalorder %v400_v0, %v3001_v40  ;;  %vm549_vm12 = vcmp.eq.s32.totalorder %v404_v3, %v3001_v40 }
  0x9b   : > { %v2372_v4 = vsel %vm548_vm11, 1.0, %v2863_v44  ;;  %v2373_v6 = vsel %vm549_vm12, 1.0, %v2863_v44 }
  0x9c   : > { %2613 = vmatmul.mubr.msk.f32.gmra.mrb[8].mxu0 %vm658_vm0, %v2371_v63 }
  0x9d   : > { %2615 = vmatprep.mubr.msk.f32.mxu0 %vm658_vm0, %v2372_v4  ;;  %v411_v7 = vpop.permute.xlu0 %410  ;;  %v415_v8 = vpop.permute.xlu1 %414 }
  0x9e   : > { %vm550_vm13 = vcmp.eq.s32.totalorder %v411_v7, %v3001_v40  ;;  %vm551_vm14 = vcmp.eq.s32.totalorder %v415_v8, %v3001_v40  ;;  %v2845_v7 = vld [vmem:[%s3334_s2 + $0x30] sm:$0xff]   ;;  %v2846_v8 = vld [vmem:[%s3334_s2 + $0x38] sm:$0xff]  }
  0x9f   : > { %v2374_v12 = vsel %vm550_vm13, 1.0, %v2863_v44  ;;  %v2375_v13 = vsel %vm551_vm14, 1.0, %v2863_v44  ;;  %2692 = vmatprep.subr.bf16.mxu1 %v2845_v7 }
  0xa0   : > { %2616 = vmatmul.mubr.msk.f32.gmra.mrb[10].mxu0 %vm658_vm0, %v2373_v6  ;;  %2693 = vmatpush3.bf16.msra.mxu1 %v2845_v7 }
  0xa1   : > { %2618 = vmatprep.mubr.msk.f32.mxu0 %vm658_vm0, %v2374_v12  ;;  %v419_v14 = vpop.permute.xlu0 %418  ;;  %v423_v15 = vpop.permute.xlu1 %422  ;;  %2694 = vmatprep.subr.bf16.mxu1 %v2846_v8  ;;  %v2848_v12 = vld [vmem:[%s3337_s5 + $0x8] sm:$0xff]  }
  0xa2   : > { %vm552_vm15 = vcmp.eq.s32.totalorder %v419_v14, %v3001_v40  ;;  %vm553_vm1 = vcmp.eq.s32.totalorder %v423_v15, %v3001_v40  ;;  %v2850_v14 = vld [vmem:[%s3337_s5 + $0x18] sm:$0xff]   ;;  %v2851_v15 = vld [vmem:[%s3337_s5 + $0x20] sm:$0xff]  }
  0xa3   : > { %v2376_v16 = vsel %vm552_vm15, 1.0, %v2863_v44  ;;  %v2377_v17 = vsel %vm553_vm1, 1.0, %v2863_v44 }
  0xa4   : > { %2619 = vmatmul.mubr.msk.f32.gmra.mrb[12].mxu0 %vm658_vm0, %v2375_v13  ;;  %2695 = vmatpush3.bf16.msra.mxu1 %v2846_v8  ;;  %v2849_v13 = vld [vmem:[%s3337_s5 + $0x10] sm:$0xff]  }
  0xa5   : > { %2621 = vmatprep.mubr.msk.f32.mxu0 %vm658_vm0, %v2376_v16  ;;  %v430_v18 = vpop.permute.xlu0 %429  ;;  %v434_v19 = vpop.permute.xlu1 %433 }
  0xa6   : > { %vm554_vm2 = vcmp.eq.s32.totalorder %v430_v18, %v3001_v40  ;;  %vm555_vm3 = vcmp.eq.s32.totalorder %v434_v19, %v3001_v40 }
  0xa7   : > { %v2378_v20 = vsel %vm554_vm2, 1.0, %v2863_v44  ;;  %v2379_v21 = vsel %vm555_vm3, 1.0, %v2863_v44 }
  0xa8   : > { %2622 = vmatmul.mubr.msk.f32.gmra.mrb[14].mxu0 %vm658_vm0, %v2377_v17 }
  0xa9   : > { %2624 = vmatprep.mubr.msk.f32.mxu0 %vm658_vm0, %v2378_v20  ;;  %v438_v22 = vpop.permute.xlu0 %437  ;;  %v442_v23 = vpop.permute.xlu1 %441 }
  0xaa   : > { %vm556_vm4 = vcmp.eq.s32.totalorder %v438_v22, %v3001_v40  ;;  %vm557_vm5 = vcmp.eq.s32.totalorder %v442_v23, %v3001_v40 }
  0xab   : > { %v2380_v24 = vsel %vm556_vm4, 1.0, %v2863_v44  ;;  %v2381_v25 = vsel %vm557_vm5, 1.0, %v2863_v44 }
  0xac   : > { %2625 = vmatmul.mubr.msk.f32.gmra.mrb[16].mxu0 %vm658_vm0, %v2379_v21 }
  0xad   : > { %2627 = vmatprep.mubr.msk.f32.mxu0 %vm658_vm0, %v2380_v24  ;;  %v449_v26 = vpop.permute.xlu0 %448  ;;  %v453_v27 = vpop.permute.xlu1 %452 }
  0xae   : > { %vm558_vm6 = vcmp.eq.s32.totalorder %v449_v26, %v3001_v40  ;;  %vm559_vm7 = vcmp.eq.s32.totalorder %v453_v27, %v3001_v40 }
  0xaf   : > { %v2382_v28 = vsel %vm558_vm6, 1.0, %v2863_v44  ;;  %v2383_v29 = vsel %vm559_vm7, 1.0, %v2863_v44 }
  0xb0   : > { %2628 = vmatmul.mubr.msk.f32.gmra.mrb[18].mxu0 %vm658_vm0, %v2381_v25 }
  0xb1   : > { %2630 = vmatprep.mubr.msk.f32.mxu0 %vm658_vm0, %v2382_v28  ;;  %v457_v30 = vpop.permute.xlu0 %456  ;;  %v461_v31 = vpop.permute.xlu1 %460 }
  0xb2   : > { %vm560_vm8 = vcmp.eq.s32.totalorder %v457_v30, %v3001_v40  ;;  %vm561_vm9 = vcmp.eq.s32.totalorder %v461_v31, %v3001_v40 }
  0xb3   : > { %v2384_v32 = vsel %vm560_vm8, 1.0, %v2863_v44  ;;  %v2385_v33 = vsel %vm561_vm9, 1.0, %v2863_v44 }
  0xb4   : > { %2631 = vmatmul.mubr.msk.f32.gmra.mrb[20].mxu0 %vm658_vm0, %v2383_v29 }
  0xb5   : > { %2633 = vmatprep.mubr.msk.f32.mxu0 %vm658_vm0, %v2384_v32  ;;  %v468_v34 = vpop.permute.xlu0 %467  ;;  %v472_v35 = vpop.permute.xlu1 %471 }
  0xb6   : > { %vm562_vm10 = vcmp.eq.s32.totalorder %v468_v34, %v3001_v40  ;;  %vm563_vm11 = vcmp.eq.s32.totalorder %v472_v35, %v3001_v40 }
  0xb7   : > { %v2386_v36 = vsel %vm562_vm10, 1.0, %v2863_v44  ;;  %v2387_v37 = vsel %vm563_vm11, 1.0, %v2863_v44 }
  0xb8   : > { %2634 = vmatmul.mubr.msk.f32.gmra.mrb[22].mxu0 %vm658_vm0, %v2385_v33 }
  0xb9   : > { %2636 = vmatprep.mubr.msk.f32.mxu0 %vm658_vm0, %v2386_v36  ;;  %v476_v38 = vpop.permute.xlu0 %475  ;;  %v480_v39 = vpop.permute.xlu1 %479 }
  0xba   : > { %vm564_vm12 = vcmp.eq.s32.totalorder %v476_v38, %v3001_v40  ;;  %vm565_vm13 = vcmp.eq.s32.totalorder %v480_v39, %v3001_v40 }
  0xbb   : > { %v2388_v41 = vsel %vm564_vm12, 1.0, %v2863_v44  ;;  %v2389_v42 = vsel %vm565_vm13, 1.0, %v2863_v44 }
  0xbc   : > { %2637 = vmatmul.mubr.msk.f32.gmra.mrb[24].mxu0 %vm658_vm0, %v2387_v37 }
  0xbd   : > { %2639 = vmatprep.mubr.msk.f32.mxu0 %vm658_vm0, %v2388_v41  ;;  %v487_v43 = vpop.permute.xlu0 %486  ;;  %v491_v45 = vpop.permute.xlu1 %490 }
  0xbe   : > { %vm566_vm14 = vcmp.eq.s32.totalorder %v487_v43, %v3001_v40  ;;  %vm567_vm15 = vcmp.eq.s32.totalorder %v491_v45, %v3001_v40 }
  0xbf   : > { %v2390_v46 = vsel %vm566_vm14, 1.0, %v2863_v44  ;;  %v2391_v47 = vsel %vm567_vm15, 1.0, %v2863_v44 }
  0xc0   : > { %2640 = vmatmul.mubr.msk.f32.gmra.mrb[26].mxu0 %vm658_vm0, %v2389_v42 }
  0xc1   : > { %2642 = vmatprep.mubr.msk.f32.mxu0 %vm658_vm0, %v2390_v46  ;;  %v495_v48 = vpop.permute.xlu0 %494  ;;  %v499_v49 = vpop.permute.xlu1 %498 }
  0xc2   : > { %vm568_vm1 = vcmp.eq.s32.totalorder %v495_v48, %v3001_v40  ;;  %vm569_vm2 = vcmp.eq.s32.totalorder %v499_v49, %v3001_v40 }
  0xc3   : > { %v2392_v50 = vsel %vm568_vm1, 1.0, %v2863_v44  ;;  %v2393_v51 = vsel %vm569_vm2, 1.0, %v2863_v44 }
  0xc4   : > { %2643 = vmatmul.mubr.msk.f32.gmra.mrb[28].mxu0 %vm658_vm0, %v2391_v47 }
  0xc5   : > { %2645 = vmatprep.mubr.msk.f32.mxu0 %vm658_vm0, %v2392_v50  ;;  %v506_v52 = vpop.permute.xlu0 %505  ;;  %v510_v53 = vpop.permute.xlu1 %509 }
  0xc6   : > { %vm570_vm3 = vcmp.eq.s32.totalorder %v506_v52, %v3001_v40  ;;  %vm571_vm4 = vcmp.eq.s32.totalorder %v510_v53, %v3001_v40 }
  0xc7   : > { %v2394_v54 = vsel %vm570_vm3, 1.0, %v2863_v44  ;;  %v2395_v55 = vsel %vm571_vm4, 1.0, %v2863_v44 }
  0xc8   : > { %2646 = vmatmul.mubr.msk.f32.gmra.mrb[30].mxu0 %vm658_vm0, %v2393_v51 }
  0xc9   : > { %2648 = vmatprep.mubr.msk.f32.mxu0 %vm658_vm0, %v2394_v54  ;;  %v514_v56 = vpop.permute.xlu0 %513  ;;  %v518_v57 = vpop.permute.xlu1 %517 }
  0xca   : > { %vm572_vm5 = vcmp.eq.s32.totalorder %v514_v56, %v3001_v40  ;;  %vm573_vm6 = vcmp.eq.s32.totalorder %v518_v57, %v3001_v40 }
  0xcb   : > { %v2396_v58 = vsel %vm572_vm5, 1.0, %v2863_v44  ;;  %v2397_v59 = vsel %vm573_vm6, 1.0, %v2863_v44 }
  0xcc   : > { %2649 = vmatmul.mubr.msk.f32.gmra.mrb[32].mxu0 %vm658_vm0, %v2395_v55 }
  0xcd   : > { %2651 = vmatprep.mubr.msk.f32.mxu0 %vm658_vm0, %v2396_v58  ;;  %v525_v60 = vpop.permute.xlu0 %524  ;;  %v529_v61 = vpop.permute.xlu1 %528 }
  0xce   : > { %vm574_vm7 = vcmp.eq.s32.totalorder %v525_v60, %v3001_v40  ;;  %vm575_vm8 = vcmp.eq.s32.totalorder %v529_v61, %v3001_v40 }
  0xcf   : > { %v2398_v62 = vsel %vm574_vm7, 1.0, %v2863_v44  ;;  %v2399_v63 = vsel %vm575_vm8, 1.0, %v2863_v44 }
  0xd0   : > { %2652 = vmatmul.mubr.msk.f32.gmra.mrb[34].mxu0 %vm658_vm0, %v2397_v59 }
  0xd1   : > { %2654 = vmatprep.mubr.msk.f32.mxu0 %vm658_vm0, %v2398_v62  ;;  %v533_v0 = vpop.permute.xlu0 %532  ;;  %v537_v3 = vpop.permute.xlu1 %536 }
  0xd2   : > { %vm576_vm9 = vcmp.eq.s32.totalorder %v533_v0, %v3001_v40  ;;  %vm577_vm10 = vcmp.eq.s32.totalorder %v537_v3, %v3001_v40 }
  0xd3   : > { %v2400_v4 = vsel %vm576_vm9, 1.0, %v2863_v44  ;;  %v2401_v6 = vsel %vm577_vm10, 1.0, %v2863_v44  ;;  %v2847_v44 = vld [vmem:[%s3337_s5] sm:$0xff]  }
  0xd4   : > { %2655 = vmatmul.mubr.msk.f32.gmra.mrb[36].mxu0 %vm658_vm0, %v2399_v63  ;;  %2736 = vmatprep.subr.bf16.mxu0 %v2847_v44 }
  0xd5   : > { %2657 = vmatprep.mubr.msk.f32.mxu0 %vm658_vm0, %v2400_v4  ;;  %2737 = vmatpush3.bf16.msra.mxu0 %v2847_v44 }
  0xd6   : > { %2738 = vmatprep.subr.bf16.mxu0 %v2848_v12 }
  0xd8   : > { %2658 = vmatmul.mubr.msk.f32.gmra.mrb[38].mxu0 %vm658_vm0, %v2401_v6 }
  0xd9   : > { %2739 = vmatpush3.bf16.msra.mxu0 %v2848_v12 }
  0xda   : > { %2740 = vmatprep.subr.bf16.mxu0 %v2849_v13 }
  0xdd   : > { %2741 = vmatpush3.bf16.msra.mxu0 %v2849_v13 }
  0xde   : > { %2742 = vmatprep.subr.bf16.mxu0 %v2850_v14 }
  0xe1   : > { %2743 = vmatpush3.bf16.msra.mxu0 %v2850_v14 }
  0xe2   : > { %2744 = vmatprep.subr.bf16.mxu0 %v2851_v15 }
  0xe5   : > { %2745 = vmatpush3.bf16.msra.mxu0 %v2851_v15 }
  0xfb   : > { %v3150_v16 = vpop.f32.mrb[0].mxu1 }
  0xfc   : > { %v3152_v17 = vpop.f32.mrb[1].mxu1 }
  0xfd   : > { %v3154_v18 = vpop.f32.mrb[2].mxu1 }
  0xfe   : > { %v3156_v19 = vpop.f32.mrb[3].mxu1 }
 0x15f   : > { %v2602_v20 = vpop.f32.mrb[0].mxu0 }
 0x160   : > { %v1045_v21 = vsub.f32 %v2602_v20, %v2937_v9  ;;  %v845_v22 = vpop.f32.mrb[1].mxu0 }
 0x161   : > { %v1044_v23 = vsub.f32 %v845_v22, %v2932_v5 }
 0x163   : > { %v1206_v24 = vpack.c.bf16 %v1045_v21, %v1044_v23  ;;  %v2605_v25 = vpop.f32.mrb[2].mxu0 }
 0x164   : > { %v1047_v26 = vsub.f32 %v2605_v25, %v2941_v11  ;;  %v855_v27 = vpop.f32.mrb[3].mxu0 }
 0x165   : > { %v1046_v28 = vsub.f32 %v855_v27, %v2939_v10  ;;  %2696 = vmatprep.mubr.bf16.mxu1 %v1206_v24 }
 0x167   : > { %v1207_v29 = vpack.c.bf16 %v1047_v26, %v1046_v28  ;;  %v2608_v30 = vpop.f32.mrb[4].mxu0 }
 0x168   : > { %v1049_v31 = vsub.f32 %v2608_v30, %v2937_v9  ;;  %v865_v32 = vpop.f32.mrb[5].mxu0 }
 0x169   : > { %v1048_v33 = vsub.f32 %v865_v32, %v2932_v5  ;;  %2697 = vmatmul.mubr.bf16.vlgmr.msra.gmra.mrb[4].mxu1 %v1207_v29 }
 0x16b   : > { %v1208_v34 = vpack.c.bf16 %v1049_v31, %v1048_v33  ;;  %v2611_v35 = vpop.f32.mrb[6].mxu0 }
 0x16c   : > { %v1051_v36 = vsub.f32 %v2611_v35, %v2941_v11  ;;  %v875_v37 = vpop.f32.mrb[7].mxu0 }
 0x16d   : > { %v1050_v38 = vsub.f32 %v875_v37, %v2939_v10  ;;  %2700 = vmatprep.mubr.bf16.mxu1 %v1208_v34 }
 0x16f   : > { %v1209_v39 = vpack.c.bf16 %v1051_v36, %v1050_v38  ;;  %v2614_v41 = vpop.f32.mrb[8].mxu0 }
 0x170   : > { %v1053_v42 = vsub.f32 %v2614_v41, %v2937_v9  ;;  %v885_v43 = vpop.f32.mrb[9].mxu0 }
 0x171   : > { %v1052_v45 = vsub.f32 %v885_v43, %v2932_v5  ;;  %2701 = vmatmul.mubr.bf16.gmra.mrb[8].mxu1 %v1209_v39 }
 0x173   : > { %v1210_v46 = vpack.c.bf16 %v1053_v42, %v1052_v45  ;;  %v2617_v47 = vpop.f32.mrb[10].mxu0 }
 0x174   : > { %v1055_v48 = vsub.f32 %v2617_v47, %v2941_v11  ;;  %v895_v49 = vpop.f32.mrb[11].mxu0 }
 0x175   : > { %v1054_v50 = vsub.f32 %v895_v49, %v2939_v10  ;;  %2704 = vmatprep.mubr.bf16.mxu1 %v1210_v46 }
 0x177   : > { %v1211_v51 = vpack.c.bf16 %v1055_v48, %v1054_v50  ;;  %v2620_v52 = vpop.f32.mrb[12].mxu0 }
 0x178   : > { %v1057_v53 = vsub.f32 %v2620_v52, %v2937_v9  ;;  %v905_v54 = vpop.f32.mrb[13].mxu0 }
 0x179   : > { %v1056_v55 = vsub.f32 %v905_v54, %v2932_v5  ;;  %2705 = vmatmul.mubr.bf16.gmra.mrb[12].mxu1 %v1211_v51 }
 0x17b   : > { %v1212_v56 = vpack.c.bf16 %v1057_v53, %v1056_v55  ;;  %v2623_v57 = vpop.f32.mrb[14].mxu0 }
 0x17c   : > { %v1059_v58 = vsub.f32 %v2623_v57, %v2941_v11  ;;  %v915_v59 = vpop.f32.mrb[15].mxu0 }
 0x17d   : > { %v1058_v60 = vsub.f32 %v915_v59, %v2939_v10  ;;  %2708 = vmatprep.mubr.bf16.mxu1 %v1212_v56 }
 0x17f   : > { %v1213_v61 = vpack.c.bf16 %v1059_v58, %v1058_v60  ;;  %v2626_v62 = vpop.f32.mrb[16].mxu0 }
 0x180   : > { %v1061_v63 = vsub.f32 %v2626_v62, %v2937_v9  ;;  %v925_v0 = vpop.f32.mrb[17].mxu0 }
 0x181   : > { %v1060_v3 = vsub.f32 %v925_v0, %v2932_v5  ;;  %2709 = vmatmul.mubr.bf16.gmra.mrb[16].mxu1 %v1213_v61 }
 0x183   : > { %v1214_v4 = vpack.c.bf16 %v1061_v63, %v1060_v3  ;;  %v2629_v6 = vpop.f32.mrb[18].mxu0 }
 0x184   : > { %v1063_v7 = vsub.f32 %v2629_v6, %v2941_v11  ;;  %v935_v8 = vpop.f32.mrb[19].mxu0 }
 0x185   : > { %v1062_v44 = vsub.f32 %v935_v8, %v2939_v10  ;;  %2712 = vmatprep.mubr.bf16.mxu1 %v1214_v4  ;;  %v2852_v8 = vld [vmem:[%s3337_s5 + $0x28] sm:$0xff]  }
 0x186   : > { %2746 = vmatprep.subr.bf16.mxu0 %v2852_v8 }
 0x187   : > { %v1215_v12 = vpack.c.bf16 %v1063_v7, %v1062_v44  ;;  %v2632_v13 = vpop.f32.mrb[20].mxu0  ;;  %2747 = vmatpush3.bf16.msra.mxu0 %v2852_v8 }
 0x188   : > { %v1065_v14 = vsub.f32 %v2632_v13, %v2937_v9  ;;  %v945_v15 = vpop.f32.mrb[21].mxu0 }
 0x189   : > { %v1064_v20 = vsub.f32 %v945_v15, %v2932_v5  ;;  %2713 = vmatmul.mubr.bf16.gmra.mrb[20].mxu1 %v1215_v12 }
 0x18b   : > { %v1216_v21 = vpack.c.bf16 %v1065_v14, %v1064_v20  ;;  %v2635_v22 = vpop.f32.mrb[22].mxu0 }
 0x18c   : > { %v1067_v23 = vsub.f32 %v2635_v22, %v2941_v11  ;;  %v955_v24 = vpop.f32.mrb[23].mxu0 }
 0x18d   : > { %v1066_v25 = vsub.f32 %v955_v24, %v2939_v10  ;;  %2716 = vmatprep.mubr.bf16.mxu1 %v1216_v21 }
 0x18f   : > { %v1217_v26 = vpack.c.bf16 %v1067_v23, %v1066_v25  ;;  %v2638_v27 = vpop.f32.mrb[24].mxu0 }
 0x190   : > { %v1069_v28 = vsub.f32 %v2638_v27, %v2937_v9  ;;  %v965_v29 = vpop.f32.mrb[25].mxu0 }
 0x191   : > { %v1068_v30 = vsub.f32 %v965_v29, %v2932_v5  ;;  %2717 = vmatmul.mubr.bf16.gmra.mrb[24].mxu1 %v1217_v26 }
 0x193   : > { %v1218_v31 = vpack.c.bf16 %v1069_v28, %v1068_v30  ;;  %v2641_v32 = vpop.f32.mrb[26].mxu0 }
 0x194   : > { %v1071_v33 = vsub.f32 %v2641_v32, %v2941_v11  ;;  %v975_v34 = vpop.f32.mrb[27].mxu0 }
 0x195   : > { %v1070_v35 = vsub.f32 %v975_v34, %v2939_v10  ;;  %2720 = vmatprep.mubr.bf16.mxu1 %v1218_v31 }
 0x197   : > { %v1219_v36 = vpack.c.bf16 %v1071_v33, %v1070_v35  ;;  %v2644_v37 = vpop.f32.mrb[28].mxu0 }
 0x198   : > { %v1073_v38 = vsub.f32 %v2644_v37, %v2937_v9  ;;  %v985_v39 = vpop.f32.mrb[29].mxu0 }
 0x199   : > { %v1072_v41 = vsub.f32 %v985_v39, %v2932_v5  ;;  %2721 = vmatmul.mubr.bf16.gmra.mrb[28].mxu1 %v1219_v36 }
 0x19b   : > { %v1220_v42 = vpack.c.bf16 %v1073_v38, %v1072_v41  ;;  %v2647_v43 = vpop.f32.mrb[30].mxu0 }
 0x19c   : > { %v1075_v45 = vsub.f32 %v2647_v43, %v2941_v11  ;;  %v995_v46 = vpop.f32.mrb[31].mxu0 }
 0x19d   : > { %v1074_v47 = vsub.f32 %v995_v46, %v2939_v10  ;;  %2724 = vmatprep.mubr.bf16.mxu1 %v1220_v42 }
 0x19f   : > { %v1221_v48 = vpack.c.bf16 %v1075_v45, %v1074_v47  ;;  %v2650_v49 = vpop.f32.mrb[32].mxu0 }
 0x1a0   : > { %v1077_v50 = vsub.f32 %v2650_v49, %v2937_v9  ;;  %v1005_v51 = vpop.f32.mrb[33].mxu0 }
 0x1a1   : > { %v1076_v52 = vsub.f32 %v1005_v51, %v2932_v5  ;;  %2725 = vmatmul.mubr.bf16.gmra.mrb[32].mxu1 %v1221_v48 }
 0x1a3   : > { %v1222_v53 = vpack.c.bf16 %v1077_v50, %v1076_v52  ;;  %v2653_v54 = vpop.f32.mrb[34].mxu0 }
 0x1a4   : > { %v1079_v55 = vsub.f32 %v2653_v54, %v2941_v11  ;;  %v1015_v56 = vpop.f32.mrb[35].mxu0 }
 0x1a5   : > { %v1078_v57 = vsub.f32 %v1015_v56, %v2939_v10  ;;  %2728 = vmatprep.mubr.bf16.mxu1 %v1222_v53 }
 0x1a7   : > { %v1223_v58 = vpack.c.bf16 %v1079_v55, %v1078_v57  ;;  %v2656_v59 = vpop.f32.mrb[36].mxu0 }
 0x1a8   : > { %v1081_v60 = vsub.f32 %v2656_v59, %v2937_v9  ;;  %v1025_v61 = vpop.f32.mrb[37].mxu0  ;;  %v2854_v9 = vld [vmem:[%s3337_s5 + $0x38] sm:$0xff]  }
 0x1a9   : > { %v1080_v62 = vsub.f32 %v1025_v61, %v2932_v5  ;;  %2729 = vmatmul.mubr.bf16.gmra.mrb[36].mxu1 %v1223_v58  ;;  %v2853_v5 = vld [vmem:[%s3337_s5 + $0x30] sm:$0xff]  }
 0x1aa   : > { %2748 = vmatprep.subr.bf16.mxu0 %v2853_v5 }
 0x1ab   : > { %v1224_v63 = vpack.c.bf16 %v1081_v60, %v1080_v62  ;;  %v2659_v0 = vpop.f32.mrb[38].mxu0  ;;  %2749 = vmatpush3.bf16.msra.mxu0 %v2853_v5 }
 0x1ac   : > { %v1083_v3 = vsub.f32 %v2659_v0, %v2941_v11  ;;  %v1035_v4 = vpop.f32.mrb[39].mxu0  ;;  %2750 = vmatprep.subr.bf16.mxu0 %v2854_v9 }
 0x1ad   : > { %v1082_v6 = vsub.f32 %v1035_v4, %v2939_v10  ;;  %2732 = vmatprep.mubr.bf16.mxu1 %v1224_v63  ;;  %v2442_v10 = vld [vmem:[%s3336_s4] ss:$0 sm:$0xff] }
 0x1ae   : > { %v3211_v11 = vadd.f32 %v3150_v16, %v2442_v10  ;;  %v3214_v44 = vadd.f32 %v2442_v10, %v3152_v17  ;;  %v3217_v13 = vadd.f32 %v3154_v18, %v2442_v10  ;;  %v3221_v20 = vadd.f32 %v2442_v10, %v3156_v19 }
 0x1af   : > { %v1225_v7 = vpack.c.bf16 %v1083_v3, %v1082_v6  ;;  %2751 = vmatpush3.bf16.msra.mxu0 %v2854_v9 }
 0x1b1   : > { %2733 = vmatmul.mubr.bf16.gmra.mrb[40].mxu1 %v1225_v7 }
 0x23c   : > { %v2698_v12 = vpop.f32.mrb[4].mxu1 }
 0x23d   : > { %v1485_v14 = vadd.f32 %v2698_v12, %v3211_v11  ;;  %v1324_v15 = vpop.f32.mrb[5].mxu1 }
 0x23e   : > { %v1483_v21 = vadd.f32 %v1324_v15, %v3214_v44  ;;  %v2699_v22 = vpop.f32.mrb[6].mxu1 }
 0x23f   : > { %v1565_v23 = vmul.f32 0.2, %v1485_v14  ;;  %v1486_v16 = vadd.f32 %v2699_v22, %v3217_v13  ;;  %v1327_v24 = vpop.f32.mrb[7].mxu1  ;;  %vm1525_vm11 = vcmp.gt.f32.partialorder %v1485_v14, 0.0 }
 0x240   : > { %v1563_v17 = vmul.f32 0.2, %v1483_v21  ;;  %v1484_v25 = vadd.f32 %v1327_v24, %v3221_v20  ;;  %vm1523_vm12 = vcmp.gt.f32.partialorder %v1483_v21, 0.0 }
 0x241   : > { %vm1526_vm13 = vcmp.gt.f32.partialorder %v1486_v16, 0.0  ;;  %v1566_v18 = vmul.f32 0.2, %v1486_v16  ;;  %v1605_v27 = vsel %vm1525_vm11, %v1485_v14, %v1565_v23 }
 0x242   : > { %vm1524_vm14 = vcmp.gt.f32.partialorder %v1484_v25, 0.0  ;;  %v1564_v26 = vmul.f32 0.2, %v1484_v25  ;;  %v1603_v30 = vsel %vm1523_vm12, %v1483_v21, %v1563_v17 }
 0x243   : > { %v1606_v28 = vsel %vm1526_vm13, %v1486_v16, %v1566_v18 }
 0x244   : > { %v1644_v19 = vpack.c.bf16 %v1606_v28, %v1605_v27  ;;  %v2702_v29 = vpop.f32.mrb[8].mxu1  ;;  %v1604_v31 = vsel %vm1524_vm14, %v1484_v25, %v1564_v26 }
 0x245   : > { %v1489_v32 = vadd.f32 %v2702_v29, %v3211_v11  ;;  %v1340_v33 = vpop.f32.mrb[9].mxu1  ;;  %v1643_v34 = vpack.c.bf16 %v1604_v31, %v1603_v30 }
 0x246   : > { %v1487_v35 = vadd.f32 %v1340_v33, %v3214_v44  ;;  %v2703_v36 = vpop.f32.mrb[10].mxu1 }
 0x247   : > { %v1569_v37 = vmul.f32 0.2, %v1489_v32  ;;  %v1490_v38 = vadd.f32 %v2703_v36, %v3217_v13  ;;  %v1343_v39 = vpop.f32.mrb[11].mxu1  ;;  %2752 = vmatprep.mubr.bf16.mxu0 %v1643_v34  ;;  %vm1529_vm15 = vcmp.gt.f32.partialorder %v1489_v32, 0.0 }
 0x248   : > { %v1567_v41 = vmul.f32 0.2, %v1487_v35  ;;  %v1488_v42 = vadd.f32 %v1343_v39, %v3221_v20  ;;  %2753 = vmatmul.mubr.bf16.vlgmr.msra.gmra.mrb[40].mxu0 %v1644_v19  ;;  %vm1527_vm1 = vcmp.gt.f32.partialorder %v1487_v35, 0.0 }
 0x249   : > { %vm1530_vm2 = vcmp.gt.f32.partialorder %v1490_v38, 0.0  ;;  %v1570_v43 = vmul.f32 0.2, %v1490_v38  ;;  %v1609_v46 = vsel %vm1529_vm15, %v1489_v32, %v1569_v37 }
 0x24a   : > { %vm1528_vm3 = vcmp.gt.f32.partialorder %v1488_v42, 0.0  ;;  %v1568_v45 = vmul.f32 0.2, %v1488_v42  ;;  %v1607_v49 = vsel %vm1527_vm1, %v1487_v35, %v1567_v41 }
 0x24b   : > { %v1610_v47 = vsel %vm1530_vm2, %v1490_v38, %v1570_v43 }
 0x24c   : > { %v2706_v48 = vpop.f32.mrb[12].mxu1  ;;  %v1608_v50 = vsel %vm1528_vm3, %v1488_v42, %v1568_v45  ;;  %v1646_v51 = vpack.c.bf16 %v1610_v47, %v1609_v46 }
 0x24d   : > { %v1493_v52 = vadd.f32 %v2706_v48, %v3211_v11  ;;  %v1356_v53 = vpop.f32.mrb[13].mxu1  ;;  %v1645_v54 = vpack.c.bf16 %v1608_v50, %v1607_v49 }
 0x24e   : > { %v1491_v55 = vadd.f32 %v1356_v53, %v3214_v44  ;;  %v2707_v56 = vpop.f32.mrb[14].mxu1 }
 0x24f   : > { %v1573_v57 = vmul.f32 0.2, %v1493_v52  ;;  %v1494_v58 = vadd.f32 %v2707_v56, %v3217_v13  ;;  %v1359_v59 = vpop.f32.mrb[15].mxu1  ;;  %2756 = vmatprep.mubr.bf16.mxu0 %v1645_v54  ;;  %vm1533_vm4 = vcmp.gt.f32.partialorder %v1493_v52, 0.0 }
 0x250   : > { %v1571_v60 = vmul.f32 0.2, %v1491_v55  ;;  %v1492_v61 = vadd.f32 %v1359_v59, %v3221_v20  ;;  %2757 = vmatmul.mubr.bf16.gmra.mrb[44].mxu0 %v1646_v51  ;;  %vm1531_vm5 = vcmp.gt.f32.partialorder %v1491_v55, 0.0 }
 0x251   : > { %vm1534_vm6 = vcmp.gt.f32.partialorder %v1494_v58, 0.0  ;;  %v1574_v62 = vmul.f32 0.2, %v1494_v58  ;;  %v1613_v0 = vsel %vm1533_vm4, %v1493_v52, %v1573_v57 }
 0x252   : > { %vm1532_vm7 = vcmp.gt.f32.partialorder %v1492_v61, 0.0  ;;  %v1572_v63 = vmul.f32 0.2, %v1492_v61  ;;  %v1611_v6 = vsel %vm1531_vm5, %v1491_v55, %v1571_v60 }
 0x253   : > { %v1614_v3 = vsel %vm1534_vm6, %v1494_v58, %v1574_v62 }
 0x254   : > { %v2710_v4 = vpop.f32.mrb[16].mxu1  ;;  %v1612_v7 = vsel %vm1532_vm7, %v1492_v61, %v1572_v63  ;;  %v1648_v8 = vpack.c.bf16 %v1614_v3, %v1613_v0 }
 0x255   : > { %v1497_v5 = vadd.f32 %v2710_v4, %v3211_v11  ;;  %v1372_v9 = vpop.f32.mrb[17].mxu1  ;;  %v1647_v10 = vpack.c.bf16 %v1612_v7, %v1611_v6 }
 0x256   : > { %v1495_v12 = vadd.f32 %v1372_v9, %v3214_v44  ;;  %v2711_v14 = vpop.f32.mrb[18].mxu1 }
 0x257   : > { %v1577_v15 = vmul.f32 0.2, %v1497_v5  ;;  %v1498_v21 = vadd.f32 %v2711_v14, %v3217_v13  ;;  %v1375_v22 = vpop.f32.mrb[19].mxu1  ;;  %2760 = vmatprep.mubr.bf16.mxu0 %v1647_v10  ;;  %vm1537_vm8 = vcmp.gt.f32.partialorder %v1497_v5, 0.0 }
 0x258   : > { %v1575_v23 = vmul.f32 0.2, %v1495_v12  ;;  %v1496_v16 = vadd.f32 %v1375_v22, %v3221_v20  ;;  %2761 = vmatmul.mubr.bf16.gmra.mrb[48].mxu0 %v1648_v8  ;;  %vm1535_vm9 = vcmp.gt.f32.partialorder %v1495_v12, 0.0 }
 0x259   : > { %vm1538_vm10 = vcmp.gt.f32.partialorder %v1498_v21, 0.0  ;;  %v1578_v24 = vmul.f32 0.2, %v1498_v21  ;;  %v1617_v25 = vsel %vm1537_vm8, %v1497_v5, %v1577_v15 }
 0x25a   : > { %vm1536_vm11 = vcmp.gt.f32.partialorder %v1496_v16, 0.0  ;;  %v1576_v17 = vmul.f32 0.2, %v1496_v16  ;;  %v1615_v27 = vsel %vm1535_vm9, %v1495_v12, %v1575_v23 }
 0x25b   : > { %v1618_v18 = vsel %vm1538_vm10, %v1498_v21, %v1578_v24 }
 0x25c   : > { %v2714_v26 = vpop.f32.mrb[20].mxu1  ;;  %v1616_v28 = vsel %vm1536_vm11, %v1496_v16, %v1576_v17  ;;  %v1650_v19 = vpack.c.bf16 %v1618_v18, %v1617_v25 }
 0x25d   : > { %v1501_v29 = vadd.f32 %v2714_v26, %v3211_v11  ;;  %v1388_v30 = vpop.f32.mrb[21].mxu1  ;;  %v1649_v31 = vpack.c.bf16 %v1616_v28, %v1615_v27 }
 0x25e   : > { %v1499_v32 = vadd.f32 %v1388_v30, %v3214_v44  ;;  %v2715_v33 = vpop.f32.mrb[22].mxu1 }
 0x25f   : > { %v1581_v34 = vmul.f32 0.2, %v1501_v29  ;;  %v1502_v35 = vadd.f32 %v2715_v33, %v3217_v13  ;;  %v1391_v36 = vpop.f32.mrb[23].mxu1  ;;  %2764 = vmatprep.mubr.bf16.mxu0 %v1649_v31  ;;  %vm1541_vm12 = vcmp.gt.f32.partialorder %v1501_v29, 0.0 }
 0x260   : > { %v1579_v37 = vmul.f32 0.2, %v1499_v32  ;;  %v1500_v38 = vadd.f32 %v1391_v36, %v3221_v20  ;;  %2765 = vmatmul.mubr.bf16.gmra.mrb[52].mxu0 %v1650_v19  ;;  %vm1539_vm13 = vcmp.gt.f32.partialorder %v1499_v32, 0.0 }
 0x261   : > { %vm1542_vm14 = vcmp.gt.f32.partialorder %v1502_v35, 0.0  ;;  %v1582_v39 = vmul.f32 0.2, %v1502_v35  ;;  %v1621_v42 = vsel %vm1541_vm12, %v1501_v29, %v1581_v34 }
 0x262   : > { %vm1540_vm15 = vcmp.gt.f32.partialorder %v1500_v38, 0.0  ;;  %v1580_v41 = vmul.f32 0.2, %v1500_v38  ;;  %v1619_v46 = vsel %vm1539_vm13, %v1499_v32, %v1579_v37 }
 0x263   : > { %v1622_v43 = vsel %vm1542_vm14, %v1502_v35, %v1582_v39 }
 0x264   : > { %v2718_v45 = vpop.f32.mrb[24].mxu1  ;;  %v1620_v47 = vsel %vm1540_vm15, %v1500_v38, %v1580_v41  ;;  %v1652_v48 = vpack.c.bf16 %v1622_v43, %v1621_v42 }
 0x265   : > { %v1505_v49 = vadd.f32 %v2718_v45, %v3211_v11  ;;  %v1404_v50 = vpop.f32.mrb[25].mxu1  ;;  %v1651_v51 = vpack.c.bf16 %v1620_v47, %v1619_v46 }
 0x266   : > { %v1503_v52 = vadd.f32 %v1404_v50, %v3214_v44  ;;  %v2719_v53 = vpop.f32.mrb[26].mxu1 }
 0x267   : > { %v1585_v54 = vmul.f32 0.2, %v1505_v49  ;;  %v1506_v55 = vadd.f32 %v2719_v53, %v3217_v13  ;;  %v1407_v56 = vpop.f32.mrb[27].mxu1  ;;  %2768 = vmatprep.mubr.bf16.mxu0 %v1651_v51  ;;  %vm1545_vm1 = vcmp.gt.f32.partialorder %v1505_v49, 0.0 }
 0x268   : > { %v1583_v57 = vmul.f32 0.2, %v1503_v52  ;;  %v1504_v58 = vadd.f32 %v1407_v56, %v3221_v20  ;;  %2769 = vmatmul.mubr.bf16.gmra.mrb[56].mxu0 %v1652_v48  ;;  %vm1543_vm2 = vcmp.gt.f32.partialorder %v1503_v52, 0.0 }
 0x269   : > { %vm1546_vm3 = vcmp.gt.f32.partialorder %v1506_v55, 0.0  ;;  %v1586_v59 = vmul.f32 0.2, %v1506_v55  ;;  %v1625_v61 = vsel %vm1545_vm1, %v1505_v49, %v1585_v54 }
 0x26a   : > { %vm1544_vm4 = vcmp.gt.f32.partialorder %v1504_v58, 0.0  ;;  %v1584_v60 = vmul.f32 0.2, %v1504_v58  ;;  %v1623_v0 = vsel %vm1543_vm2, %v1503_v52, %v1583_v57 }
 0x26b   : > { %v1626_v62 = vsel %vm1546_vm3, %v1506_v55, %v1586_v59 }
 0x26c   : > { %v2722_v63 = vpop.f32.mrb[28].mxu1  ;;  %v1624_v3 = vsel %vm1544_vm4, %v1504_v58, %v1584_v60  ;;  %v1654_v4 = vpack.c.bf16 %v1626_v62, %v1625_v61 }
 0x26d   : > { %v1509_v6 = vadd.f32 %v2722_v63, %v3211_v11  ;;  %v1420_v7 = vpop.f32.mrb[29].mxu1  ;;  %v1653_v8 = vpack.c.bf16 %v1624_v3, %v1623_v0 }
 0x26e   : > { %v1507_v5 = vadd.f32 %v1420_v7, %v3214_v44  ;;  %v2723_v9 = vpop.f32.mrb[30].mxu1 }
 0x26f   : > { %v1589_v10 = vmul.f32 0.2, %v1509_v6  ;;  %v1510_v12 = vadd.f32 %v2723_v9, %v3217_v13  ;;  %v1423_v14 = vpop.f32.mrb[31].mxu1  ;;  %2772 = vmatprep.mubr.bf16.mxu0 %v1653_v8  ;;  %vm1549_vm5 = vcmp.gt.f32.partialorder %v1509_v6, 0.0 }
 0x270   : > { %v1587_v15 = vmul.f32 0.2, %v1507_v5  ;;  %v1508_v21 = vadd.f32 %v1423_v14, %v3221_v20  ;;  %2773 = vmatmul.mubr.bf16.gmra.mrb[60].mxu0 %v1654_v4  ;;  %vm1547_vm6 = vcmp.gt.f32.partialorder %v1507_v5, 0.0 }
 0x271   : > { %vm1550_vm7 = vcmp.gt.f32.partialorder %v1510_v12, 0.0  ;;  %v1590_v22 = vmul.f32 0.2, %v1510_v12  ;;  %v1629_v16 = vsel %vm1549_vm5, %v1509_v6, %v1589_v10 }
 0x272   : > { %vm1548_vm8 = vcmp.gt.f32.partialorder %v1508_v21, 0.0  ;;  %v1588_v23 = vmul.f32 0.2, %v1508_v21  ;;  %v1627_v25 = vsel %vm1547_vm6, %v1507_v5, %v1587_v15 }
 0x273   : > { %v1630_v24 = vsel %vm1550_vm7, %v1510_v12, %v1590_v22 }
 0x274   : > { %v2726_v17 = vpop.f32.mrb[32].mxu1  ;;  %v1628_v18 = vsel %vm1548_vm8, %v1508_v21, %v1588_v23  ;;  %v1656_v26 = vpack.c.bf16 %v1630_v24, %v1629_v16 }
 0x275   : > { %v1513_v27 = vadd.f32 %v2726_v17, %v3211_v11  ;;  %v1436_v28 = vpop.f32.mrb[33].mxu1  ;;  %v1655_v19 = vpack.c.bf16 %v1628_v18, %v1627_v25 }
 0x276   : > { %v1511_v29 = vadd.f32 %v1436_v28, %v3214_v44  ;;  %v2727_v30 = vpop.f32.mrb[34].mxu1 }
 0x277   : > { %v1593_v31 = vmul.f32 0.2, %v1513_v27  ;;  %v1514_v32 = vadd.f32 %v2727_v30, %v3217_v13  ;;  %v1439_v33 = vpop.f32.mrb[35].mxu1  ;;  %2776 = vmatprep.mubr.bf16.mxu0 %v1655_v19  ;;  %vm1553_vm9 = vcmp.gt.f32.partialorder %v1513_v27, 0.0 }
 0x278   : > { %v1591_v34 = vmul.f32 0.2, %v1511_v29  ;;  %v1512_v35 = vadd.f32 %v1439_v33, %v3221_v20  ;;  %2777 = vmatmul.mubr.bf16.gmra.mrb[64].mxu0 %v1656_v26  ;;  %vm1551_vm10 = vcmp.gt.f32.partialorder %v1511_v29, 0.0 }
 0x279   : > { %vm1554_vm11 = vcmp.gt.f32.partialorder %v1514_v32, 0.0  ;;  %v1594_v36 = vmul.f32 0.2, %v1514_v32  ;;  %v1633_v38 = vsel %vm1553_vm9, %v1513_v27, %v1593_v31 }
 0x27a   : > { %vm1552_vm12 = vcmp.gt.f32.partialorder %v1512_v35, 0.0  ;;  %v1592_v37 = vmul.f32 0.2, %v1512_v35  ;;  %v1631_v42 = vsel %vm1551_vm10, %v1511_v29, %v1591_v34 }
 0x27b   : > { %v1634_v39 = vsel %vm1554_vm11, %v1514_v32, %v1594_v36 }
 0x27c   : > { %v2730_v41 = vpop.f32.mrb[36].mxu1  ;;  %v1632_v43 = vsel %vm1552_vm12, %v1512_v35, %v1592_v37  ;;  %v1658_v45 = vpack.c.bf16 %v1634_v39, %v1633_v38 }
 0x27d   : > { %v1517_v46 = vadd.f32 %v2730_v41, %v3211_v11  ;;  %v1452_v47 = vpop.f32.mrb[37].mxu1  ;;  %v1657_v48 = vpack.c.bf16 %v1632_v43, %v1631_v42 }
 0x27e   : > { %v1515_v49 = vadd.f32 %v1452_v47, %v3214_v44  ;;  %v2731_v50 = vpop.f32.mrb[38].mxu1 }
 0x27f   : > { %v1597_v51 = vmul.f32 0.2, %v1517_v46  ;;  %v1518_v52 = vadd.f32 %v2731_v50, %v3217_v13  ;;  %v1455_v53 = vpop.f32.mrb[39].mxu1  ;;  %2780 = vmatprep.mubr.bf16.mxu0 %v1657_v48  ;;  %vm1557_vm13 = vcmp.gt.f32.partialorder %v1517_v46, 0.0 }
 0x280   : > { %v1595_v54 = vmul.f32 0.2, %v1515_v49  ;;  %v1516_v55 = vadd.f32 %v1455_v53, %v3221_v20  ;;  %2781 = vmatmul.mubr.bf16.gmra.mrb[68].mxu0 %v1658_v45  ;;  %vm1555_vm14 = vcmp.gt.f32.partialorder %v1515_v49, 0.0 }
 0x281   : > { %vm1558_vm15 = vcmp.gt.f32.partialorder %v1518_v52, 0.0  ;;  %v1598_v56 = vmul.f32 0.2, %v1518_v52  ;;  %v1637_v58 = vsel %vm1557_vm13, %v1517_v46, %v1597_v51 }
 0x282   : > { %vm1556_vm1 = vcmp.gt.f32.partialorder %v1516_v55, 0.0  ;;  %v1596_v57 = vmul.f32 0.2, %v1516_v55  ;;  %v1635_v61 = vsel %vm1555_vm14, %v1515_v49, %v1595_v54 }
 0x283   : > { %v1638_v59 = vsel %vm1558_vm15, %v1518_v52, %v1598_v56 }
 0x284   : > { %v2734_v60 = vpop.f32.mrb[40].mxu1  ;;  %v1636_v62 = vsel %vm1556_vm1, %v1516_v55, %v1596_v57  ;;  %v1660_v63 = vpack.c.bf16 %v1638_v59, %v1637_v58 }
 0x285   : > { %v1521_v0 = vadd.f32 %v2734_v60, %v3211_v11  ;;  %v1468_v3 = vpop.f32.mrb[41].mxu1  ;;  %v1659_v4 = vpack.c.bf16 %v1636_v62, %v1635_v61 }
 0x286   : > { %v1519_v6 = vadd.f32 %v1468_v3, %v3214_v44  ;;  %v2735_v7 = vpop.f32.mrb[42].mxu1 }
 0x287   : > { %v1601_v8 = vmul.f32 0.2, %v1521_v0  ;;  %v1522_v5 = vadd.f32 %v2735_v7, %v3217_v13  ;;  %v1471_v9 = vpop.f32.mrb[43].mxu1  ;;  %2784 = vmatprep.mubr.bf16.mxu0 %v1659_v4  ;;  %vm1561_vm2 = vcmp.gt.f32.partialorder %v1521_v0, 0.0  ;;  %v3265_v13 = vld [vmem:[%s3338_s6] ss:$0 sm:$0xff] }
 0x288   : > { %v1599_v10 = vmul.f32 0.2, %v1519_v6  ;;  %v1520_v12 = vadd.f32 %v1471_v9, %v3221_v20  ;;  %2785 = vmatmul.mubr.bf16.gmra.mrb[72].mxu0 %v1660_v63  ;;  %vm1559_vm3 = vcmp.gt.f32.partialorder %v1519_v6, 0.0 }
 0x289   : > { %vm1562_vm4 = vcmp.gt.f32.partialorder %v1522_v5, 0.0  ;;  %v1602_v14 = vmul.f32 0.2, %v1522_v5  ;;  %v1641_v15 = vsel %vm1561_vm2, %v1521_v0, %v1601_v8 }
 0x28a   : > { %vm1560_vm5 = vcmp.gt.f32.partialorder %v1520_v12, 0.0  ;;  %v1600_v11 = vmul.f32 0.2, %v1520_v12  ;;  %v1639_v22 = vsel %vm1559_vm3, %v1519_v6, %v1599_v10 }
 0x28b   : > { %v1642_v21 = vsel %vm1562_vm4, %v1522_v5, %v1602_v14 }
 0x28c   : > { %v1640_v44 = vsel %vm1560_vm5, %v1520_v12, %v1600_v11  ;;  %v1662_v23 = vpack.c.bf16 %v1642_v21, %v1641_v15 }
 0x28d   : > { %v1661_v16 = vpack.c.bf16 %v1640_v44, %v1639_v22 }
 0x28f   : > { %2788 = vmatprep.mubr.bf16.mxu0 %v1661_v16 }
 0x290   : > { %2789 = vmatmul.mubr.bf16.gmra.mrb[76].mxu0 %v1662_v23 }
 0x31b   : > { %v2754_v20 = vpop.f32.mrb[40].mxu0 }
 0x31c   : > { %v1768_v24 = vpop.f32.mrb[41].mxu0  ;;  %v1777_v17 = vadd.f32 %v2754_v20, %v3265_v13 }
 0x31d   : > { %v2755_v25 = vpop.f32.mrb[42].mxu0  ;;  %v1769_v18 = vadd.f32 %v3265_v13, %v1768_v24 }
 0x31e   : > { %v1771_v26 = vpop.f32.mrb[43].mxu0  ;;  %v1969_v27 = vmul.f32 0.2, %v1777_v17  ;;  %v1780_v28 = vadd.f32 %v2755_v25, %v3265_v13  ;;  %vm1929_vm6 = vcmp.gt.f32.partialorder %v1777_v17, 0.0 }
 0x31f   : > { %v1967_v19 = vmul.f32 0.2, %v1769_v18  ;;  %vm1927_vm7 = vcmp.gt.f32.partialorder %v1769_v18, 0.0  ;;  %v1772_v29 = vadd.f32 %v3265_v13, %v1771_v26 }
 0x320   : > { %v2009_v33 = vsel %vm1929_vm6, %v1777_v17, %v1969_v27  ;;  %vm1930_vm8 = vcmp.gt.f32.partialorder %v1780_v28, 0.0  ;;  %v1970_v34 = vmul.f32 0.2, %v1780_v28 }
 0x321   : > { %v2007_v37 = vsel %vm1927_vm7, %v1769_v18, %v1967_v19  ;;  %v1968_v42 = vmul.f32 0.2, %v1772_v29  ;;  %vm1928_vm11 = vcmp.gt.f32.partialorder %v1772_v29, 0.0 }
 0x322   : > { %v2010_v51 = vsel %vm1930_vm8, %v1780_v28, %v1970_v34 }
 0x323   : > { %v2758_v30 = vpop.f32.mrb[44].mxu0  ;;  %v2008_v54 = vsel %vm1928_vm11, %v1772_v29, %v1968_v42 }
 0x324   : > { %v1793_v31 = vadd.f32 %v2758_v30, %v3265_v13  ;;  %v1784_v32 = vpop.f32.mrb[45].mxu0 }
 0x325   : > { %v1785_v35 = vadd.f32 %v3265_v13, %v1784_v32  ;;  %v2759_v36 = vpop.f32.mrb[46].mxu0 }
 0x326   : > { %vm1933_vm9 = vcmp.gt.f32.partialorder %v1793_v31, 0.0  ;;  %v1973_v38 = vmul.f32 0.2, %v1793_v31  ;;  %v1796_v39 = vadd.f32 %v2759_v36, %v3265_v13  ;;  %v1787_v41 = vpop.f32.mrb[47].mxu0 }
 0x327   : > { %vm1931_vm10 = vcmp.gt.f32.partialorder %v1785_v35, 0.0  ;;  %v1971_v43 = vmul.f32 0.2, %v1785_v35  ;;  %v1788_v45 = vadd.f32 %v3265_v13, %v1787_v41 }
 0x328   : > { %v2013_v46 = vsel %vm1933_vm9, %v1793_v31, %v1973_v38  ;;  %vm1934_vm12 = vcmp.gt.f32.partialorder %v1796_v39, 0.0  ;;  %v1974_v47 = vmul.f32 0.2, %v1796_v39 }
 0x329   : > { %v2065_v48 = vmax.f32 %v2009_v33, %v2013_v46  ;;  %v2011_v49 = vsel %vm1931_vm10, %v1785_v35, %v1971_v43  ;;  %vm1932_vm13 = vcmp.gt.f32.partialorder %v1788_v45, 0.0  ;;  %v1972_v50 = vmul.f32 0.2, %v1788_v45 }
 0x32a   : > { %v2047_v52 = vmax.f32 %v2007_v37, %v2011_v49  ;;  %v2014_v53 = vsel %vm1934_vm12, %v1796_v39, %v1974_v47 }
 0x32b   : > { %v2074_v55 = vmax.f32 %v2010_v51, %v2014_v53  ;;  %v2012_v56 = vsel %vm1932_vm13, %v1788_v45, %v1972_v50  ;;  %v2762_v57 = vpop.f32.mrb[48].mxu0 }
 0x32c   : > { %v2056_v58 = vmax.f32 %v2008_v54, %v2012_v56  ;;  %v1809_v59 = vadd.f32 %v2762_v57, %v3265_v13  ;;  %v1800_v60 = vpop.f32.mrb[49].mxu0 }
 0x32d   : > { %v1801_v61 = vadd.f32 %v3265_v13, %v1800_v60  ;;  %v2763_v62 = vpop.f32.mrb[50].mxu0 }
 0x32e   : > { %vm1937_vm14 = vcmp.gt.f32.partialorder %v1809_v59, 0.0  ;;  %v1977_v63 = vmul.f32 0.2, %v1809_v59  ;;  %v1812_v0 = vadd.f32 %v2763_v62, %v3265_v13  ;;  %v1803_v3 = vpop.f32.mrb[51].mxu0 }
 0x32f   : > { %vm1935_vm15 = vcmp.gt.f32.partialorder %v1801_v61, 0.0  ;;  %v1975_v4 = vmul.f32 0.2, %v1801_v61  ;;  %v1804_v6 = vadd.f32 %v3265_v13, %v1803_v3 }
 0x330   : > { %v2017_v7 = vsel %vm1937_vm14, %v1809_v59, %v1977_v63  ;;  %vm1938_vm1 = vcmp.gt.f32.partialorder %v1812_v0, 0.0  ;;  %v1978_v8 = vmul.f32 0.2, %v1812_v0 }
 0x331   : > { %v2066_v5 = vmax.f32 %v2065_v48, %v2017_v7  ;;  %v2015_v9 = vsel %vm1935_vm15, %v1801_v61, %v1975_v4  ;;  %vm1936_vm2 = vcmp.gt.f32.partialorder %v1804_v6, 0.0  ;;  %v1976_v10 = vmul.f32 0.2, %v1804_v6 }
 0x332   : > { %v2048_v12 = vmax.f32 %v2047_v52, %v2015_v9  ;;  %v2018_v14 = vsel %vm1938_vm1, %v1812_v0, %v1978_v8 }
 0x333   : > { %v2075_v11 = vmax.f32 %v2074_v55, %v2018_v14  ;;  %v2016_v15 = vsel %vm1936_vm2, %v1804_v6, %v1976_v10  ;;  %v2766_v21 = vpop.f32.mrb[52].mxu0 }
 0x334   : > { %v2057_v22 = vmax.f32 %v2056_v58, %v2016_v15  ;;  %v1825_v44 = vadd.f32 %v2766_v21, %v3265_v13  ;;  %v1816_v23 = vpop.f32.mrb[53].mxu0 }
 0x335   : > { %v1817_v16 = vadd.f32 %v3265_v13, %v1816_v23  ;;  %v2767_v20 = vpop.f32.mrb[54].mxu0 }
 0x336   : > { %vm1941_vm3 = vcmp.gt.f32.partialorder %v1825_v44, 0.0  ;;  %v1981_v24 = vmul.f32 0.2, %v1825_v44  ;;  %v1828_v17 = vadd.f32 %v2767_v20, %v3265_v13  ;;  %v1819_v25 = vpop.f32.mrb[55].mxu0 }
 0x337   : > { %vm1939_vm4 = vcmp.gt.f32.partialorder %v1817_v16, 0.0  ;;  %v1979_v18 = vmul.f32 0.2, %v1817_v16  ;;  %v1820_v26 = vadd.f32 %v3265_v13, %v1819_v25 }
 0x338   : > { %v2021_v27 = vsel %vm1941_vm3, %v1825_v44, %v1981_v24  ;;  %vm1942_vm5 = vcmp.gt.f32.partialorder %v1828_v17, 0.0  ;;  %v1982_v28 = vmul.f32 0.2, %v1828_v17 }
 0x339   : > { %v2067_v19 = vmax.f32 %v2066_v5, %v2021_v27  ;;  %v2019_v29 = vsel %vm1939_vm4, %v1817_v16, %v1979_v18  ;;  %vm1940_vm6 = vcmp.gt.f32.partialorder %v1820_v26, 0.0  ;;  %v1980_v30 = vmul.f32 0.2, %v1820_v26 }
 0x33a   : > { %v2049_v31 = vmax.f32 %v2048_v12, %v2019_v29  ;;  %v2022_v32 = vsel %vm1942_vm5, %v1828_v17, %v1982_v28 }
 0x33b   : > { %v2076_v33 = vmax.f32 %v2075_v11, %v2022_v32  ;;  %v2020_v34 = vsel %vm1940_vm6, %v1820_v26, %v1980_v30  ;;  %v2770_v35 = vpop.f32.mrb[56].mxu0 }
 0x33c   : > { %v2058_v36 = vmax.f32 %v2057_v22, %v2020_v34  ;;  %v1841_v37 = vadd.f32 %v2770_v35, %v3265_v13  ;;  %v1832_v38 = vpop.f32.mrb[57].mxu0 }
 0x33d   : > { %v1833_v39 = vadd.f32 %v3265_v13, %v1832_v38  ;;  %v2771_v41 = vpop.f32.mrb[58].mxu0 }
 0x33e   : > { %vm1945_vm7 = vcmp.gt.f32.partialorder %v1841_v37, 0.0  ;;  %v1985_v42 = vmul.f32 0.2, %v1841_v37  ;;  %v1844_v43 = vadd.f32 %v2771_v41, %v3265_v13  ;;  %v1835_v45 = vpop.f32.mrb[59].mxu0 }
 0x33f   : > { %vm1943_vm8 = vcmp.gt.f32.partialorder %v1833_v39, 0.0  ;;  %v1983_v46 = vmul.f32 0.2, %v1833_v39  ;;  %v1836_v47 = vadd.f32 %v3265_v13, %v1835_v45 }
 0x340   : > { %v2025_v48 = vsel %vm1945_vm7, %v1841_v37, %v1985_v42  ;;  %vm1946_vm9 = vcmp.gt.f32.partialorder %v1844_v43, 0.0  ;;  %v1986_v49 = vmul.f32 0.2, %v1844_v43 }
 0x341   : > { %v2068_v50 = vmax.f32 %v2067_v19, %v2025_v48  ;;  %v2023_v51 = vsel %vm1943_vm8, %v1833_v39, %v1983_v46  ;;  %vm1944_vm10 = vcmp.gt.f32.partialorder %v1836_v47, 0.0  ;;  %v1984_v52 = vmul.f32 0.2, %v1836_v47 }
 0x342   : > { %v2050_v53 = vmax.f32 %v2049_v31, %v2023_v51  ;;  %v2026_v54 = vsel %vm1946_vm9, %v1844_v43, %v1986_v49 }
 0x343   : > { %v2077_v55 = vmax.f32 %v2076_v33, %v2026_v54  ;;  %v2024_v56 = vsel %vm1944_vm10, %v1836_v47, %v1984_v52  ;;  %v2774_v57 = vpop.f32.mrb[60].mxu0 }
 0x344   : > { %v2059_v58 = vmax.f32 %v2058_v36, %v2024_v56  ;;  %v1857_v59 = vadd.f32 %v2774_v57, %v3265_v13  ;;  %v1848_v60 = vpop.f32.mrb[61].mxu0 }
 0x345   : > { %v1849_v61 = vadd.f32 %v3265_v13, %v1848_v60  ;;  %v2775_v62 = vpop.f32.mrb[62].mxu0 }
 0x346   : > { %vm1949_vm11 = vcmp.gt.f32.partialorder %v1857_v59, 0.0  ;;  %v1989_v63 = vmul.f32 0.2, %v1857_v59  ;;  %v1860_v0 = vadd.f32 %v2775_v62, %v3265_v13  ;;  %v1851_v3 = vpop.f32.mrb[63].mxu0 }
 0x347   : > { %vm1947_vm12 = vcmp.gt.f32.partialorder %v1849_v61, 0.0  ;;  %v1987_v4 = vmul.f32 0.2, %v1849_v61  ;;  %v1852_v6 = vadd.f32 %v3265_v13, %v1851_v3 }
 0x348   : > { %v2029_v7 = vsel %vm1949_vm11, %v1857_v59, %v1989_v63  ;;  %vm1950_vm13 = vcmp.gt.f32.partialorder %v1860_v0, 0.0  ;;  %v1990_v8 = vmul.f32 0.2, %v1860_v0 }
 0x349   : > { %v2069_v5 = vmax.f32 %v2068_v50, %v2029_v7  ;;  %v2027_v9 = vsel %vm1947_vm12, %v1849_v61, %v1987_v4  ;;  %vm1948_vm14 = vcmp.gt.f32.partialorder %v1852_v6, 0.0  ;;  %v1988_v10 = vmul.f32 0.2, %v1852_v6 }
 0x34a   : > { %v2051_v12 = vmax.f32 %v2050_v53, %v2027_v9  ;;  %v2030_v14 = vsel %vm1950_vm13, %v1860_v0, %v1990_v8 }
 0x34b   : > { %v2078_v11 = vmax.f32 %v2077_v55, %v2030_v14  ;;  %v2028_v15 = vsel %vm1948_vm14, %v1852_v6, %v1988_v10  ;;  %v2778_v21 = vpop.f32.mrb[64].mxu0 }
 0x34c   : > { %v2060_v22 = vmax.f32 %v2059_v58, %v2028_v15  ;;  %v1873_v44 = vadd.f32 %v2778_v21, %v3265_v13  ;;  %v1864_v23 = vpop.f32.mrb[65].mxu0 }
 0x34d   : > { %v1865_v16 = vadd.f32 %v3265_v13, %v1864_v23  ;;  %v2779_v20 = vpop.f32.mrb[66].mxu0 }
 0x34e   : > { %vm1953_vm15 = vcmp.gt.f32.partialorder %v1873_v44, 0.0  ;;  %v1993_v24 = vmul.f32 0.2, %v1873_v44  ;;  %v1876_v17 = vadd.f32 %v2779_v20, %v3265_v13  ;;  %v1867_v25 = vpop.f32.mrb[67].mxu0 }
 0x34f   : > { %vm1951_vm1 = vcmp.gt.f32.partialorder %v1865_v16, 0.0  ;;  %v1991_v18 = vmul.f32 0.2, %v1865_v16  ;;  %v1868_v26 = vadd.f32 %v3265_v13, %v1867_v25 }
 0x350   : > { %v2033_v27 = vsel %vm1953_vm15, %v1873_v44, %v1993_v24  ;;  %vm1954_vm2 = vcmp.gt.f32.partialorder %v1876_v17, 0.0  ;;  %v1994_v28 = vmul.f32 0.2, %v1876_v17 }
 0x351   : > { %v2070_v19 = vmax.f32 %v2069_v5, %v2033_v27  ;;  %v2031_v29 = vsel %vm1951_vm1, %v1865_v16, %v1991_v18  ;;  %vm1952_vm3 = vcmp.gt.f32.partialorder %v1868_v26, 0.0  ;;  %v1992_v30 = vmul.f32 0.2, %v1868_v26 }
 0x352   : > { %v2052_v31 = vmax.f32 %v2051_v12, %v2031_v29  ;;  %v2034_v32 = vsel %vm1954_vm2, %v1876_v17, %v1994_v28  ;;  %vm2237_vm1 = vcmp.eq.s32.totalorder %v2918_v1, %v3001_v40 }
 0x353   : > { %v2079_v33 = vmax.f32 %v2078_v11, %v2034_v32  ;;  %v2032_v34 = vsel %vm1952_vm3, %v1868_v26, %v1992_v30  ;;  %v2782_v35 = vpop.f32.mrb[68].mxu0 }
 0x354   : > { %v2061_v36 = vmax.f32 %v2060_v22, %v2032_v34  ;;  %v1889_v37 = vadd.f32 %v2782_v35, %v3265_v13  ;;  %v1880_v38 = vpop.f32.mrb[69].mxu0 }
 0x355   : > { %v1881_v39 = vadd.f32 %v3265_v13, %v1880_v38  ;;  %v2783_v41 = vpop.f32.mrb[70].mxu0 }
 0x356   : > { %vm1957_vm4 = vcmp.gt.f32.partialorder %v1889_v37, 0.0  ;;  %v1997_v42 = vmul.f32 0.2, %v1889_v37  ;;  %v1892_v43 = vadd.f32 %v2783_v41, %v3265_v13  ;;  %v1883_v45 = vpop.f32.mrb[71].mxu0 }
 0x357   : > { %vm1955_vm5 = vcmp.gt.f32.partialorder %v1881_v39, 0.0  ;;  %v1995_v46 = vmul.f32 0.2, %v1881_v39  ;;  %v1884_v47 = vadd.f32 %v3265_v13, %v1883_v45 }
 0x358   : > { %v2037_v48 = vsel %vm1957_vm4, %v1889_v37, %v1997_v42  ;;  %vm1958_vm6 = vcmp.gt.f32.partialorder %v1892_v43, 0.0  ;;  %v1998_v49 = vmul.f32 0.2, %v1892_v43 }
 0x359   : > { %v2071_v50 = vmax.f32 %v2070_v19, %v2037_v48  ;;  %v2035_v51 = vsel %vm1955_vm5, %v1881_v39, %v1995_v46  ;;  %vm1956_vm7 = vcmp.gt.f32.partialorder %v1884_v47, 0.0  ;;  %v1996_v52 = vmul.f32 0.2, %v1884_v47 }
 0x35a   : > { %v2053_v53 = vmax.f32 %v2052_v31, %v2035_v51  ;;  %v2038_v54 = vsel %vm1958_vm6, %v1892_v43, %v1998_v49 }
 0x35b   : > { %v2080_v55 = vmax.f32 %v2079_v33, %v2038_v54  ;;  %v2036_v56 = vsel %vm1956_vm7, %v1884_v47, %v1996_v52  ;;  %v2786_v57 = vpop.f32.mrb[72].mxu0 }
 0x35c   : > { %v2062_v58 = vmax.f32 %v2061_v36, %v2036_v56  ;;  %v1905_v59 = vadd.f32 %v2786_v57, %v3265_v13  ;;  %v1896_v60 = vpop.f32.mrb[73].mxu0  ;;  %v2235_v56 = vadd.s32 16, %v2918_v1  ;;  %v2236_v57 = vadd.s32 24, %v2918_v1 }
 0x35d   : > { %v1897_v61 = vadd.f32 %v3265_v13, %v1896_v60  ;;  %v2787_v62 = vpop.f32.mrb[74].mxu0 }
 0x35e   : > { %vm1961_vm8 = vcmp.gt.f32.partialorder %v1905_v59, 0.0  ;;  %v2001_v63 = vmul.f32 0.2, %v1905_v59  ;;  %v1908_v0 = vadd.f32 %v2787_v62, %v3265_v13  ;;  %v1899_v3 = vpop.f32.mrb[75].mxu0  ;;  %vm2239_vm3 = vcmp.eq.s32.totalorder %v2235_v56, %v3001_v40 }
 0x35f   : > { %vm1959_vm9 = vcmp.gt.f32.partialorder %v1897_v61, 0.0  ;;  %v1999_v4 = vmul.f32 0.2, %v1897_v61  ;;  %v1900_v6 = vadd.f32 %v3265_v13, %v1899_v3  ;;  %vm2240_vm4 = vcmp.eq.s32.totalorder %v2236_v57, %v3001_v40 }
 0x360   : > { %v2041_v7 = vsel %vm1961_vm8, %v1905_v59, %v2001_v63  ;;  %vm1962_vm10 = vcmp.gt.f32.partialorder %v1908_v0, 0.0  ;;  %v2002_v8 = vmul.f32 0.2, %v1908_v0 }
 0x361   : > { %v2072_v5 = vmax.f32 %v2071_v50, %v2041_v7  ;;  %v2039_v9 = vsel %vm1959_vm9, %v1897_v61, %v1999_v4  ;;  %vm1960_vm11 = vcmp.gt.f32.partialorder %v1900_v6, 0.0  ;;  %v2000_v10 = vmul.f32 0.2, %v1900_v6 }
 0x362   : > { %v2054_v12 = vmax.f32 %v2053_v53, %v2039_v9  ;;  %v2042_v14 = vsel %vm1962_vm10, %v1908_v0, %v2002_v8 }
 0x363   : > { %v2081_v11 = vmax.f32 %v2080_v55, %v2042_v14  ;;  %v2040_v15 = vsel %vm1960_vm11, %v1900_v6, %v2000_v10  ;;  %v2790_v21 = vpop.f32.mrb[76].mxu0  ;;  %v2234_v55 = vadd.s32 8, %v2918_v1 }
 0x364   : > { %v2063_v22 = vmax.f32 %v2062_v58, %v2040_v15  ;;  %v1921_v44 = vadd.f32 %v2790_v21, %v3265_v13  ;;  %v1912_v23 = vpop.f32.mrb[77].mxu0 }
 0x365   : > { %v1913_v16 = vadd.f32 %v3265_v13, %v1912_v23  ;;  %v2791_v20 = vpop.f32.mrb[78].mxu0  ;;  %vm2238_vm2 = vcmp.eq.s32.totalorder %v2234_v55, %v3001_v40 }
 0x366   : > { %vm1965_vm12 = vcmp.gt.f32.partialorder %v1921_v44, 0.0  ;;  %v2005_v24 = vmul.f32 0.2, %v1921_v44  ;;  %v1924_v17 = vadd.f32 %v2791_v20, %v3265_v13  ;;  %v1915_v25 = vpop.f32.mrb[79].mxu0 }
 0x367   : > { %vm1963_vm13 = vcmp.gt.f32.partialorder %v1913_v16, 0.0  ;;  %v2003_v18 = vmul.f32 0.2, %v1913_v16  ;;  %v1916_v26 = vadd.f32 %v3265_v13, %v1915_v25 }
 0x368   : > { %v2045_v27 = vsel %vm1965_vm12, %v1921_v44, %v2005_v24  ;;  %vm1966_vm14 = vcmp.gt.f32.partialorder %v1924_v17, 0.0  ;;  %v2006_v28 = vmul.f32 0.2, %v1924_v17 }
 0x369   : > { %v2073_v19 = vmax.f32 %v2072_v5, %v2045_v27  ;;  %v2043_v29 = vsel %vm1963_vm13, %v1913_v16, %v2003_v18  ;;  %vm1964_vm15 = vcmp.gt.f32.partialorder %v1916_v26, 0.0  ;;  %v2004_v30 = vmul.f32 0.2, %v1916_v26 }
 0x36a   : > { %v2055_v31 = vmax.f32 %v2054_v12, %v2043_v29  ;;  %v2046_v32 = vsel %vm1966_vm14, %v1924_v17, %v2006_v28 }
 0x36b   : > { %2085 = vst [vmem:[%s333_s9 + $0x10] sm:$0xff] %v2073_v19  ;;  %v2082_v33 = vmax.f32 %v2081_v11, %v2046_v32  ;;  %v2044_v34 = vsel %vm1964_vm15, %v1916_v26, %v2004_v30  ;;  %v2089_v39 = vmul.f32 %v2073_v19, %v2073_v19 }
 0x36c   : > { %2083 = vst [vmem:[%s333_s9] sm:$0xff] %v2055_v31  ;;  %v2064_v35 = vmax.f32 %v2063_v22, %v2044_v34  ;;  %2800 = vmatprep.mubr.f32.mxu1 %v2055_v31  ;;  %v2087_v13 = vmul.f32 %v2055_v31, %v2055_v31 }
 0x36d   : > { %2086 = vst [vmem:[%s333_s9 + $0x18] sm:$0xff] %v2082_v33  ;;  %v2818_v36 = vpack.c.bf16 %v2082_v33, %v2073_v19  ;;  %v2090_v41 = vmul.f32 %v2082_v33, %v2082_v33 }
 0x36e   : > { %2084 = vst [vmem:[%s333_s9 + $0x8] sm:$0xff] %v2064_v35  ;;  %2091 = vadd.xlane.f32.xlu0 %v2087_v13  ;;  %v2088_v37 = vmul.f32 %v2064_v35, %v2064_v35  ;;  %v2814_v38 = vpack.c.bf16 %v2064_v35, %v2055_v31 }
 0x370   : > { %2093 = vadd.xlane.f32.xlu1 %v2088_v37  ;;  %2815 = vmatprep.subr.bf16.mxu1 %v2814_v38 }
 0x371   : > { %2817 = vmatpush3.bf16.xpose.msra.mxu1 %v2814_v38 }
 0x372   : > { %2819 = vmatprep.subr.bf16.mxu1 %v2818_v36  ;;  %2095 = vadd.xlane.f32.xlu0 %v2089_v39 }
 0x376   : > { %2097 = vadd.xlane.f32.xlu0 %v2090_v41 }
 0x379   : > { %2821 = vmatpush3.bf16.xpose.msra.mxu1 %v2818_v36 }
 0x380   : > { %2801 = vmatmul.mubr.f32.vlgmr.msra.gmra.mrb[44].mxu1 %v2064_v35 }
 0x381   : > { %2803 = vmatprep.mubr.f32.mxu1 %v2073_v19 }
 0x384   : > { %2804 = vmatmul.mubr.f32.gmra.mrb[46].mxu1 %v2082_v33 }
 0x3fb   : > { %v2092_v42 = vpop.xlane.xlu0 %2091 }
 0x3fc   : > { %2192 = vxpose.xlu1.b32.start [1/4] (short) (narrow) %v2092_v42, 8 }
 0x3fd   : > { %v2094_v43 = vpop.xlane.xlu1 %2093 }
 0x3ff   : > { %v2096_v45 = vpop.xlane.xlu0 %2095 }
 0x400   : > { %2193 = vxpose.xlu1.b32.cont [2/4] (short) (narrow) %v2094_v43, 8 }
 0x403   : > { %v2098_v46 = vpop.xlane.xlu0 %2097 }
 0x404   : > { %2194 = vxpose.xlu1.b32.cont [3/4] (short) (narrow) %v2096_v45, 8 }
 0x408   : > { %2195 = vxpose.xlu1.b32.end [4/4] (short) (narrow) %v2098_v46, 8 }
 0x453   : > { %v2802_v47 = vpop.f32.mrb[44].mxu1 }
 0x454   : > { %v2165_v48 = vpop.f32.mrb[45].mxu1  ;;  %v2185_v51 = vmul.f32 2.0, %v2802_v47 }
 0x455   : > { %v2184_v52 = vmul.f32 2.0, %v2165_v48 }
 0x456   : > { %v2189_v58 = vsub.f32 %v2185_v51, %v2094_v43 }
 0x457   : > { %v2805_v49 = vpop.f32.mrb[46].mxu1  ;;  %v2188_v60 = vsub.f32 %v2184_v52, %v2092_v42 }
 0x458   : > { %v2175_v50 = vpop.f32.mrb[47].mxu1  ;;  %v2187_v53 = vmul.f32 2.0, %v2805_v49 }
 0x459   : > { %v2186_v54 = vmul.f32 2.0, %v2175_v50 }
 0x45a   : > { %v2191_v61 = vsub.f32 %v2187_v53, %v2098_v46 }
 0x45b   : > { %v2190_v62 = vsub.f32 %v2186_v54, %v2096_v45 }
 0x47c   : > { %v2208_v59 = vpop.trf.xlu1 }
 0x47d   : > { %v2227_v63 = vrot.slane %v2208_v59, %v2921_v2 }
 0x47f   : > { %v2228_v0 = vsub.f32 %v2188_v60, %v2227_v63  ;;  %v2229_v3 = vsub.f32 %v2189_v58, %v2227_v63  ;;  %v2230_v4 = vsub.f32 %v2190_v62, %v2227_v63  ;;  %v2231_v6 = vsub.f32 %v2191_v61, %v2227_v63 }
 0x481   : > { %v2241_v7 = vsel %vm2237_vm1, 0.0, %v2228_v0  ;;  %v2242_v8 = vsel %vm2238_vm2, 0.0, %v2229_v3  ;;  %v2243_v2 = vsel %vm2239_vm3, 0.0, %v2230_v4  ;;  %v2244_v5 = vsel %vm2240_vm4, 0.0, %v2231_v6 }
 0x482   : > { %2245 = vst.msk [vmem:[%s338_s12] sm:$0xff] %vm658_vm0, %v2241_v7  ;;  %2246 = vst.msk [vmem:[%s338_s12 + $0x8] sm:$0xff] %vm658_vm0, %v2242_v8 }
 0x483   : > { %2247 = vst.msk [vmem:[%s338_s12 + $0x10] sm:$0xff] %vm658_vm0, %v2243_v2  ;;  %2248 = vst.msk [vmem:[%s338_s12 + $0x18] sm:$0xff] %vm658_vm0, %v2244_v5 }
 0x484 PF: > { %s19_s27 = sadd.s32 1, %s2861_s27  }
 0x485   : > { %p16_p4 = scmp.ge.s32.totalorder %s19_s27, 4  }
 0x487   :  { %18 = sbr.rel (!%p16_p4) target bundleno = 1 (0x1), region = 93 }

// kernel: dense_update_forward.5
= control target key start
LH: loop header
LB: loop body
LE: loop exit
PB: predicated region body
PF: predicated region fallthrough
CT: control target
= control target key end

     0   :  { %s3325_s21 = smov 0   ;;  %s3814_s0 = inlined_call_operand.vmem [shape: f32[2,32,128], index: 0, kind: input, shape index: {}]   ;;  %s3815_s1 = inlined_call_operand.vmem [shape: s32[2,10,32], index: 1, kind: input, shape index: {}]   ;;  %s3816_s2 = inlined_call_operand.vmem [shape: bf16[128,128], index: 2, kind: input, shape index: {}]   ;;  %s3817_s3 = inlined_call_operand.vmem [shape: bf16[128,128], index: 3, kind: input, shape index: {}]   ;;  %s3818_s4 = inlined_call_operand.vmem [shape: f32[1,128], index: 4, kind: input, shape index: {}]   ;;  %s3819_s5 = inlined_call_operand.vmem [shape: bf16[128,128], index: 5, kind: input, shape index: {}]   ;;  %s3820_s6 = inlined_call_operand.vmem [shape: f32[1,128], index: 6, kind: input, shape index: {}]   ;;  %s3821_s7 = inlined_call_operand.vmem [shape: bf16[128,128], index: 7, kind: input, shape index: {}]   ;;  %s3822_s8 = inlined_call_operand.vmem [shape: bf16[128,128], index: 8, kind: input, shape index: {}]   ;;  %s3823_s9 = inlined_call_operand.vmem [shape: f32[1,128], index: 9, kind: input, shape index: {}]   ;;  %s3824_s10 = inlined_call_operand.vmem [shape: bf16[128,128], index: 10, kind: input, shape index: {}]   ;;  %s3825_s11 = inlined_call_operand.vmem [shape: f32[1,128], index: 11, kind: input, shape index: {}]   ;;  %s3826_s12 = inlined_call_operand.vmem [shape: f32[2,32,128], index: 12, kind: output, shape index: {}]  }
   0x1 LB: > { %s2634_s22 = sadd.s32 4294967295, %s3257_s21   ;;  %p2638_p0 = scmp.ge.s32.totalorder %s3257_s21, 1  ;;  %s3257_s21 = sphi %s3325_s21, %s22_s21  }
   0x2   : > { %p372_p1 = scmp.lt.s32.totalorder %s3257_s21, 3 }
   0x4   : > { %p373_p2 = pnand %p2638_p0, %p372_p1 }
   0x5   : > { %p419_p3 = scmp.lt.s32.totalorder (!%p373_p2), %s2634_s22, 1  ;;  %v441_v0 = vlaneseq (!%p373_p2)  ;;  %v3203_v28 = vld [vmem:[%s3817_s3] sm:$0xff] (!%p373_p2)   ;;  %v3204_v29 = vld [vmem:[%s3817_s3 + $0x8] sm:$0xff] (!%p373_p2)   ;;  %v3205_v30 = vld [vmem:[%s3817_s3 + $0x10] sm:$0xff] (!%p373_p2)   ;;  %vm753_vm0 = vcmask (!%p373_p2), 261120   ;;  %v3259_v44 = vmov (!%p373_p2), 0.0  }
   0x6   : > { %376 = sbr.rel (%p373_p2) target bundleno = 1357 (0x54d), region = 68  ;;  %2990 = vmatprep.subr.bf16.mxu1 (!%p373_p2), %v3203_v28  ;;  %v3206_v31 = vld [vmem:[%s3817_s3 + $0x18] sm:$0xff] (!%p373_p2)   ;;  %v3207_v32 = vld [vmem:[%s3817_s3 + $0x20] sm:$0xff] (!%p373_p2)   ;;  %v3208_v33 = vld [vmem:[%s3817_s3 + $0x28] sm:$0xff] (!%p373_p2)  }
   0x7   : > { %v3336_v1 = vshrl.u32 (!%p373_p2), %v441_v0, 7  ;;  %2991 = vmatpush3.bf16.msra.mxu1 (!%p373_p2), %v3203_v28  ;;  %v3209_v34 = vld [vmem:[%s3817_s3 + $0x30] sm:$0xff] (!%p373_p2)   ;;  %v3210_v35 = vld [vmem:[%s3817_s3 + $0x38] sm:$0xff] (!%p373_p2)   ;;  %v3211_v36 = vld [vmem:[%s3816_s2] sm:$0xff] (!%p373_p2)   ;;  %v3415_v40 = vand.u32 (!%p373_p2), 127, %v441_v0 }
   0x8   : > { %2992 = vmatprep.subr.bf16.mxu1 (!%p373_p2), %v3204_v29  ;;  %v3212_v37 = vld [vmem:[%s3816_s2 + $0x8] sm:$0xff] (!%p373_p2)   ;;  %v3213_v38 = vld [vmem:[%s3816_s2 + $0x10] sm:$0xff] (!%p373_p2)   ;;  %v3214_v39 = vld [vmem:[%s3816_s2 + $0x18] sm:$0xff] (!%p373_p2)  }
   0x9   : > { %v445_v2 = vsub.s32 (!%p373_p2), 0, %v3336_v1  ;;  %v464_v6 = vsub.s32 (!%p373_p2), 1, %v3336_v1  ;;  %v483_v7 = vsub.s32 (!%p373_p2), 2, %v3336_v1  ;;  %v502_v11 = vsub.s32 (!%p373_p2), 3, %v3336_v1  ;;  %v3215_v43 = vld [vmem:[%s3816_s2 + $0x20] sm:$0xff] (!%p373_p2)   ;;  %v3216_v48 = vld [vmem:[%s3816_s2 + $0x28] sm:$0xff] (!%p373_p2)  }
   0xa   : > { %v521_v12 = vsub.s32 (!%p373_p2), 4, %v3336_v1  ;;  %v540_v22 = vsub.s32 (!%p373_p2), 5, %v3336_v1  ;;  %v559_v24 = vsub.s32 (!%p373_p2), 6, %v3336_v1  ;;  %v578_v26 = vsub.s32 (!%p373_p2), 7, %v3336_v1 }
   0xb   : > { %2993 = vmatpush3.bf16.msra.mxu1 (!%p373_p2), %v3204_v29 }
   0xc   : > { %2994 = vmatprep.subr.bf16.mxu1 (!%p373_p2), %v3205_v30 }
   0xd   : > { %s3828_s22 = smov (!%p419_p3, %s2634_s22), 1 }
   0xe   : > { %s2780_s23 = sshll.u32 %s3828_s22, 4  ;;  %s2779_s24 = sshll.u32 %s3828_s22, 5 }
   0xf   : > { %s428_s27 = scalar_lea.vmem %s3815_s1, %s2780_s23  ;;  %s423_s30 = scalar_lea.vmem %s3814_s0, %s2779_s24  ;;  %2995 = vmatpush3.bf16.msra.mxu1 %v3205_v30 }
  0x10   : > { %v439_v3 = vld [vmem:[%s428_s27] sm:$0xff]  ;;  %v3351_v5 = vld [vmem:[%s423_s30 + $0x8] sm:$0xff]  ;;  %v3355_v9 = vld [vmem:[%s423_s30 + $0x10] sm:$0xff]  ;;  %2996 = vmatprep.subr.bf16.mxu1 %v3206_v31  ;;  %s433_s14 = scalar_lea.vmem %s3826_s12, %s2779_s24 }
  0x11   : > { %v3349_v4 = vld [vmem:[%s423_s30] sm:$0xff]  ;;  %v446_v8 = vrot.slane %v439_v3, %v445_v2  ;;  %v3357_v10 = vld [vmem:[%s423_s30 + $0x18] sm:$0xff]  ;;  %v440_v13 = vld [vmem:[%s428_s27 + $0x8] sm:$0x3]  ;;  %v465_v18 = vrot.slane %v439_v3, %v464_v6  ;;  %v484_v19 = vrot.slane %v439_v3, %v483_v7  ;;  %v503_v20 = vrot.slane %v439_v3, %v502_v11 }
  0x12   : > { %v598_v14 = vrot.slane %v440_v13, %v445_v2  ;;  %v617_v15 = vrot.slane %v440_v13, %v464_v6  ;;  %v3363_v16 = vpack.c.bf16 %v3351_v5, %v3349_v4  ;;  %v3367_v17 = vpack.c.bf16 %v3357_v10, %v3355_v9 }
  0x13   : > { %448 = vbcast.lane.b32.xlu0 %v446_v8, 256  ;;  %456 = vbcast.lane.b32.xlu1 %v446_v8, 272  ;;  %v522_v21 = vrot.slane %v439_v3, %v521_v12  ;;  %v541_v23 = vrot.slane %v439_v3, %v540_v22  ;;  %v560_v25 = vrot.slane %v439_v3, %v559_v24 }
  0x14   : > { %3183 = vmatprep.subr.bf16.mxu0 %v3363_v16  ;;  %3006 = vmatprep.mubr.bf16.mxu1 %v3363_v16  ;;  %v579_v27 = vrot.slane %v439_v3, %v578_v26 }
  0x15   : > { %3185 = vmatpush3.bf16.msra.mxu0 %v3363_v16  ;;  %2997 = vmatpush3.bf16.msra.mxu1 %v3206_v31 }
  0x16   : > { %3187 = vmatprep.subr.bf16.mxu0 %v3367_v17  ;;  %2998 = vmatprep.subr.bf16.mxu1 %v3207_v32 }
  0x17   : > { %452 = vbcast.lane.b32.xlu0 %v446_v8, 264  ;;  %460 = vbcast.lane.b32.xlu1 %v446_v8, 280 }
  0x19   : > { %3189 = vmatpush3.bf16.msra.mxu0 %v3367_v17  ;;  %2999 = vmatpush3.bf16.msra.mxu1 %v3207_v32 }
  0x1a   : > { %3000 = vmatprep.subr.bf16.mxu1 %v3208_v33 }
  0x1b   : > { %467 = vbcast.lane.b32.xlu0 %v465_v18, 256  ;;  %471 = vbcast.lane.b32.xlu1 %v465_v18, 264 }
  0x1d   : > { %3001 = vmatpush3.bf16.msra.mxu1 %v3208_v33 }
  0x1e   : > { %3002 = vmatprep.subr.bf16.mxu1 %v3209_v34 }
  0x1f   : > { %475 = vbcast.lane.b32.xlu0 %v465_v18, 272  ;;  %479 = vbcast.lane.b32.xlu1 %v465_v18, 280 }
  0x21   : > { %3003 = vmatpush3.bf16.msra.mxu1 %v3209_v34 }
  0x22   : > { %3004 = vmatprep.subr.bf16.mxu1 %v3210_v35 }
  0x23   : > { %486 = vbcast.lane.b32.xlu0 %v484_v19, 256  ;;  %490 = vbcast.lane.b32.xlu1 %v484_v19, 264 }
  0x25   : > { %3005 = vmatpush3.bf16.msra.mxu1 %v3210_v35 }
  0x26   : > { %3010 = vmatprep.subr.bf16.mxu1 %v3211_v36 }
  0x27   : > { %494 = vbcast.lane.b32.xlu0 %v484_v19, 272  ;;  %498 = vbcast.lane.b32.xlu1 %v484_v19, 280 }
  0x28   : > { %3007 = vmatmul.mubr.bf16.vlgmr.msra.gmra.mrb[0].mxu1 %v3367_v17 }
  0x29   : > { %3011 = vmatpush3.bf16.msra.mxu1 %v3211_v36 }
  0x2a   : > { %3012 = vmatprep.subr.bf16.mxu1 %v3212_v37 }
  0x2b   : > { %505 = vbcast.lane.b32.xlu0 %v503_v20, 256  ;;  %509 = vbcast.lane.b32.xlu1 %v503_v20, 264 }
  0x2d   : > { %3013 = vmatpush3.bf16.msra.mxu1 %v3212_v37 }
  0x2e   : > { %3014 = vmatprep.subr.bf16.mxu1 %v3213_v38 }
  0x2f   : > { %513 = vbcast.lane.b32.xlu0 %v503_v20, 272  ;;  %517 = vbcast.lane.b32.xlu1 %v503_v20, 280 }
  0x31   : > { %3015 = vmatpush3.bf16.msra.mxu1 %v3213_v38 }
  0x32   : > { %3016 = vmatprep.subr.bf16.mxu1 %v3214_v39 }
  0x33   : > { %524 = vbcast.lane.b32.xlu0 %v522_v21, 256  ;;  %528 = vbcast.lane.b32.xlu1 %v522_v21, 264 }
  0x35   : > { %3017 = vmatpush3.bf16.msra.mxu1 %v3214_v39 }
  0x36   : > { %3018 = vmatprep.subr.bf16.mxu1 %v3215_v43 }
  0x37   : > { %532 = vbcast.lane.b32.xlu0 %v522_v21, 272  ;;  %536 = vbcast.lane.b32.xlu1 %v522_v21, 280 }
  0x39   : > { %3019 = vmatpush3.bf16.msra.mxu1 %v3215_v43 }
  0x3a   : > { %3020 = vmatprep.subr.bf16.mxu1 %v3216_v48 }
  0x3b   : > { %543 = vbcast.lane.b32.xlu0 %v541_v23, 256  ;;  %547 = vbcast.lane.b32.xlu1 %v541_v23, 264 }
  0x3d   : > { %3021 = vmatpush3.bf16.msra.mxu1 %v3216_v48 }
  0x3f   : > { %551 = vbcast.lane.b32.xlu0 %v541_v23, 272  ;;  %555 = vbcast.lane.b32.xlu1 %v541_v23, 280 }
  0x43   : > { %562 = vbcast.lane.b32.xlu0 %v560_v25, 256  ;;  %566 = vbcast.lane.b32.xlu1 %v560_v25, 264 }
  0x47   : > { %570 = vbcast.lane.b32.xlu0 %v560_v25, 272  ;;  %574 = vbcast.lane.b32.xlu1 %v560_v25, 280 }
  0x4b   : > { %581 = vbcast.lane.b32.xlu0 %v579_v27, 256  ;;  %585 = vbcast.lane.b32.xlu1 %v579_v27, 264 }
  0x4f   : > { %589 = vbcast.lane.b32.xlu0 %v579_v27, 272  ;;  %593 = vbcast.lane.b32.xlu1 %v579_v27, 280 }
  0x53   : > { %600 = vbcast.lane.b32.xlu0 %v598_v14, 256  ;;  %604 = vbcast.lane.b32.xlu1 %v598_v14, 264 }
  0x57   : > { %608 = vbcast.lane.b32.xlu0 %v598_v14, 272  ;;  %612 = vbcast.lane.b32.xlu1 %v598_v14, 280 }
  0x5b   : > { %619 = vbcast.lane.b32.xlu0 %v617_v15, 256  ;;  %623 = vbcast.lane.b32.xlu1 %v617_v15, 264 }
  0x5f   : > { %627 = vbcast.lane.b32.xlu0 %v617_v15, 272  ;;  %631 = vbcast.lane.b32.xlu1 %v617_v15, 280 }
  0x85   : > { %v449_v41 = vpop.permute.xlu0 %448  ;;  %v457_v42 = vpop.permute.xlu1 %456 }
  0x86   : > { %vm633_vm1 = vcmp.eq.s32.totalorder %v449_v41, %v3415_v40  ;;  %vm635_vm2 = vcmp.eq.s32.totalorder %v457_v42, %v3415_v40 }
  0x87   : > { %v2645_v45 = vsel %vm633_vm1, 1.0, %v3259_v44  ;;  %v2647_v49 = vsel %vm635_vm2, 1.0, %v3259_v44 }
  0x88   : > { %2930 = vmatprep.mubr.msk.f32.mxu0 %vm753_vm0, %v2645_v45 }
  0x89   : > { %v453_v46 = vpop.permute.xlu0 %452  ;;  %v461_v47 = vpop.permute.xlu1 %460 }
  0x8a   : > { %vm634_vm3 = vcmp.eq.s32.totalorder %v453_v46, %v3415_v40  ;;  %vm636_vm4 = vcmp.eq.s32.totalorder %v461_v47, %v3415_v40 }
  0x8b   : > { %v2646_v50 = vsel %vm634_vm3, 1.0, %v3259_v44  ;;  %v2648_v51 = vsel %vm636_vm4, 1.0, %v3259_v44 }
  0x8c   : > { %2931 = vmatmul.mubr.msk.f32.vlgmr.msra.gmra.mrb[0].mxu0 %vm753_vm0, %v2646_v50 }
  0x8d   : > { %2933 = vmatprep.mubr.msk.f32.mxu0 %vm753_vm0, %v2647_v49  ;;  %v468_v52 = vpop.permute.xlu0 %467  ;;  %v472_v53 = vpop.permute.xlu1 %471 }
  0x8e   : > { %vm637_vm5 = vcmp.eq.s32.totalorder %v468_v52, %v3415_v40  ;;  %vm638_vm6 = vcmp.eq.s32.totalorder %v472_v53, %v3415_v40 }
  0x8f   : > { %v2649_v54 = vsel %vm637_vm5, 1.0, %v3259_v44  ;;  %v2650_v55 = vsel %vm638_vm6, 1.0, %v3259_v44 }
  0x90   : > { %2934 = vmatmul.mubr.msk.f32.gmra.mrb[2].mxu0 %vm753_vm0, %v2648_v51 }
  0x91   : > { %2936 = vmatprep.mubr.msk.f32.mxu0 %vm753_vm0, %v2649_v54  ;;  %v476_v56 = vpop.permute.xlu0 %475  ;;  %v480_v57 = vpop.permute.xlu1 %479 }
  0x92   : > { %vm639_vm7 = vcmp.eq.s32.totalorder %v476_v56, %v3415_v40  ;;  %vm640_vm8 = vcmp.eq.s32.totalorder %v480_v57, %v3415_v40 }
  0x93   : > { %v2651_v58 = vsel %vm639_vm7, 1.0, %v3259_v44  ;;  %v2652_v59 = vsel %vm640_vm8, 1.0, %v3259_v44 }
  0x94   : > { %2937 = vmatmul.mubr.msk.f32.gmra.mrb[4].mxu0 %vm753_vm0, %v2650_v55 }
  0x95   : > { %2939 = vmatprep.mubr.msk.f32.mxu0 %vm753_vm0, %v2651_v58  ;;  %v487_v60 = vpop.permute.xlu0 %486  ;;  %v491_v61 = vpop.permute.xlu1 %490 }
  0x96   : > { %vm641_vm9 = vcmp.eq.s32.totalorder %v487_v60, %v3415_v40  ;;  %vm642_vm10 = vcmp.eq.s32.totalorder %v491_v61, %v3415_v40 }
  0x97   : > { %v2653_v62 = vsel %vm641_vm9, 1.0, %v3259_v44  ;;  %v2654_v63 = vsel %vm642_vm10, 1.0, %v3259_v44 }
  0x98   : > { %2940 = vmatmul.mubr.msk.f32.gmra.mrb[6].mxu0 %vm753_vm0, %v2652_v59 }
  0x99   : > { %2942 = vmatprep.mubr.msk.f32.mxu0 %vm753_vm0, %v2653_v62  ;;  %v495_v0 = vpop.permute.xlu0 %494  ;;  %v499_v1 = vpop.permute.xlu1 %498 }
  0x9a   : > { %vm643_vm11 = vcmp.eq.s32.totalorder %v495_v0, %v3415_v40  ;;  %vm644_vm12 = vcmp.eq.s32.totalorder %v499_v1, %v3415_v40 }
  0x9b   : > { %v2655_v2 = vsel %vm643_vm11, 1.0, %v3259_v44  ;;  %v2656_v3 = vsel %vm644_vm12, 1.0, %v3259_v44 }
  0x9c   : > { %2943 = vmatmul.mubr.msk.f32.gmra.mrb[8].mxu0 %vm753_vm0, %v2654_v63 }
  0x9d   : > { %2945 = vmatprep.mubr.msk.f32.mxu0 %vm753_vm0, %v2655_v2  ;;  %v506_v6 = vpop.permute.xlu0 %505  ;;  %v510_v7 = vpop.permute.xlu1 %509 }
  0x9e   : > { %vm645_vm13 = vcmp.eq.s32.totalorder %v506_v6, %v3415_v40  ;;  %vm646_vm14 = vcmp.eq.s32.totalorder %v510_v7, %v3415_v40  ;;  %v3217_v6 = vld [vmem:[%s3816_s2 + $0x30] sm:$0xff]   ;;  %v3220_v7 = vld [vmem:[%s3819_s5 + $0x8] sm:$0xff]  }
  0x9f   : > { %v2657_v8 = vsel %vm645_vm13, 1.0, %v3259_v44  ;;  %v2658_v11 = vsel %vm646_vm14, 1.0, %v3259_v44  ;;  %3022 = vmatprep.subr.bf16.mxu1 %v3217_v6 }
  0xa0   : > { %2946 = vmatmul.mubr.msk.f32.gmra.mrb[10].mxu0 %vm753_vm0, %v2656_v3  ;;  %3023 = vmatpush3.bf16.msra.mxu1 %v3217_v6 }
  0xa1   : > { %2948 = vmatprep.mubr.msk.f32.mxu0 %vm753_vm0, %v2657_v8  ;;  %v514_v12 = vpop.permute.xlu0 %513  ;;  %v518_v13 = vpop.permute.xlu1 %517  ;;  %v3221_v8 = vld [vmem:[%s3819_s5 + $0x10] sm:$0xff]  }
  0xa2   : > { %vm647_vm15 = vcmp.eq.s32.totalorder %v514_v12, %v3415_v40  ;;  %vm648_vm1 = vcmp.eq.s32.totalorder %v518_v13, %v3415_v40  ;;  %v3223_v12 = vld [vmem:[%s3819_s5 + $0x20] sm:$0xff]   ;;  %v3224_v13 = vld [vmem:[%s3819_s5 + $0x28] sm:$0xff]  }
  0xa3   : > { %v2659_v14 = vsel %vm647_vm15, 1.0, %v3259_v44  ;;  %v2660_v15 = vsel %vm648_vm1, 1.0, %v3259_v44 }
  0xa4   : > { %2949 = vmatmul.mubr.msk.f32.gmra.mrb[12].mxu0 %vm753_vm0, %v2658_v11  ;;  %v3222_v11 = vld [vmem:[%s3819_s5 + $0x18] sm:$0xff]  }
  0xa5   : > { %2951 = vmatprep.mubr.msk.f32.mxu0 %vm753_vm0, %v2659_v14  ;;  %v525_v18 = vpop.permute.xlu0 %524  ;;  %v529_v19 = vpop.permute.xlu1 %528  ;;  %v3225_v14 = vld [vmem:[%s3819_s5 + $0x30] sm:$0xff]  }
  0xa6   : > { %vm649_vm2 = vcmp.eq.s32.totalorder %v525_v18, %v3415_v40  ;;  %vm650_vm3 = vcmp.eq.s32.totalorder %v529_v19, %v3415_v40 }
  0xa7   : > { %v2661_v20 = vsel %vm649_vm2, 1.0, %v3259_v44  ;;  %v2662_v21 = vsel %vm650_vm3, 1.0, %v3259_v44 }
  0xa8   : > { %2952 = vmatmul.mubr.msk.f32.gmra.mrb[14].mxu0 %vm753_vm0, %v2660_v15 }
  0xa9   : > { %2954 = vmatprep.mubr.msk.f32.mxu0 %vm753_vm0, %v2661_v20  ;;  %v533_v22 = vpop.permute.xlu0 %532  ;;  %v537_v23 = vpop.permute.xlu1 %536 }
  0xaa   : > { %vm651_vm4 = vcmp.eq.s32.totalorder %v533_v22, %v3415_v40  ;;  %vm652_vm5 = vcmp.eq.s32.totalorder %v537_v23, %v3415_v40 }
  0xab   : > { %v2663_v24 = vsel %vm651_vm4, 1.0, %v3259_v44  ;;  %v2664_v25 = vsel %vm652_vm5, 1.0, %v3259_v44 }
  0xac   : > { %2955 = vmatmul.mubr.msk.f32.gmra.mrb[16].mxu0 %vm753_vm0, %v2662_v21 }
  0xad   : > { %2957 = vmatprep.mubr.msk.f32.mxu0 %vm753_vm0, %v2663_v24  ;;  %v544_v26 = vpop.permute.xlu0 %543  ;;  %v548_v27 = vpop.permute.xlu1 %547 }
  0xae   : > { %vm653_vm6 = vcmp.eq.s32.totalorder %v544_v26, %v3415_v40  ;;  %vm654_vm7 = vcmp.eq.s32.totalorder %v548_v27, %v3415_v40 }
  0xaf   : > { %v2665_v28 = vsel %vm653_vm6, 1.0, %v3259_v44  ;;  %v2666_v29 = vsel %vm654_vm7, 1.0, %v3259_v44 }
  0xb0   : > { %2958 = vmatmul.mubr.msk.f32.gmra.mrb[18].mxu0 %vm753_vm0, %v2664_v25 }
  0xb1   : > { %2960 = vmatprep.mubr.msk.f32.mxu0 %vm753_vm0, %v2665_v28  ;;  %v552_v30 = vpop.permute.xlu0 %551  ;;  %v556_v31 = vpop.permute.xlu1 %555 }
  0xb2   : > { %vm655_vm8 = vcmp.eq.s32.totalorder %v552_v30, %v3415_v40  ;;  %vm656_vm9 = vcmp.eq.s32.totalorder %v556_v31, %v3415_v40 }
  0xb3   : > { %v2667_v32 = vsel %vm655_vm8, 1.0, %v3259_v44  ;;  %v2668_v33 = vsel %vm656_vm9, 1.0, %v3259_v44 }
  0xb4   : > { %2961 = vmatmul.mubr.msk.f32.gmra.mrb[20].mxu0 %vm753_vm0, %v2666_v29 }
  0xb5   : > { %2963 = vmatprep.mubr.msk.f32.mxu0 %vm753_vm0, %v2667_v32  ;;  %v563_v34 = vpop.permute.xlu0 %562  ;;  %v567_v35 = vpop.permute.xlu1 %566 }
  0xb6   : > { %vm657_vm10 = vcmp.eq.s32.totalorder %v563_v34, %v3415_v40  ;;  %vm658_vm11 = vcmp.eq.s32.totalorder %v567_v35, %v3415_v40 }
  0xb7   : > { %v2669_v36 = vsel %vm657_vm10, 1.0, %v3259_v44  ;;  %v2670_v37 = vsel %vm658_vm11, 1.0, %v3259_v44 }
  0xb8   : > { %2964 = vmatmul.mubr.msk.f32.gmra.mrb[22].mxu0 %vm753_vm0, %v2668_v33 }
  0xb9   : > { %2966 = vmatprep.mubr.msk.f32.mxu0 %vm753_vm0, %v2669_v36  ;;  %v571_v38 = vpop.permute.xlu0 %570  ;;  %v575_v39 = vpop.permute.xlu1 %574 }
  0xba   : > { %vm659_vm12 = vcmp.eq.s32.totalorder %v571_v38, %v3415_v40  ;;  %vm660_vm13 = vcmp.eq.s32.totalorder %v575_v39, %v3415_v40 }
  0xbb   : > { %v2671_v41 = vsel %vm659_vm12, 1.0, %v3259_v44  ;;  %v2672_v42 = vsel %vm660_vm13, 1.0, %v3259_v44 }
  0xbc   : > { %2967 = vmatmul.mubr.msk.f32.gmra.mrb[24].mxu0 %vm753_vm0, %v2670_v37 }
  0xbd   : > { %2969 = vmatprep.mubr.msk.f32.mxu0 %vm753_vm0, %v2671_v41  ;;  %v582_v43 = vpop.permute.xlu0 %581  ;;  %v586_v45 = vpop.permute.xlu1 %585 }
  0xbe   : > { %vm661_vm14 = vcmp.eq.s32.totalorder %v582_v43, %v3415_v40  ;;  %vm662_vm15 = vcmp.eq.s32.totalorder %v586_v45, %v3415_v40 }
  0xbf   : > { %v2673_v46 = vsel %vm661_vm14, 1.0, %v3259_v44  ;;  %v2674_v47 = vsel %vm662_vm15, 1.0, %v3259_v44 }
  0xc0   : > { %2970 = vmatmul.mubr.msk.f32.gmra.mrb[26].mxu0 %vm753_vm0, %v2672_v42 }
  0xc1   : > { %2972 = vmatprep.mubr.msk.f32.mxu0 %vm753_vm0, %v2673_v46  ;;  %v590_v48 = vpop.permute.xlu0 %589  ;;  %v594_v49 = vpop.permute.xlu1 %593 }
  0xc2   : > { %vm663_vm1 = vcmp.eq.s32.totalorder %v590_v48, %v3415_v40  ;;  %vm664_vm2 = vcmp.eq.s32.totalorder %v594_v49, %v3415_v40 }
  0xc3   : > { %v2675_v50 = vsel %vm663_vm1, 1.0, %v3259_v44  ;;  %v2676_v51 = vsel %vm664_vm2, 1.0, %v3259_v44 }
  0xc4   : > { %2973 = vmatmul.mubr.msk.f32.gmra.mrb[28].mxu0 %vm753_vm0, %v2674_v47 }
  0xc5   : > { %2975 = vmatprep.mubr.msk.f32.mxu0 %vm753_vm0, %v2675_v50  ;;  %v601_v52 = vpop.permute.xlu0 %600  ;;  %v605_v53 = vpop.permute.xlu1 %604 }
  0xc6   : > { %vm665_vm3 = vcmp.eq.s32.totalorder %v601_v52, %v3415_v40  ;;  %vm666_vm4 = vcmp.eq.s32.totalorder %v605_v53, %v3415_v40 }
  0xc7   : > { %v2677_v54 = vsel %vm665_vm3, 1.0, %v3259_v44  ;;  %v2678_v55 = vsel %vm666_vm4, 1.0, %v3259_v44 }
  0xc8   : > { %2976 = vmatmul.mubr.msk.f32.gmra.mrb[30].mxu0 %vm753_vm0, %v2676_v51 }
  0xc9   : > { %2978 = vmatprep.mubr.msk.f32.mxu0 %vm753_vm0, %v2677_v54  ;;  %v609_v56 = vpop.permute.xlu0 %608  ;;  %v613_v57 = vpop.permute.xlu1 %612 }
  0xca   : > { %vm667_vm5 = vcmp.eq.s32.totalorder %v609_v56, %v3415_v40  ;;  %vm668_vm6 = vcmp.eq.s32.totalorder %v613_v57, %v3415_v40 }
  0xcb   : > { %v2679_v58 = vsel %vm667_vm5, 1.0, %v3259_v44  ;;  %v2680_v59 = vsel %vm668_vm6, 1.0, %v3259_v44 }
  0xcc   : > { %2979 = vmatmul.mubr.msk.f32.gmra.mrb[32].mxu0 %vm753_vm0, %v2678_v55 }
  0xcd   : > { %2981 = vmatprep.mubr.msk.f32.mxu0 %vm753_vm0, %v2679_v58  ;;  %v620_v60 = vpop.permute.xlu0 %619  ;;  %v624_v61 = vpop.permute.xlu1 %623 }
  0xce   : > { %vm669_vm7 = vcmp.eq.s32.totalorder %v620_v60, %v3415_v40  ;;  %vm670_vm8 = vcmp.eq.s32.totalorder %v624_v61, %v3415_v40 }
  0xcf   : > { %v2681_v62 = vsel %vm669_vm7, 1.0, %v3259_v44  ;;  %v2682_v63 = vsel %vm670_vm8, 1.0, %v3259_v44 }
  0xd0   : > { %2982 = vmatmul.mubr.msk.f32.gmra.mrb[34].mxu0 %vm753_vm0, %v2680_v59 }
  0xd1   : > { %2984 = vmatprep.mubr.msk.f32.mxu0 %vm753_vm0, %v2681_v62  ;;  %v628_v0 = vpop.permute.xlu0 %627  ;;  %v632_v1 = vpop.permute.xlu1 %631 }
  0xd2   : > { %vm671_vm9 = vcmp.eq.s32.totalorder %v628_v0, %v3415_v40  ;;  %vm672_vm10 = vcmp.eq.s32.totalorder %v632_v1, %v3415_v40  ;;  %v3218_v40 = vld [vmem:[%s3816_s2 + $0x38] sm:$0xff]  }
  0xd3   : > { %v2683_v2 = vsel %vm671_vm9, 1.0, %v3259_v44  ;;  %v2684_v3 = vsel %vm672_vm10, 1.0, %v3259_v44  ;;  %3024 = vmatprep.subr.bf16.mxu1 %v3218_v40  ;;  %v3219_v44 = vld [vmem:[%s3819_s5] sm:$0xff]  }
  0xd4   : > { %2985 = vmatmul.mubr.msk.f32.gmra.mrb[36].mxu0 %vm753_vm0, %v2682_v63  ;;  %3025 = vmatpush3.bf16.msra.mxu1 %v3218_v40 }
  0xd5   : > { %2987 = vmatprep.mubr.msk.f32.mxu0 %vm753_vm0, %v2683_v2  ;;  %3066 = vmatprep.subr.bf16.mxu0 %v3219_v44 }
  0xd6   : > { %3067 = vmatpush3.bf16.msra.mxu0 %v3219_v44 }
  0xd7   : > { %3068 = vmatprep.subr.bf16.mxu0 %v3220_v7 }
  0xd8   : > { %2988 = vmatmul.mubr.msk.f32.gmra.mrb[38].mxu0 %vm753_vm0, %v2684_v3 }
  0xda   : > { %3069 = vmatpush3.bf16.msra.mxu0 %v3220_v7 }
  0xdb   : > { %3070 = vmatprep.subr.bf16.mxu0 %v3221_v8 }
  0xde   : > { %3071 = vmatpush3.bf16.msra.mxu0 %v3221_v8 }
  0xdf   : > { %3072 = vmatprep.subr.bf16.mxu0 %v3222_v11 }
  0xe2   : > { %3073 = vmatpush3.bf16.msra.mxu0 %v3222_v11 }
  0xe3   : > { %3074 = vmatprep.subr.bf16.mxu0 %v3223_v12 }
  0xe6   : > { %3075 = vmatpush3.bf16.msra.mxu0 %v3223_v12 }
  0xe7   : > { %3076 = vmatprep.subr.bf16.mxu0 %v3224_v13 }
  0xea   : > { %3077 = vmatpush3.bf16.msra.mxu0 %v3224_v13 }
  0xeb   : > { %3078 = vmatprep.subr.bf16.mxu0 %v3225_v14 }
  0xee   : > { %3079 = vmatpush3.bf16.msra.mxu0 %v3225_v14 }
  0xfb   : > { %v3570_v15 = vpop.f32.mrb[0].mxu1 }
  0xfc   : > { %v3572_v18 = vpop.f32.mrb[1].mxu1 }
  0xfd   : > { %v3574_v19 = vpop.f32.mrb[2].mxu1 }
  0xfe   : > { %v3576_v20 = vpop.f32.mrb[3].mxu1 }
 0x15f   : > { %v2932_v21 = vpop.f32.mrb[0].mxu0 }
 0x160   : > { %v1140_v22 = vsub.f32 %v2932_v21, %v3351_v5  ;;  %v940_v23 = vpop.f32.mrb[1].mxu0 }
 0x161   : > { %v1139_v24 = vsub.f32 %v940_v23, %v3349_v4 }
 0x163   : > { %v1301_v25 = vpack.c.bf16 %v1140_v22, %v1139_v24  ;;  %v2935_v26 = vpop.f32.mrb[2].mxu0 }
 0x164   : > { %v1142_v27 = vsub.f32 %v2935_v26, %v3357_v10  ;;  %v950_v28 = vpop.f32.mrb[3].mxu0 }
 0x165   : > { %v1141_v29 = vsub.f32 %v950_v28, %v3355_v9  ;;  %3026 = vmatprep.mubr.bf16.mxu1 %v1301_v25 }
 0x167   : > { %v1302_v30 = vpack.c.bf16 %v1142_v27, %v1141_v29  ;;  %v2938_v31 = vpop.f32.mrb[4].mxu0 }
 0x168   : > { %v1144_v32 = vsub.f32 %v2938_v31, %v3351_v5  ;;  %v960_v33 = vpop.f32.mrb[5].mxu0 }
 0x169   : > { %v1143_v34 = vsub.f32 %v960_v33, %v3349_v4  ;;  %3027 = vmatmul.mubr.bf16.vlgmr.msra.gmra.mrb[4].mxu1 %v1302_v30 }
 0x16b   : > { %v1303_v35 = vpack.c.bf16 %v1144_v32, %v1143_v34  ;;  %v2941_v36 = vpop.f32.mrb[6].mxu0 }
 0x16c   : > { %v1146_v37 = vsub.f32 %v2941_v36, %v3357_v10  ;;  %v970_v38 = vpop.f32.mrb[7].mxu0 }
 0x16d   : > { %v1145_v39 = vsub.f32 %v970_v38, %v3355_v9  ;;  %3030 = vmatprep.mubr.bf16.mxu1 %v1303_v35 }
 0x16f   : > { %v1304_v41 = vpack.c.bf16 %v1146_v37, %v1145_v39  ;;  %v2944_v42 = vpop.f32.mrb[8].mxu0 }
 0x170   : > { %v1148_v43 = vsub.f32 %v2944_v42, %v3351_v5  ;;  %v980_v45 = vpop.f32.mrb[9].mxu0 }
 0x171   : > { %v1147_v46 = vsub.f32 %v980_v45, %v3349_v4  ;;  %3031 = vmatmul.mubr.bf16.gmra.mrb[8].mxu1 %v1304_v41 }
 0x173   : > { %v1305_v47 = vpack.c.bf16 %v1148_v43, %v1147_v46  ;;  %v2947_v48 = vpop.f32.mrb[10].mxu0 }
 0x174   : > { %v1150_v49 = vsub.f32 %v2947_v48, %v3357_v10  ;;  %v990_v50 = vpop.f32.mrb[11].mxu0 }
 0x175   : > { %v1149_v51 = vsub.f32 %v990_v50, %v3355_v9  ;;  %3034 = vmatprep.mubr.bf16.mxu1 %v1305_v47 }
 0x177   : > { %v1306_v52 = vpack.c.bf16 %v1150_v49, %v1149_v51  ;;  %v2950_v53 = vpop.f32.mrb[12].mxu0 }
 0x178   : > { %v1152_v54 = vsub.f32 %v2950_v53, %v3351_v5  ;;  %v1000_v55 = vpop.f32.mrb[13].mxu0 }
 0x179   : > { %v1151_v56 = vsub.f32 %v1000_v55, %v3349_v4  ;;  %3035 = vmatmul.mubr.bf16.gmra.mrb[12].mxu1 %v1306_v52 }
 0x17b   : > { %v1307_v57 = vpack.c.bf16 %v1152_v54, %v1151_v56  ;;  %v2953_v58 = vpop.f32.mrb[14].mxu0 }
 0x17c   : > { %v1154_v59 = vsub.f32 %v2953_v58, %v3357_v10  ;;  %v1010_v60 = vpop.f32.mrb[15].mxu0 }
 0x17d   : > { %v1153_v61 = vsub.f32 %v1010_v60, %v3355_v9  ;;  %3038 = vmatprep.mubr.bf16.mxu1 %v1307_v57 }
 0x17f   : > { %v1308_v62 = vpack.c.bf16 %v1154_v59, %v1153_v61  ;;  %v2956_v63 = vpop.f32.mrb[16].mxu0 }
 0x180   : > { %v1156_v0 = vsub.f32 %v2956_v63, %v3351_v5  ;;  %v1020_v1 = vpop.f32.mrb[17].mxu0 }
 0x181   : > { %v1155_v2 = vsub.f32 %v1020_v1, %v3349_v4  ;;  %3039 = vmatmul.mubr.bf16.gmra.mrb[16].mxu1 %v1308_v62 }
 0x183   : > { %v1309_v3 = vpack.c.bf16 %v1156_v0, %v1155_v2  ;;  %v2959_v6 = vpop.f32.mrb[18].mxu0 }
 0x184   : > { %v1158_v40 = vsub.f32 %v2959_v6, %v3357_v10  ;;  %v1030_v44 = vpop.f32.mrb[19].mxu0 }
 0x185   : > { %v1157_v7 = vsub.f32 %v1030_v44, %v3355_v9  ;;  %3042 = vmatprep.mubr.bf16.mxu1 %v1309_v3 }
 0x187   : > { %v1310_v8 = vpack.c.bf16 %v1158_v40, %v1157_v7  ;;  %v2962_v11 = vpop.f32.mrb[20].mxu0  ;;  %v3226_v40 = vld [vmem:[%s3819_s5 + $0x38] sm:$0xff]  }
 0x188   : > { %v1160_v12 = vsub.f32 %v2962_v11, %v3351_v5  ;;  %v1040_v13 = vpop.f32.mrb[21].mxu0  ;;  %3080 = vmatprep.subr.bf16.mxu0 %v3226_v40 }
 0x189   : > { %v1159_v14 = vsub.f32 %v1040_v13, %v3349_v4  ;;  %3043 = vmatmul.mubr.bf16.gmra.mrb[20].mxu1 %v1310_v8  ;;  %3081 = vmatpush3.bf16.msra.mxu0 %v3226_v40 }
 0x18b   : > { %v1311_v21 = vpack.c.bf16 %v1160_v12, %v1159_v14  ;;  %v2965_v22 = vpop.f32.mrb[22].mxu0 }
 0x18c   : > { %v1162_v23 = vsub.f32 %v2965_v22, %v3357_v10  ;;  %v1050_v24 = vpop.f32.mrb[23].mxu0 }
 0x18d   : > { %v1161_v25 = vsub.f32 %v1050_v24, %v3355_v9  ;;  %3046 = vmatprep.mubr.bf16.mxu1 %v1311_v21 }
 0x18f   : > { %v1312_v26 = vpack.c.bf16 %v1162_v23, %v1161_v25  ;;  %v2968_v27 = vpop.f32.mrb[24].mxu0 }
 0x190   : > { %v1164_v28 = vsub.f32 %v2968_v27, %v3351_v5  ;;  %v1060_v29 = vpop.f32.mrb[25].mxu0 }
 0x191   : > { %v1163_v30 = vsub.f32 %v1060_v29, %v3349_v4  ;;  %3047 = vmatmul.mubr.bf16.gmra.mrb[24].mxu1 %v1312_v26 }
 0x193   : > { %v1313_v31 = vpack.c.bf16 %v1164_v28, %v1163_v30  ;;  %v2971_v32 = vpop.f32.mrb[26].mxu0 }
 0x194   : > { %v1166_v33 = vsub.f32 %v2971_v32, %v3357_v10  ;;  %v1070_v34 = vpop.f32.mrb[27].mxu0 }
 0x195   : > { %v1165_v35 = vsub.f32 %v1070_v34, %v3355_v9  ;;  %3050 = vmatprep.mubr.bf16.mxu1 %v1313_v31 }
 0x197   : > { %v1314_v36 = vpack.c.bf16 %v1166_v33, %v1165_v35  ;;  %v2974_v37 = vpop.f32.mrb[28].mxu0 }
 0x198   : > { %v1168_v38 = vsub.f32 %v2974_v37, %v3351_v5  ;;  %v1080_v39 = vpop.f32.mrb[29].mxu0 }
 0x199   : > { %v1167_v41 = vsub.f32 %v1080_v39, %v3349_v4  ;;  %3051 = vmatmul.mubr.bf16.gmra.mrb[28].mxu1 %v1314_v36 }
 0x19b   : > { %v1315_v42 = vpack.c.bf16 %v1168_v38, %v1167_v41  ;;  %v2977_v43 = vpop.f32.mrb[30].mxu0 }
 0x19c   : > { %v1170_v45 = vsub.f32 %v2977_v43, %v3357_v10  ;;  %v1090_v46 = vpop.f32.mrb[31].mxu0 }
 0x19d   : > { %v1169_v47 = vsub.f32 %v1090_v46, %v3355_v9  ;;  %3054 = vmatprep.mubr.bf16.mxu1 %v1315_v42 }
 0x19f   : > { %v1316_v48 = vpack.c.bf16 %v1170_v45, %v1169_v47  ;;  %v2980_v49 = vpop.f32.mrb[32].mxu0 }
 0x1a0   : > { %v1172_v50 = vsub.f32 %v2980_v49, %v3351_v5  ;;  %v1100_v51 = vpop.f32.mrb[33].mxu0 }
 0x1a1   : > { %v1171_v52 = vsub.f32 %v1100_v51, %v3349_v4  ;;  %3055 = vmatmul.mubr.bf16.gmra.mrb[32].mxu1 %v1316_v48 }
 0x1a3   : > { %v1317_v53 = vpack.c.bf16 %v1172_v50, %v1171_v52  ;;  %v2983_v54 = vpop.f32.mrb[34].mxu0 }
 0x1a4   : > { %v1174_v55 = vsub.f32 %v2983_v54, %v3357_v10  ;;  %v1110_v56 = vpop.f32.mrb[35].mxu0 }
 0x1a5   : > { %v1173_v57 = vsub.f32 %v1110_v56, %v3355_v9  ;;  %3058 = vmatprep.mubr.bf16.mxu1 %v1317_v53 }
 0x1a7   : > { %v1318_v58 = vpack.c.bf16 %v1174_v55, %v1173_v57  ;;  %v2986_v59 = vpop.f32.mrb[36].mxu0 }
 0x1a8   : > { %v1176_v60 = vsub.f32 %v2986_v59, %v3351_v5  ;;  %v1120_v61 = vpop.f32.mrb[37].mxu0 }
 0x1a9   : > { %v1175_v62 = vsub.f32 %v1120_v61, %v3349_v4  ;;  %3059 = vmatmul.mubr.bf16.gmra.mrb[36].mxu1 %v1318_v58  ;;  %v2725_v4 = vld [vmem:[%s3818_s4] ss:$0 sm:$0xff] }
 0x1aa   : > { %v3625_v5 = vadd.f32 %v3570_v15, %v2725_v4  ;;  %v3631_v44 = vadd.f32 %v3574_v19, %v2725_v4  ;;  %v3635_v11 = vadd.f32 %v2725_v4, %v3576_v20 }
 0x1ab   : > { %v1319_v63 = vpack.c.bf16 %v1176_v60, %v1175_v62  ;;  %v2989_v0 = vpop.f32.mrb[38].mxu0 }
 0x1ac   : > { %v1178_v1 = vsub.f32 %v2989_v0, %v3357_v10  ;;  %v1130_v2 = vpop.f32.mrb[39].mxu0  ;;  %v3628_v10 = vadd.f32 %v2725_v4, %v3572_v18 }
 0x1ad   : > { %v1177_v3 = vsub.f32 %v1130_v2, %v3355_v9  ;;  %3062 = vmatprep.mubr.bf16.mxu1 %v1319_v63 }
 0x1af   : > { %v1320_v6 = vpack.c.bf16 %v1178_v1, %v1177_v3 }
 0x1b1   : > { %3063 = vmatmul.mubr.bf16.gmra.mrb[40].mxu1 %v1320_v6 }
 0x23c   : > { %v3028_v9 = vpop.f32.mrb[4].mxu1 }
 0x23d   : > { %v1580_v7 = vadd.f32 %v3028_v9, %v3625_v5  ;;  %v1419_v8 = vpop.f32.mrb[5].mxu1 }
 0x23e   : > { %v1578_v12 = vadd.f32 %v1419_v8, %v3628_v10  ;;  %v3029_v13 = vpop.f32.mrb[6].mxu1 }
 0x23f   : > { %v1660_v14 = vmul.f32 0.2, %v1580_v7  ;;  %v1581_v15 = vadd.f32 %v3029_v13, %v3631_v44  ;;  %v1422_v21 = vpop.f32.mrb[7].mxu1  ;;  %vm1620_vm0 = vcmp.gt.f32.partialorder %v1580_v7, 0.0 }
 0x240   : > { %v1658_v18 = vmul.f32 0.2, %v1578_v12  ;;  %v1579_v22 = vadd.f32 %v1422_v21, %v3635_v11  ;;  %vm1618_vm11 = vcmp.gt.f32.partialorder %v1578_v12, 0.0 }
 0x241   : > { %vm1621_vm12 = vcmp.gt.f32.partialorder %v1581_v15, 0.0  ;;  %v1661_v19 = vmul.f32 0.2, %v1581_v15  ;;  %v1700_v24 = vsel %vm1620_vm0, %v1580_v7, %v1660_v14 }
 0x242   : > { %vm1619_vm13 = vcmp.gt.f32.partialorder %v1579_v22, 0.0  ;;  %v1659_v23 = vmul.f32 0.2, %v1579_v22  ;;  %v1698_v27 = vsel %vm1618_vm11, %v1578_v12, %v1658_v18 }
 0x243   : > { %v1701_v25 = vsel %vm1621_vm12, %v1581_v15, %v1661_v19 }
 0x244   : > { %v1739_v20 = vpack.c.bf16 %v1701_v25, %v1700_v24  ;;  %v3032_v26 = vpop.f32.mrb[8].mxu1  ;;  %v1699_v28 = vsel %vm1619_vm13, %v1579_v22, %v1659_v23 }
 0x245   : > { %v1584_v29 = vadd.f32 %v3032_v26, %v3625_v5  ;;  %v1435_v30 = vpop.f32.mrb[9].mxu1  ;;  %v1738_v31 = vpack.c.bf16 %v1699_v28, %v1698_v27 }
 0x246   : > { %v1582_v32 = vadd.f32 %v1435_v30, %v3628_v10  ;;  %v3033_v33 = vpop.f32.mrb[10].mxu1 }
 0x247   : > { %v1664_v34 = vmul.f32 0.2, %v1584_v29  ;;  %v1585_v35 = vadd.f32 %v3033_v33, %v3631_v44  ;;  %v1438_v36 = vpop.f32.mrb[11].mxu1  ;;  %3082 = vmatprep.mubr.bf16.mxu0 %v1738_v31  ;;  %vm1624_vm14 = vcmp.gt.f32.partialorder %v1584_v29, 0.0 }
 0x248   : > { %v1662_v37 = vmul.f32 0.2, %v1582_v32  ;;  %v1583_v38 = vadd.f32 %v1438_v36, %v3635_v11  ;;  %3083 = vmatmul.mubr.bf16.vlgmr.msra.gmra.mrb[40].mxu0 %v1739_v20  ;;  %vm1622_vm15 = vcmp.gt.f32.partialorder %v1582_v32, 0.0 }
 0x249   : > { %vm1625_vm1 = vcmp.gt.f32.partialorder %v1585_v35, 0.0  ;;  %v1665_v39 = vmul.f32 0.2, %v1585_v35  ;;  %v1704_v42 = vsel %vm1624_vm14, %v1584_v29, %v1664_v34 }
 0x24a   : > { %vm1623_vm2 = vcmp.gt.f32.partialorder %v1583_v38, 0.0  ;;  %v1663_v41 = vmul.f32 0.2, %v1583_v38  ;;  %v1702_v46 = vsel %vm1622_vm15, %v1582_v32, %v1662_v37 }
 0x24b   : > { %v1705_v43 = vsel %vm1625_vm1, %v1585_v35, %v1665_v39 }
 0x24c   : > { %v3036_v45 = vpop.f32.mrb[12].mxu1  ;;  %v1703_v47 = vsel %vm1623_vm2, %v1583_v38, %v1663_v41  ;;  %v1741_v48 = vpack.c.bf16 %v1705_v43, %v1704_v42 }
 0x24d   : > { %v1588_v49 = vadd.f32 %v3036_v45, %v3625_v5  ;;  %v1451_v50 = vpop.f32.mrb[13].mxu1  ;;  %v1740_v51 = vpack.c.bf16 %v1703_v47, %v1702_v46 }
 0x24e   : > { %v1586_v52 = vadd.f32 %v1451_v50, %v3628_v10  ;;  %v3037_v53 = vpop.f32.mrb[14].mxu1 }
 0x24f   : > { %v1668_v54 = vmul.f32 0.2, %v1588_v49  ;;  %v1589_v55 = vadd.f32 %v3037_v53, %v3631_v44  ;;  %v1454_v56 = vpop.f32.mrb[15].mxu1  ;;  %3086 = vmatprep.mubr.bf16.mxu0 %v1740_v51  ;;  %vm1628_vm3 = vcmp.gt.f32.partialorder %v1588_v49, 0.0 }
 0x250   : > { %v1666_v57 = vmul.f32 0.2, %v1586_v52  ;;  %v1587_v58 = vadd.f32 %v1454_v56, %v3635_v11  ;;  %3087 = vmatmul.mubr.bf16.gmra.mrb[44].mxu0 %v1741_v48  ;;  %vm1626_vm4 = vcmp.gt.f32.partialorder %v1586_v52, 0.0 }
 0x251   : > { %vm1629_vm5 = vcmp.gt.f32.partialorder %v1589_v55, 0.0  ;;  %v1669_v59 = vmul.f32 0.2, %v1589_v55  ;;  %v1708_v61 = vsel %vm1628_vm3, %v1588_v49, %v1668_v54 }
 0x252   : > { %vm1627_vm6 = vcmp.gt.f32.partialorder %v1587_v58, 0.0  ;;  %v1667_v60 = vmul.f32 0.2, %v1587_v58  ;;  %v1706_v0 = vsel %vm1626_vm4, %v1586_v52, %v1666_v57 }
 0x253   : > { %v1709_v62 = vsel %vm1629_vm5, %v1589_v55, %v1669_v59 }
 0x254   : > { %v3040_v63 = vpop.f32.mrb[16].mxu1  ;;  %v1707_v1 = vsel %vm1627_vm6, %v1587_v58, %v1667_v60  ;;  %v1743_v2 = vpack.c.bf16 %v1709_v62, %v1708_v61 }
 0x255   : > { %v1592_v3 = vadd.f32 %v3040_v63, %v3625_v5  ;;  %v1467_v6 = vpop.f32.mrb[17].mxu1  ;;  %v1742_v40 = vpack.c.bf16 %v1707_v1, %v1706_v0 }
 0x256   : > { %v1590_v4 = vadd.f32 %v1467_v6, %v3628_v10  ;;  %v3041_v9 = vpop.f32.mrb[18].mxu1 }
 0x257   : > { %v1672_v7 = vmul.f32 0.2, %v1592_v3  ;;  %v1593_v8 = vadd.f32 %v3041_v9, %v3631_v44  ;;  %v1470_v12 = vpop.f32.mrb[19].mxu1  ;;  %3090 = vmatprep.mubr.bf16.mxu0 %v1742_v40  ;;  %vm1632_vm7 = vcmp.gt.f32.partialorder %v1592_v3, 0.0 }
 0x258   : > { %v1670_v13 = vmul.f32 0.2, %v1590_v4  ;;  %v1591_v14 = vadd.f32 %v1470_v12, %v3635_v11  ;;  %3091 = vmatmul.mubr.bf16.gmra.mrb[48].mxu0 %v1743_v2  ;;  %vm1630_vm8 = vcmp.gt.f32.partialorder %v1590_v4, 0.0 }
 0x259   : > { %vm1633_vm9 = vcmp.gt.f32.partialorder %v1593_v8, 0.0  ;;  %v1673_v15 = vmul.f32 0.2, %v1593_v8  ;;  %v1712_v18 = vsel %vm1632_vm7, %v1592_v3, %v1672_v7 }
 0x25a   : > { %vm1631_vm10 = vcmp.gt.f32.partialorder %v1591_v14, 0.0  ;;  %v1671_v21 = vmul.f32 0.2, %v1591_v14  ;;  %v1710_v23 = vsel %vm1630_vm8, %v1590_v4, %v1670_v13 }
 0x25b   : > { %v1713_v22 = vsel %vm1633_vm9, %v1593_v8, %v1673_v15 }
 0x25c   : > { %v3044_v19 = vpop.f32.mrb[20].mxu1  ;;  %v1711_v24 = vsel %vm1631_vm10, %v1591_v14, %v1671_v21  ;;  %v1745_v25 = vpack.c.bf16 %v1713_v22, %v1712_v18 }
 0x25d   : > { %v1596_v20 = vadd.f32 %v3044_v19, %v3625_v5  ;;  %v1483_v26 = vpop.f32.mrb[21].mxu1  ;;  %v1744_v27 = vpack.c.bf16 %v1711_v24, %v1710_v23 }
 0x25e   : > { %v1594_v28 = vadd.f32 %v1483_v26, %v3628_v10  ;;  %v3045_v29 = vpop.f32.mrb[22].mxu1 }
 0x25f   : > { %v1676_v30 = vmul.f32 0.2, %v1596_v20  ;;  %v1597_v31 = vadd.f32 %v3045_v29, %v3631_v44  ;;  %v1486_v32 = vpop.f32.mrb[23].mxu1  ;;  %3094 = vmatprep.mubr.bf16.mxu0 %v1744_v27  ;;  %vm1636_vm0 = vcmp.gt.f32.partialorder %v1596_v20, 0.0 }
 0x260   : > { %v1674_v33 = vmul.f32 0.2, %v1594_v28  ;;  %v1595_v34 = vadd.f32 %v1486_v32, %v3635_v11  ;;  %3095 = vmatmul.mubr.bf16.gmra.mrb[52].mxu0 %v1745_v25  ;;  %vm1634_vm11 = vcmp.gt.f32.partialorder %v1594_v28, 0.0 }
 0x261   : > { %vm1637_vm12 = vcmp.gt.f32.partialorder %v1597_v31, 0.0  ;;  %v1677_v35 = vmul.f32 0.2, %v1597_v31  ;;  %v1716_v37 = vsel %vm1636_vm0, %v1596_v20, %v1676_v30 }
 0x262   : > { %vm1635_vm13 = vcmp.gt.f32.partialorder %v1595_v34, 0.0  ;;  %v1675_v36 = vmul.f32 0.2, %v1595_v34  ;;  %v1714_v41 = vsel %vm1634_vm11, %v1594_v28, %v1674_v33 }
 0x263   : > { %v1717_v38 = vsel %vm1637_vm12, %v1597_v31, %v1677_v35 }
 0x264   : > { %v3048_v39 = vpop.f32.mrb[24].mxu1  ;;  %v1715_v42 = vsel %vm1635_vm13, %v1595_v34, %v1675_v36  ;;  %v1747_v43 = vpack.c.bf16 %v1717_v38, %v1716_v37 }
 0x265   : > { %v1600_v45 = vadd.f32 %v3048_v39, %v3625_v5  ;;  %v1499_v46 = vpop.f32.mrb[25].mxu1  ;;  %v1746_v47 = vpack.c.bf16 %v1715_v42, %v1714_v41 }
 0x266   : > { %v1598_v48 = vadd.f32 %v1499_v46, %v3628_v10  ;;  %v3049_v49 = vpop.f32.mrb[26].mxu1 }
 0x267   : > { %v1680_v50 = vmul.f32 0.2, %v1600_v45  ;;  %v1601_v51 = vadd.f32 %v3049_v49, %v3631_v44  ;;  %v1502_v52 = vpop.f32.mrb[27].mxu1  ;;  %3098 = vmatprep.mubr.bf16.mxu0 %v1746_v47  ;;  %vm1640_vm14 = vcmp.gt.f32.partialorder %v1600_v45, 0.0 }
 0x268   : > { %v1678_v53 = vmul.f32 0.2, %v1598_v48  ;;  %v1599_v54 = vadd.f32 %v1502_v52, %v3635_v11  ;;  %3099 = vmatmul.mubr.bf16.gmra.mrb[56].mxu0 %v1747_v43  ;;  %vm1638_vm15 = vcmp.gt.f32.partialorder %v1598_v48, 0.0 }
 0x269   : > { %vm1641_vm1 = vcmp.gt.f32.partialorder %v1601_v51, 0.0  ;;  %v1681_v55 = vmul.f32 0.2, %v1601_v51  ;;  %v1720_v57 = vsel %vm1640_vm14, %v1600_v45, %v1680_v50 }
 0x26a   : > { %vm1639_vm2 = vcmp.gt.f32.partialorder %v1599_v54, 0.0  ;;  %v1679_v56 = vmul.f32 0.2, %v1599_v54  ;;  %v1718_v60 = vsel %vm1638_vm15, %v1598_v48, %v1678_v53 }
 0x26b   : > { %v1721_v58 = vsel %vm1641_vm1, %v1601_v51, %v1681_v55 }
 0x26c   : > { %v3052_v59 = vpop.f32.mrb[28].mxu1  ;;  %v1719_v61 = vsel %vm1639_vm2, %v1599_v54, %v1679_v56  ;;  %v1749_v62 = vpack.c.bf16 %v1721_v58, %v1720_v57 }
 0x26d   : > { %v1604_v63 = vadd.f32 %v3052_v59, %v3625_v5  ;;  %v1515_v0 = vpop.f32.mrb[29].mxu1  ;;  %v1748_v1 = vpack.c.bf16 %v1719_v61, %v1718_v60 }
 0x26e   : > { %v1602_v2 = vadd.f32 %v1515_v0, %v3628_v10  ;;  %v3053_v3 = vpop.f32.mrb[30].mxu1 }
 0x26f   : > { %v1684_v6 = vmul.f32 0.2, %v1604_v63  ;;  %v1605_v40 = vadd.f32 %v3053_v3, %v3631_v44  ;;  %v1518_v4 = vpop.f32.mrb[31].mxu1  ;;  %3102 = vmatprep.mubr.bf16.mxu0 %v1748_v1  ;;  %vm1644_vm3 = vcmp.gt.f32.partialorder %v1604_v63, 0.0 }
 0x270   : > { %v1682_v9 = vmul.f32 0.2, %v1602_v2  ;;  %v1603_v7 = vadd.f32 %v1518_v4, %v3635_v11  ;;  %3103 = vmatmul.mubr.bf16.gmra.mrb[60].mxu0 %v1749_v62  ;;  %vm1642_vm4 = vcmp.gt.f32.partialorder %v1602_v2, 0.0 }
 0x271   : > { %vm1645_vm5 = vcmp.gt.f32.partialorder %v1605_v40, 0.0  ;;  %v1685_v8 = vmul.f32 0.2, %v1605_v40  ;;  %v1724_v13 = vsel %vm1644_vm3, %v1604_v63, %v1684_v6 }
 0x272   : > { %vm1643_vm6 = vcmp.gt.f32.partialorder %v1603_v7, 0.0  ;;  %v1683_v12 = vmul.f32 0.2, %v1603_v7  ;;  %v1722_v21 = vsel %vm1642_vm4, %v1602_v2, %v1682_v9 }
 0x273   : > { %v1725_v14 = vsel %vm1645_vm5, %v1605_v40, %v1685_v8 }
 0x274   : > { %v3056_v15 = vpop.f32.mrb[32].mxu1  ;;  %v1723_v18 = vsel %vm1643_vm6, %v1603_v7, %v1683_v12  ;;  %v1751_v22 = vpack.c.bf16 %v1725_v14, %v1724_v13  ;;  %v3229_v13 = vld [vmem:[%s3822_s8 + $0x10] sm:$0xff]   ;;  %v3230_v14 = vld [vmem:[%s3822_s8 + $0x18] sm:$0xff]  }
 0x275   : > { %v1608_v19 = vadd.f32 %v3056_v15, %v3625_v5  ;;  %v1531_v23 = vpop.f32.mrb[33].mxu1  ;;  %v1750_v24 = vpack.c.bf16 %v1723_v18, %v1722_v21  ;;  %v3231_v15 = vld [vmem:[%s3822_s8 + $0x20] sm:$0xff]   ;;  %v3232_v21 = vld [vmem:[%s3822_s8 + $0x28] sm:$0xff]   ;;  %v3233_v18 = vld [vmem:[%s3822_s8 + $0x30] sm:$0xff]  }
 0x276   : > { %v1606_v25 = vadd.f32 %v1531_v23, %v3628_v10  ;;  %v3057_v20 = vpop.f32.mrb[34].mxu1  ;;  %v3243_v23 = vld [vmem:[%s3824_s10] sm:$0xff]  }
 0x277   : > { %v1688_v26 = vmul.f32 0.2, %v1608_v19  ;;  %v1609_v27 = vadd.f32 %v3057_v20, %v3631_v44  ;;  %v1534_v28 = vpop.f32.mrb[35].mxu1  ;;  %3106 = vmatprep.mubr.bf16.mxu0 %v1750_v24  ;;  %vm1648_vm7 = vcmp.gt.f32.partialorder %v1608_v19, 0.0  ;;  %v3244_v24 = vld [vmem:[%s3824_s10 + $0x8] sm:$0xff]   ;;  %3162 = vmatprep.subr.bf16.mxu0 %v3243_v23  ;;  %v3246_v20 = vld [vmem:[%s3824_s10 + $0x18] sm:$0xff]  }
 0x278   : > { %v1686_v29 = vmul.f32 0.2, %v1606_v25  ;;  %v1607_v30 = vadd.f32 %v1534_v28, %v3635_v11  ;;  %3107 = vmatmul.mubr.bf16.gmra.mrb[64].mxu0 %v1751_v22  ;;  %vm1646_vm8 = vcmp.gt.f32.partialorder %v1606_v25, 0.0  ;;  %v3234_v22 = vld [vmem:[%s3822_s8 + $0x38] sm:$0xff]  }
 0x279   : > { %vm1649_vm9 = vcmp.gt.f32.partialorder %v1609_v27, 0.0  ;;  %v1689_v31 = vmul.f32 0.2, %v1609_v27  ;;  %v1728_v33 = vsel %vm1648_vm7, %v1608_v19, %v1688_v26  ;;  %v3703_v19 = vld [vmem:[%s3821_s7] sm:$0xff]   ;;  %3163 = vmatpush3.bf16.msra.mxu0 %v3243_v23 }
 0x27a   : > { %vm1647_vm10 = vcmp.gt.f32.partialorder %v1607_v30, 0.0  ;;  %v1687_v32 = vmul.f32 0.2, %v1607_v30  ;;  %v1726_v36 = vsel %vm1646_vm8, %v1606_v25, %v1686_v29  ;;  %3164 = vmatprep.subr.bf16.mxu0 %v3244_v24  ;;  %v3245_v25 = vld [vmem:[%s3824_s10 + $0x10] sm:$0xff]   ;;  %v3721_v26 = vld [vmem:[%s3820_s6] ss:$0 sm:$0xff] }
 0x27b   : > { %v1729_v34 = vsel %vm1649_vm9, %v1609_v27, %v1689_v31  ;;  %v3247_v31 = vld [vmem:[%s3824_s10 + $0x20] sm:$0xff]  }
 0x27c   : > { %v3060_v35 = vpop.f32.mrb[36].mxu1  ;;  %v1727_v37 = vsel %vm1647_vm10, %v1607_v30, %v1687_v32  ;;  %v1753_v38 = vpack.c.bf16 %v1729_v34, %v1728_v33 }
 0x27d   : > { %v1612_v39 = vadd.f32 %v3060_v35, %v3625_v5  ;;  %v1547_v41 = vpop.f32.mrb[37].mxu1  ;;  %v1752_v42 = vpack.c.bf16 %v1727_v37, %v1726_v36  ;;  %3165 = vmatpush3.bf16.msra.mxu0 %v3244_v24  ;;  %v3248_v36 = vld [vmem:[%s3824_s10 + $0x28] sm:$0xff]  }
 0x27e   : > { %v1610_v43 = vadd.f32 %v1547_v41, %v3628_v10  ;;  %v3061_v45 = vpop.f32.mrb[38].mxu1  ;;  %3166 = vmatprep.subr.bf16.mxu0 %v3245_v25 }
 0x27f   : > { %v1692_v46 = vmul.f32 0.2, %v1612_v39  ;;  %v1613_v47 = vadd.f32 %v3061_v45, %v3631_v44  ;;  %v1550_v48 = vpop.f32.mrb[39].mxu1  ;;  %3110 = vmatprep.mubr.bf16.mxu0 %v1752_v42  ;;  %vm1652_vm0 = vcmp.gt.f32.partialorder %v1612_v39, 0.0 }
 0x280   : > { %v1690_v49 = vmul.f32 0.2, %v1610_v43  ;;  %v1611_v50 = vadd.f32 %v1550_v48, %v3635_v11  ;;  %3111 = vmatmul.mubr.bf16.gmra.mrb[68].mxu0 %v1753_v38  ;;  %vm1650_vm11 = vcmp.gt.f32.partialorder %v1610_v43, 0.0  ;;  %v3249_v48 = vld [vmem:[%s3824_s10 + $0x30] sm:$0xff]  }
 0x281   : > { %vm1653_vm12 = vcmp.gt.f32.partialorder %v1613_v47, 0.0  ;;  %v1693_v51 = vmul.f32 0.2, %v1613_v47  ;;  %v1732_v53 = vsel %vm1652_vm0, %v1612_v39, %v1692_v46  ;;  %3167 = vmatpush3.bf16.msra.mxu0 %v3245_v25 }
 0x282   : > { %vm1651_vm13 = vcmp.gt.f32.partialorder %v1611_v50, 0.0  ;;  %v1691_v52 = vmul.f32 0.2, %v1611_v50  ;;  %v1730_v56 = vsel %vm1650_vm11, %v1610_v43, %v1690_v49  ;;  %3168 = vmatprep.subr.bf16.mxu0 %v3246_v20 }
 0x283   : > { %v1733_v54 = vsel %vm1653_vm12, %v1613_v47, %v1693_v51 }
 0x284   : > { %v3064_v55 = vpop.f32.mrb[40].mxu1  ;;  %v1731_v57 = vsel %vm1651_vm13, %v1611_v50, %v1691_v52  ;;  %v1755_v58 = vpack.c.bf16 %v1733_v54, %v1732_v53 }
 0x285   : > { %v1616_v59 = vadd.f32 %v3064_v55, %v3625_v5  ;;  %v1563_v60 = vpop.f32.mrb[41].mxu1  ;;  %v1754_v61 = vpack.c.bf16 %v1731_v57, %v1730_v56  ;;  %3169 = vmatpush3.bf16.msra.mxu0 %v3246_v20 }
 0x286   : > { %v1614_v62 = vadd.f32 %v1563_v60, %v3628_v10  ;;  %v3065_v63 = vpop.f32.mrb[42].mxu1  ;;  %3170 = vmatprep.subr.bf16.mxu0 %v3247_v31 }
 0x287   : > { %v1696_v0 = vmul.f32 0.2, %v1616_v59  ;;  %v1617_v1 = vadd.f32 %v3065_v63, %v3631_v44  ;;  %v1566_v2 = vpop.f32.mrb[43].mxu1  ;;  %3114 = vmatprep.mubr.bf16.mxu0 %v1754_v61  ;;  %vm1656_vm14 = vcmp.gt.f32.partialorder %v1616_v59, 0.0  ;;  %v3227_v44 = vld [vmem:[%s3822_s8] sm:$0xff]  }
 0x288   : > { %v1694_v3 = vmul.f32 0.2, %v1614_v62  ;;  %v1615_v6 = vadd.f32 %v1566_v2, %v3635_v11  ;;  %3115 = vmatmul.mubr.bf16.gmra.mrb[72].mxu0 %v1755_v58  ;;  %vm1654_vm15 = vcmp.gt.f32.partialorder %v1614_v62, 0.0  ;;  %3122 = vmatprep.subr.bf16.mxu1 %v3227_v44  ;;  %v3228_v11 = vld [vmem:[%s3822_s8 + $0x8] sm:$0xff]  }
 0x289   : > { %vm1657_vm1 = vcmp.gt.f32.partialorder %v1617_v1, 0.0  ;;  %v1697_v40 = vmul.f32 0.2, %v1617_v1  ;;  %v1736_v4 = vsel %vm1656_vm14, %v1616_v59, %v1696_v0  ;;  %3123 = vmatpush3.bf16.msra.mxu1 %v3227_v44  ;;  %3171 = vmatpush3.bf16.msra.mxu0 %v3247_v31 }
 0x28a   : > { %vm1655_vm2 = vcmp.gt.f32.partialorder %v1615_v6, 0.0  ;;  %v1695_v5 = vmul.f32 0.2, %v1615_v6  ;;  %v1734_v7 = vsel %vm1654_vm15, %v1614_v62, %v1694_v3  ;;  %3124 = vmatprep.subr.bf16.mxu1 %v3228_v11  ;;  %3172 = vmatprep.subr.bf16.mxu0 %v3248_v36 }
 0x28b   : > { %v1737_v9 = vsel %vm1657_vm1, %v1617_v1, %v1697_v40 }
 0x28c   : > { %v1735_v10 = vsel %vm1655_vm2, %v1615_v6, %v1695_v5  ;;  %v1757_v8 = vpack.c.bf16 %v1737_v9, %v1736_v4 }
 0x28d   : > { %v1756_v12 = vpack.c.bf16 %v1735_v10, %v1734_v7  ;;  %3125 = vmatpush3.bf16.msra.mxu1 %v3228_v11  ;;  %3173 = vmatpush3.bf16.msra.mxu0 %v3248_v36 }
 0x28e   : > { %3126 = vmatprep.subr.bf16.mxu1 %v3229_v13  ;;  %3174 = vmatprep.subr.bf16.mxu0 %v3249_v48 }
 0x28f   : > { %3118 = vmatprep.mubr.bf16.mxu0 %v1756_v12 }
 0x290   : > { %3119 = vmatmul.mubr.bf16.gmra.mrb[76].mxu0 %v1757_v8 }
 0x291   : > { %3127 = vmatpush3.bf16.msra.mxu1 %v3229_v13  ;;  %3175 = vmatpush3.bf16.msra.mxu0 %v3249_v48 }
 0x292   : > { %3128 = vmatprep.subr.bf16.mxu1 %v3230_v14 }
 0x295   : > { %3129 = vmatpush3.bf16.msra.mxu1 %v3230_v14 }
 0x296   : > { %3130 = vmatprep.subr.bf16.mxu1 %v3231_v15 }
 0x299   : > { %3131 = vmatpush3.bf16.msra.mxu1 %v3231_v15 }
 0x29a   : > { %3132 = vmatprep.subr.bf16.mxu1 %v3232_v21 }
 0x29d   : > { %3133 = vmatpush3.bf16.msra.mxu1 %v3232_v21 }
 0x29e   : > { %3134 = vmatprep.subr.bf16.mxu1 %v3233_v18 }
 0x2a1   : > { %3135 = vmatpush3.bf16.msra.mxu1 %v3233_v18 }
 0x2a2   : > { %3136 = vmatprep.subr.bf16.mxu1 %v3234_v22 }
 0x2a5   : > { %3137 = vmatpush3.bf16.msra.mxu1 %v3234_v22 }
 0x2a6   : > { %3142 = vmatprep.subr.bf16.mxu1 %v3703_v19 }
 0x31b   : > { %v3084_v27 = vpop.f32.mrb[40].mxu0 }
 0x31c   : > { %v1863_v28 = vpop.f32.mrb[41].mxu0  ;;  %v1872_v29 = vadd.f32 %v3084_v27, %v3721_v26 }
 0x31d   : > { %v3085_v30 = vpop.f32.mrb[42].mxu0  ;;  %v1864_v32 = vadd.f32 %v3721_v26, %v1863_v28 }
 0x31e   : > { %v1866_v33 = vpop.f32.mrb[43].mxu0  ;;  %v2064_v34 = vmul.f32 0.2, %v1872_v29  ;;  %v1875_v35 = vadd.f32 %v3085_v30, %v3721_v26  ;;  %vm2024_vm3 = vcmp.gt.f32.partialorder %v1872_v29, 0.0 }
 0x31f   : > { %v2062_v37 = vmul.f32 0.2, %v1864_v32  ;;  %vm2022_vm4 = vcmp.gt.f32.partialorder %v1864_v32, 0.0  ;;  %v1867_v38 = vadd.f32 %v3721_v26, %v1866_v33 }
 0x320   : > { %v2104_v43 = vsel %vm2024_vm3, %v1872_v29, %v2064_v34  ;;  %vm2025_vm5 = vcmp.gt.f32.partialorder %v1875_v35, 0.0  ;;  %v2065_v45 = vmul.f32 0.2, %v1875_v35 }
 0x321   : > { %v2102_v49 = vsel %vm2022_vm4, %v1864_v32, %v2062_v37  ;;  %v2063_v53 = vmul.f32 0.2, %v1867_v38  ;;  %vm2023_vm8 = vcmp.gt.f32.partialorder %v1867_v38, 0.0 }
 0x322   : > { %v2105_v61 = vsel %vm2025_vm5, %v1875_v35, %v2065_v45 }
 0x323   : > { %v3088_v39 = vpop.f32.mrb[44].mxu0  ;;  %v2103_v0 = vsel %vm2023_vm8, %v1867_v38, %v2063_v53 }
 0x324   : > { %v1888_v41 = vadd.f32 %v3088_v39, %v3721_v26  ;;  %v1879_v42 = vpop.f32.mrb[45].mxu0 }
 0x325   : > { %v1880_v46 = vadd.f32 %v3721_v26, %v1879_v42  ;;  %v3089_v47 = vpop.f32.mrb[46].mxu0 }
 0x326   : > { %vm2028_vm6 = vcmp.gt.f32.partialorder %v1888_v41, 0.0  ;;  %v2068_v50 = vmul.f32 0.2, %v1888_v41  ;;  %v1891_v51 = vadd.f32 %v3089_v47, %v3721_v26  ;;  %v1882_v52 = vpop.f32.mrb[47].mxu0 }
 0x327   : > { %vm2026_vm7 = vcmp.gt.f32.partialorder %v1880_v46, 0.0  ;;  %v2066_v54 = vmul.f32 0.2, %v1880_v46  ;;  %v1883_v55 = vadd.f32 %v3721_v26, %v1882_v52 }
 0x328   : > { %v2108_v56 = vsel %vm2028_vm6, %v1888_v41, %v2068_v50  ;;  %vm2029_vm9 = vcmp.gt.f32.partialorder %v1891_v51, 0.0  ;;  %v2069_v57 = vmul.f32 0.2, %v1891_v51 }
 0x329   : > { %v2160_v58 = vmax.f32 %v2104_v43, %v2108_v56  ;;  %v2106_v59 = vsel %vm2026_vm7, %v1880_v46, %v2066_v54  ;;  %vm2027_vm10 = vcmp.gt.f32.partialorder %v1883_v55, 0.0  ;;  %v2067_v60 = vmul.f32 0.2, %v1883_v55 }
 0x32a   : > { %v2142_v62 = vmax.f32 %v2102_v49, %v2106_v59  ;;  %v2109_v63 = vsel %vm2029_vm9, %v1891_v51, %v2069_v57 }
 0x32b   : > { %v2169_v1 = vmax.f32 %v2105_v61, %v2109_v63  ;;  %v2107_v2 = vsel %vm2027_vm10, %v1883_v55, %v2067_v60  ;;  %v3092_v3 = vpop.f32.mrb[48].mxu0 }
 0x32c   : > { %v2151_v6 = vmax.f32 %v2103_v0, %v2107_v2  ;;  %v1904_v40 = vadd.f32 %v3092_v3, %v3721_v26  ;;  %v1895_v5 = vpop.f32.mrb[49].mxu0 }
 0x32d   : > { %v1896_v4 = vadd.f32 %v3721_v26, %v1895_v5  ;;  %v3093_v9 = vpop.f32.mrb[50].mxu0 }
 0x32e   : > { %vm2032_vm0 = vcmp.gt.f32.partialorder %v1904_v40, 0.0  ;;  %v2072_v7 = vmul.f32 0.2, %v1904_v40  ;;  %v1907_v10 = vadd.f32 %v3093_v9, %v3721_v26  ;;  %v1898_v8 = vpop.f32.mrb[51].mxu0 }
 0x32f   : > { %vm2030_vm11 = vcmp.gt.f32.partialorder %v1896_v4, 0.0  ;;  %v2070_v12 = vmul.f32 0.2, %v1896_v4  ;;  %v1899_v44 = vadd.f32 %v3721_v26, %v1898_v8 }
 0x330   : > { %v2112_v11 = vsel %vm2032_vm0, %v1904_v40, %v2072_v7  ;;  %vm2033_vm12 = vcmp.gt.f32.partialorder %v1907_v10, 0.0  ;;  %v2073_v13 = vmul.f32 0.2, %v1907_v10 }
 0x331   : > { %v2161_v14 = vmax.f32 %v2160_v58, %v2112_v11  ;;  %v2110_v15 = vsel %vm2030_vm11, %v1896_v4, %v2070_v12  ;;  %vm2031_vm13 = vcmp.gt.f32.partialorder %v1899_v44, 0.0  ;;  %v2071_v21 = vmul.f32 0.2, %v1899_v44 }
 0x332   : > { %v2143_v18 = vmax.f32 %v2142_v62, %v2110_v15  ;;  %v2113_v22 = vsel %vm2033_vm12, %v1907_v10, %v2073_v13 }
 0x333   : > { %v2170_v23 = vmax.f32 %v2169_v1, %v2113_v22  ;;  %v2111_v24 = vsel %vm2031_vm13, %v1899_v44, %v2071_v21  ;;  %v3096_v25 = vpop.f32.mrb[52].mxu0 }
 0x334   : > { %v2152_v20 = vmax.f32 %v2151_v6, %v2111_v24  ;;  %v1920_v27 = vadd.f32 %v3096_v25, %v3721_v26  ;;  %v1911_v28 = vpop.f32.mrb[53].mxu0 }
 0x335   : > { %v1912_v29 = vadd.f32 %v3721_v26, %v1911_v28  ;;  %v3097_v30 = vpop.f32.mrb[54].mxu0 }
 0x336   : > { %vm2036_vm14 = vcmp.gt.f32.partialorder %v1920_v27, 0.0  ;;  %v2076_v31 = vmul.f32 0.2, %v1920_v27  ;;  %v1923_v32 = vadd.f32 %v3097_v30, %v3721_v26  ;;  %v1914_v33 = vpop.f32.mrb[55].mxu0 }
 0x337   : > { %vm2034_vm15 = vcmp.gt.f32.partialorder %v1912_v29, 0.0  ;;  %v2074_v34 = vmul.f32 0.2, %v1912_v29  ;;  %v1915_v35 = vadd.f32 %v3721_v26, %v1914_v33 }
 0x338   : > { %v2116_v36 = vsel %vm2036_vm14, %v1920_v27, %v2076_v31  ;;  %vm2037_vm1 = vcmp.gt.f32.partialorder %v1923_v32, 0.0  ;;  %v2077_v37 = vmul.f32 0.2, %v1923_v32 }
 0x339   : > { %v2162_v38 = vmax.f32 %v2161_v14, %v2116_v36  ;;  %v2114_v39 = vsel %vm2034_vm15, %v1912_v29, %v2074_v34  ;;  %vm2035_vm2 = vcmp.gt.f32.partialorder %v1915_v35, 0.0  ;;  %v2075_v41 = vmul.f32 0.2, %v1915_v35 }
 0x33a   : > { %v2144_v42 = vmax.f32 %v2143_v18, %v2114_v39  ;;  %v2117_v43 = vsel %vm2037_vm1, %v1923_v32, %v2077_v37 }
 0x33b   : > { %v2171_v45 = vmax.f32 %v2170_v23, %v2117_v43  ;;  %v2115_v46 = vsel %vm2035_vm2, %v1915_v35, %v2075_v41  ;;  %v3100_v47 = vpop.f32.mrb[56].mxu0 }
 0x33c   : > { %v2153_v48 = vmax.f32 %v2152_v20, %v2115_v46  ;;  %v1936_v49 = vadd.f32 %v3100_v47, %v3721_v26  ;;  %v1927_v50 = vpop.f32.mrb[57].mxu0 }
 0x33d   : > { %v1928_v51 = vadd.f32 %v3721_v26, %v1927_v50  ;;  %v3101_v52 = vpop.f32.mrb[58].mxu0 }
 0x33e   : > { %vm2040_vm3 = vcmp.gt.f32.partialorder %v1936_v49, 0.0  ;;  %v2080_v53 = vmul.f32 0.2, %v1936_v49  ;;  %v1939_v54 = vadd.f32 %v3101_v52, %v3721_v26  ;;  %v1930_v55 = vpop.f32.mrb[59].mxu0 }
 0x33f   : > { %vm2038_vm4 = vcmp.gt.f32.partialorder %v1928_v51, 0.0  ;;  %v2078_v56 = vmul.f32 0.2, %v1928_v51  ;;  %v1931_v57 = vadd.f32 %v3721_v26, %v1930_v55 }
 0x340   : > { %v2120_v58 = vsel %vm2040_vm3, %v1936_v49, %v2080_v53  ;;  %vm2041_vm5 = vcmp.gt.f32.partialorder %v1939_v54, 0.0  ;;  %v2081_v59 = vmul.f32 0.2, %v1939_v54 }
 0x341   : > { %v2163_v60 = vmax.f32 %v2162_v38, %v2120_v58  ;;  %v2118_v61 = vsel %vm2038_vm4, %v1928_v51, %v2078_v56  ;;  %vm2039_vm6 = vcmp.gt.f32.partialorder %v1931_v57, 0.0  ;;  %v2079_v62 = vmul.f32 0.2, %v1931_v57 }
 0x342   : > { %v2145_v63 = vmax.f32 %v2144_v42, %v2118_v61  ;;  %v2121_v0 = vsel %vm2041_vm5, %v1939_v54, %v2081_v59 }
 0x343   : > { %v2172_v1 = vmax.f32 %v2171_v45, %v2121_v0  ;;  %v2119_v2 = vsel %vm2039_vm6, %v1931_v57, %v2079_v62  ;;  %v3104_v3 = vpop.f32.mrb[60].mxu0 }
 0x344   : > { %v2154_v6 = vmax.f32 %v2153_v48, %v2119_v2  ;;  %v1952_v40 = vadd.f32 %v3104_v3, %v3721_v26  ;;  %v1943_v5 = vpop.f32.mrb[61].mxu0 }
 0x345   : > { %v1944_v4 = vadd.f32 %v3721_v26, %v1943_v5  ;;  %v3105_v9 = vpop.f32.mrb[62].mxu0 }
 0x346   : > { %vm2044_vm7 = vcmp.gt.f32.partialorder %v1952_v40, 0.0  ;;  %v2084_v7 = vmul.f32 0.2, %v1952_v40  ;;  %v1955_v10 = vadd.f32 %v3105_v9, %v3721_v26  ;;  %v1946_v8 = vpop.f32.mrb[63].mxu0 }
 0x347   : > { %vm2042_vm8 = vcmp.gt.f32.partialorder %v1944_v4, 0.0  ;;  %v2082_v12 = vmul.f32 0.2, %v1944_v4  ;;  %v1947_v44 = vadd.f32 %v3721_v26, %v1946_v8 }
 0x348   : > { %v2124_v11 = vsel %vm2044_vm7, %v1952_v40, %v2084_v7  ;;  %vm2045_vm9 = vcmp.gt.f32.partialorder %v1955_v10, 0.0  ;;  %v2085_v13 = vmul.f32 0.2, %v1955_v10 }
 0x349   : > { %v2164_v14 = vmax.f32 %v2163_v60, %v2124_v11  ;;  %v2122_v15 = vsel %vm2042_vm8, %v1944_v4, %v2082_v12  ;;  %vm2043_vm10 = vcmp.gt.f32.partialorder %v1947_v44, 0.0  ;;  %v2083_v21 = vmul.f32 0.2, %v1947_v44 }
 0x34a   : > { %v2146_v18 = vmax.f32 %v2145_v63, %v2122_v15  ;;  %v2125_v22 = vsel %vm2045_vm9, %v1955_v10, %v2085_v13 }
 0x34b   : > { %v2173_v23 = vmax.f32 %v2172_v1, %v2125_v22  ;;  %v2123_v24 = vsel %vm2043_vm10, %v1947_v44, %v2083_v21  ;;  %v3108_v25 = vpop.f32.mrb[64].mxu0 }
 0x34c   : > { %v2155_v20 = vmax.f32 %v2154_v6, %v2123_v24  ;;  %v1968_v27 = vadd.f32 %v3108_v25, %v3721_v26  ;;  %v1959_v28 = vpop.f32.mrb[65].mxu0 }
 0x34d   : > { %v1960_v29 = vadd.f32 %v3721_v26, %v1959_v28  ;;  %v3109_v30 = vpop.f32.mrb[66].mxu0 }
 0x34e   : > { %vm2048_vm0 = vcmp.gt.f32.partialorder %v1968_v27, 0.0  ;;  %v2088_v31 = vmul.f32 0.2, %v1968_v27  ;;  %v1971_v32 = vadd.f32 %v3109_v30, %v3721_v26  ;;  %v1962_v33 = vpop.f32.mrb[67].mxu0 }
 0x34f   : > { %vm2046_vm11 = vcmp.gt.f32.partialorder %v1960_v29, 0.0  ;;  %v2086_v34 = vmul.f32 0.2, %v1960_v29  ;;  %v1963_v35 = vadd.f32 %v3721_v26, %v1962_v33 }
 0x350   : > { %v2128_v36 = vsel %vm2048_vm0, %v1968_v27, %v2088_v31  ;;  %vm2049_vm12 = vcmp.gt.f32.partialorder %v1971_v32, 0.0  ;;  %v2089_v37 = vmul.f32 0.2, %v1971_v32 }
 0x351   : > { %v2165_v38 = vmax.f32 %v2164_v14, %v2128_v36  ;;  %v2126_v39 = vsel %vm2046_vm11, %v1960_v29, %v2086_v34  ;;  %vm2047_vm13 = vcmp.gt.f32.partialorder %v1963_v35, 0.0  ;;  %v2087_v41 = vmul.f32 0.2, %v1963_v35 }
 0x352   : > { %v2147_v42 = vmax.f32 %v2146_v18, %v2126_v39  ;;  %v2129_v43 = vsel %vm2049_vm12, %v1971_v32, %v2089_v37 }
 0x353   : > { %v2174_v45 = vmax.f32 %v2173_v23, %v2129_v43  ;;  %v2127_v46 = vsel %vm2047_vm13, %v1963_v35, %v2087_v41  ;;  %v3112_v47 = vpop.f32.mrb[68].mxu0 }
 0x354   : > { %v2156_v48 = vmax.f32 %v2155_v20, %v2127_v46  ;;  %v1984_v49 = vadd.f32 %v3112_v47, %v3721_v26  ;;  %v1975_v50 = vpop.f32.mrb[69].mxu0 }
 0x355   : > { %v1976_v51 = vadd.f32 %v3721_v26, %v1975_v50  ;;  %v3113_v52 = vpop.f32.mrb[70].mxu0  ;;  %v3236_v50 = vld [vmem:[%s3821_s7 + $0x8] sm:$0xff]  }
 0x356   : > { %vm2052_vm14 = vcmp.gt.f32.partialorder %v1984_v49, 0.0  ;;  %v2092_v53 = vmul.f32 0.2, %v1984_v49  ;;  %v1987_v54 = vadd.f32 %v3113_v52, %v3721_v26  ;;  %v1978_v55 = vpop.f32.mrb[71].mxu0  ;;  %v3239_v52 = vld [vmem:[%s3821_s7 + $0x20] sm:$0xff]  }
 0x357   : > { %vm2050_vm15 = vcmp.gt.f32.partialorder %v1976_v51, 0.0  ;;  %v2090_v56 = vmul.f32 0.2, %v1976_v51  ;;  %v1979_v57 = vadd.f32 %v3721_v26, %v1978_v55  ;;  %v2767_v55 = vld [vmem:[%s3823_s9] ss:$0 sm:$0xff] }
 0x358   : > { %v2132_v58 = vsel %vm2052_vm14, %v1984_v49, %v2092_v53  ;;  %vm2053_vm1 = vcmp.gt.f32.partialorder %v1987_v54, 0.0  ;;  %v2093_v59 = vmul.f32 0.2, %v1987_v54  ;;  %v3242_v53 = vld [vmem:[%s3821_s7 + $0x38] sm:$0xff]  }
 0x359   : > { %v2166_v60 = vmax.f32 %v2165_v38, %v2132_v58  ;;  %v2130_v61 = vsel %vm2050_vm15, %v1976_v51, %v2090_v56  ;;  %vm2051_vm2 = vcmp.gt.f32.partialorder %v1979_v57, 0.0  ;;  %v2091_v62 = vmul.f32 0.2, %v1979_v57  ;;  %v3238_v51 = vld [vmem:[%s3821_s7 + $0x18] sm:$0xff]  }
 0x35a   : > { %v2148_v63 = vmax.f32 %v2147_v42, %v2130_v61  ;;  %v2133_v0 = vsel %vm2053_vm1, %v1987_v54, %v2093_v59  ;;  %v3250_v54 = vld [vmem:[%s3824_s10 + $0x38] sm:$0xff]  }
 0x35b   : > { %v2175_v1 = vmax.f32 %v2174_v45, %v2133_v0  ;;  %v2131_v2 = vsel %vm2051_vm2, %v1979_v57, %v2091_v62  ;;  %v3116_v3 = vpop.f32.mrb[72].mxu0  ;;  %3176 = vmatprep.subr.bf16.mxu0 %v3250_v54 }
 0x35c   : > { %v2157_v6 = vmax.f32 %v2156_v48, %v2131_v2  ;;  %v2000_v40 = vadd.f32 %v3116_v3, %v3721_v26  ;;  %v1991_v5 = vpop.f32.mrb[73].mxu0  ;;  %3177 = vmatpush3.bf16.msra.mxu0 %v3250_v54 }
 0x35d   : > { %v1992_v4 = vadd.f32 %v3721_v26, %v1991_v5  ;;  %v3117_v9 = vpop.f32.mrb[74].mxu0 }
 0x35e   : > { %vm2056_vm3 = vcmp.gt.f32.partialorder %v2000_v40, 0.0  ;;  %v2096_v7 = vmul.f32 0.2, %v2000_v40  ;;  %v2003_v10 = vadd.f32 %v3117_v9, %v3721_v26  ;;  %v1994_v8 = vpop.f32.mrb[75].mxu0 }
 0x35f   : > { %vm2054_vm4 = vcmp.gt.f32.partialorder %v1992_v4, 0.0  ;;  %v2094_v12 = vmul.f32 0.2, %v1992_v4  ;;  %v1995_v44 = vadd.f32 %v3721_v26, %v1994_v8 }
 0x360   : > { %v2136_v11 = vsel %vm2056_vm3, %v2000_v40, %v2096_v7  ;;  %vm2057_vm5 = vcmp.gt.f32.partialorder %v2003_v10, 0.0  ;;  %v2097_v13 = vmul.f32 0.2, %v2003_v10  ;;  %v2768_v7 = vld [vmem:[%s3825_s11] ss:$0 sm:$0xff] }
 0x361   : > { %v2167_v14 = vmax.f32 %v2166_v60, %v2136_v11  ;;  %v2134_v15 = vsel %vm2054_vm4, %v1992_v4, %v2094_v12  ;;  %vm2055_vm6 = vcmp.gt.f32.partialorder %v1995_v44, 0.0  ;;  %v2095_v21 = vmul.f32 0.2, %v1995_v44 }
 0x362   : > { %v2149_v18 = vmax.f32 %v2148_v63, %v2134_v15  ;;  %v2137_v22 = vsel %vm2057_vm5, %v2003_v10, %v2097_v13 }
 0x363   : > { %v2176_v23 = vmax.f32 %v2175_v1, %v2137_v22  ;;  %v2135_v24 = vsel %vm2055_vm6, %v1995_v44, %v2095_v21  ;;  %v3120_v25 = vpop.f32.mrb[76].mxu0 }
 0x364   : > { %v2158_v20 = vmax.f32 %v2157_v6, %v2135_v24  ;;  %v2016_v27 = vadd.f32 %v3120_v25, %v3721_v26  ;;  %v2007_v28 = vpop.f32.mrb[77].mxu0 }
 0x365   : > { %v2008_v29 = vadd.f32 %v3721_v26, %v2007_v28  ;;  %v3121_v30 = vpop.f32.mrb[78].mxu0 }
 0x366   : > { %vm2060_vm7 = vcmp.gt.f32.partialorder %v2016_v27, 0.0  ;;  %v2100_v31 = vmul.f32 0.2, %v2016_v27  ;;  %v2019_v32 = vadd.f32 %v3121_v30, %v3721_v26  ;;  %v2010_v33 = vpop.f32.mrb[79].mxu0 }
 0x367   : > { %vm2058_vm8 = vcmp.gt.f32.partialorder %v2008_v29, 0.0  ;;  %v2098_v34 = vmul.f32 0.2, %v2008_v29  ;;  %v2011_v35 = vadd.f32 %v3721_v26, %v2010_v33  ;;  %v3237_v26 = vld [vmem:[%s3821_s7 + $0x10] sm:$0xff]  }
 0x368   : > { %v2140_v36 = vsel %vm2060_vm7, %v2016_v27, %v2100_v31  ;;  %vm2061_vm9 = vcmp.gt.f32.partialorder %v2019_v32, 0.0  ;;  %v2101_v37 = vmul.f32 0.2, %v2019_v32 }
 0x369   : > { %v2168_v38 = vmax.f32 %v2167_v14, %v2140_v36  ;;  %v2138_v39 = vsel %vm2058_vm8, %v2008_v29, %v2098_v34  ;;  %vm2059_vm10 = vcmp.gt.f32.partialorder %v2011_v35, 0.0  ;;  %v2099_v41 = vmul.f32 0.2, %v2011_v35 }
 0x36a   : > { %v2141_v42 = vsel %vm2061_vm9, %v2019_v32, %v2101_v37  ;;  %v2150_v43 = vmax.f32 %v2149_v18, %v2138_v39 }
 0x36b   : > { %v2177_v45 = vmax.f32 %v2176_v23, %v2141_v42  ;;  %v2139_v46 = vsel %vm2059_vm10, %v2011_v35, %v2099_v41 }
 0x36c   : > { %v2159_v47 = vmax.f32 %v2158_v20, %v2139_v46 }
 0x36d   : > { %v2195_v48 = vpack.c.bf16 %v2177_v45, %v2168_v38 }
 0x36e   : > { %v2194_v49 = vpack.c.bf16 %v2159_v47, %v2150_v43 }
 0x370   : > { %3138 = vmatprep.mubr.bf16.mxu1 %v2194_v49 }
 0x371   : > { %3139 = vmatmul.mubr.bf16.vlgmr.msra.gmra.mrb[44].mxu1 %v2195_v48 }
 0x372   : > { %3143 = vmatpush3.bf16.msra.mxu1 %v3703_v19  ;;  %3158 = vmatprep.mubr.bf16.mxu1 %v3363_v16  ;;  %v3240_v16 = vld [vmem:[%s3821_s7 + $0x28] sm:$0xff]   ;;  %v3241_v19 = vld [vmem:[%s3821_s7 + $0x30] sm:$0xff]  }
 0x373   : > { %3144 = vmatprep.subr.bf16.mxu1 %v3236_v50 }
 0x376   : > { %3145 = vmatpush3.bf16.msra.mxu1 %v3236_v50 }
 0x377   : > { %3146 = vmatprep.subr.bf16.mxu1 %v3237_v26 }
 0x37a   : > { %3147 = vmatpush3.bf16.msra.mxu1 %v3237_v26 }
 0x37b   : > { %3148 = vmatprep.subr.bf16.mxu1 %v3238_v51 }
 0x37e   : > { %3149 = vmatpush3.bf16.msra.mxu1 %v3238_v51 }
 0x37f   : > { %3150 = vmatprep.subr.bf16.mxu1 %v3239_v52 }
 0x382   : > { %3151 = vmatpush3.bf16.msra.mxu1 %v3239_v52 }
 0x383   : > { %3152 = vmatprep.subr.bf16.mxu1 %v3240_v16 }
 0x386   : > { %3153 = vmatpush3.bf16.msra.mxu1 %v3240_v16 }
 0x387   : > { %3154 = vmatprep.subr.bf16.mxu1 %v3241_v19 }
 0x38a   : > { %3155 = vmatpush3.bf16.msra.mxu1 %v3241_v19 }
 0x38b   : > { %3156 = vmatprep.subr.bf16.mxu1 %v3242_v53 }
 0x38e   : > { %3157 = vmatpush3.bf16.msra.mxu1 %v3242_v53 }
 0x391   : > { %3159 = vmatmul.mubr.bf16.vlgmr.msra.gmra.mrb[44].mxu1 %v3367_v17 }
 0x464   : > { %v3160_v56 = vpop.f32.mrb[44].mxu1 }
 0x465   : > { %v2415_v57 = vadd.f32 %v3160_v56, %v2767_v55  ;;  %v2391_v58 = vpop.f32.mrb[45].mxu1 }
 0x466   : > { %v2413_v59 = vadd.f32 %v2767_v55, %v2391_v58  ;;  %v3161_v60 = vpop.f32.mrb[46].mxu1 }
 0x467   : > { %v2423_v61 = vmul.f32 0.2, %v2415_v57  ;;  %v2416_v62 = vadd.f32 %v3161_v60, %v2767_v55  ;;  %v2394_v63 = vpop.f32.mrb[47].mxu1  ;;  %vm2419_vm0 = vcmp.gt.f32.partialorder %v2415_v57, 0.0 }
 0x468   : > { %v2421_v17 = vmul.f32 0.2, %v2413_v59  ;;  %v2414_v0 = vadd.f32 %v2767_v55, %v2394_v63  ;;  %vm2417_vm11 = vcmp.gt.f32.partialorder %v2413_v59, 0.0 }
 0x469   : > { %vm2420_vm12 = vcmp.gt.f32.partialorder %v2416_v62, 0.0  ;;  %v2424_v1 = vmul.f32 0.2, %v2416_v62  ;;  %v2427_v3 = vsel %vm2419_vm0, %v2415_v57, %v2423_v61 }
 0x46a   : > { %vm2418_vm13 = vcmp.gt.f32.partialorder %v2414_v0, 0.0  ;;  %v2422_v2 = vmul.f32 0.2, %v2414_v0  ;;  %v2425_v5 = vsel %vm2417_vm11, %v2413_v59, %v2421_v17 }
 0x46b   : > { %v2428_v6 = vsel %vm2420_vm12, %v2416_v62, %v2424_v1 }
 0x46c   : > { %v2430_v40 = vpack.c.bf16 %v2428_v6, %v2427_v3  ;;  %v2426_v4 = vsel %vm2418_vm13, %v2414_v0, %v2422_v2 }
 0x46d   : > { %v2429_v9 = vpack.c.bf16 %v2426_v4, %v2425_v5 }
 0x46f   : > { %3178 = vmatprep.mubr.bf16.mxu0 %v2429_v9 }
 0x470   : > { %3179 = vmatmul.mubr.bf16.vlgmr.msra.gmra.mrb[80].mxu0 %v2430_v40 }
 0x543   : > { %v3180_v10 = vpop.f32.mrb[80].mxu0 }
 0x544   : > { %v2545_v8 = vadd.f32 %v3180_v10, %v2768_v7  ;;  %v2536_v12 = vpop.f32.mrb[81].mxu0 }
 0x545   : > { %v2537_v44 = vadd.f32 %v2768_v7, %v2536_v12  ;;  %v3181_v11 = vpop.f32.mrb[82].mxu0 }
 0x546   : > { %vm2553_vm14 = vcmp.gt.f32.partialorder %v2545_v8, 0.0  ;;  %v2557_v13 = vmul.f32 0.2, %v2545_v8  ;;  %v2548_v14 = vadd.f32 %v3181_v11, %v2768_v7  ;;  %v2539_v15 = vpop.f32.mrb[83].mxu0 }
 0x547   : > { %vm2551_vm15 = vcmp.gt.f32.partialorder %v2537_v44, 0.0  ;;  %v2555_v21 = vmul.f32 0.2, %v2537_v44  ;;  %v2540_v18 = vadd.f32 %v2768_v7, %v2539_v15 }
 0x548   : > { %v2561_v22 = vsel %vm2553_vm14, %v2545_v8, %v2557_v13  ;;  %vm2554_vm1 = vcmp.gt.f32.partialorder %v2548_v14, 0.0  ;;  %v2558_v23 = vmul.f32 0.2, %v2548_v14 }
 0x549   : > { %2565 = vst [vmem:[%s433_s14 + $0x10] sm:$0xff] %v2561_v22  ;;  %v2559_v24 = vsel %vm2551_vm15, %v2537_v44, %v2555_v21  ;;  %vm2552_vm2 = vcmp.gt.f32.partialorder %v2540_v18, 0.0  ;;  %v2556_v25 = vmul.f32 0.2, %v2540_v18 }
 0x54a   : > { %2563 = vst [vmem:[%s433_s14] sm:$0xff] %v2559_v24  ;;  %v2562_v20 = vsel %vm2554_vm1, %v2548_v14, %v2558_v23 }
 0x54b   : > { %2566 = vst [vmem:[%s433_s14 + $0x18] sm:$0xff] %v2562_v20  ;;  %v2560_v27 = vsel %vm2552_vm2, %v2540_v18, %v2556_v25 }
 0x54c   : > { %2564 = vst [vmem:[%s433_s14 + $0x8] sm:$0xff] %v2560_v27 }
 0x54d PF: > { %s22_s21 = sadd.s32 1, %s3257_s21  }
 0x54e   : > { %p19_p4 = scmp.ge.s32.totalorder %s22_s21, 4  }
 0x550   :  { %21 = sbr.rel (!%p19_p4) target bundleno = 1 (0x1), region = 101 }

</bundles_post_ra>
